<compile_context>
chip_gen: v7x
topology: tpu7x:2x2x1
jax: 0.10.0
libtpu: 0.0.40
codegen_flags: <defaults>
</compile_context>

<pallas_src>
import functools

import jax
import jax.numpy as jnp
from jax import lax
from jax.experimental import pallas as pl
from jax.experimental.pallas import tpu as pltpu


def _round_up(v, m):
    return (v + m - 1) // m * m


def _vmem_limit_bytes():
    """Explicit scoped-VMEM limit with headroom (defaults are far below physical)."""
    try:
        cap = int(pltpu.get_tpu_info().vmem_capacity_bytes)
    except Exception:
        cap = 64 * 1024 * 1024          # conservative fallback (v7x physical)
    return max(32 * 1024 * 1024, (cap * 3) // 4)


# ---------------------------------------------------------------------------
# Pallas kernel: whole forward pass (LSTM recurrence + fc1 + deep MLP head)
# ---------------------------------------------------------------------------
def lstm_forecaster_kernel(
    x_ref,      # (1, S*TB, F)         f32   time-major flattened input tile
    wih_ref,    # (F, 4*GP)            bf16  W_ih^T, gates (i,f,o,g), 128-lane padded
    whh_ref,    # (GP, 4*GP)           bf16  W_hh^T, reordered, padded
    b_ref,      # (1, 4*GP)            f32   b_ih + b_hh, reordered, padded
    w1_ref,     # (S, GP, HP)          bf16  fc1 weight^T split per time step, padded
    b1_ref,     # (1, HP)              f32
    wd_ref,     # (max(L,1), HP, HP)   bf16  deep hidden weights^T (dummy if L==0)
    bd_ref,     # (max(L,1), 1, HP)    f32
    wo_ref,     # (HP, n_out)          bf16  final weight^T
    bo_ref,     # (1, n_out)           f32
    out_ref,    # (TB, n_out)          f32
    gx_ref,     # scratch (S*TB, 4*GP) f32 : hoisted x-projection (+bias)
    z_ref,      # scratch (TB, HP)     f32 : fc1 accumulator  sum_t h_t @ w1[t]
    *,
    seq_len,
    n_hidden_layers,
):
    S = seq_len
    TB = x_ref.shape[1] // S
    GP = whh_ref.shape[0]

    # ---- 1. hoisted input projection (bias folded): one big-M matmul -------
    x_flat = x_ref[0].astype(jnp.bfloat16)                       # (S*TB, F)
    gx_ref[...] = (
        jnp.dot(x_flat, wih_ref[...], preferred_element_type=jnp.float32)
        + b_ref[...]
    )

    # fc1 accumulator (scratch persists across grid steps -> re-zero each tile)
    z_ref[...] = jnp.zeros_like(z_ref)

    # ---- 2. LSTM recurrence: only h @ W_hh stays on the serial chain -------
    hb = jnp.zeros((TB, GP), jnp.bfloat16)   # h carried as the bf16 matmul operand
    c = jnp.zeros((TB, GP), jnp.float32)

    def cell(gates_x, w1_t, hb, c):
        gates = gates_x + jnp.dot(hb, whh_ref[...],
                                  preferred_element_type=jnp.float32)  # (TB, 4GP)
        # gate layout (i | f | o | g): one wide sigmoid slab + one tanh slab
        sig = jax.nn.sigmoid(gates[:, 0:3 * GP])
        i_g = sig[:, 0 * GP:1 * GP]
        f_g = sig[:, 1 * GP:2 * GP]
        o_g = sig[:, 2 * GP:3 * GP]
        g_g = jnp.tanh(gates[:, 3 * GP:4 * GP])
        c_new = f_g * c + i_g * g_g            # f32 state math (v5e: no bf16 VPU/EUP)
        h_new = o_g * jnp.tanh(c_new)
        hb_new = h_new.astype(jnp.bfloat16)
        # deferred fc1: per-step accumulation, off the serial chain (MXU slack).
        z_ref[...] += jnp.dot(hb_new, w1_t, preferred_element_type=jnp.float32)
        return hb_new, c_new

    if S <= 8 and TB <= 32:
        # small working set: full static unroll (best LLO scheduling)
        for t in range(S):
            hb, c = cell(gx_ref[t * TB:(t + 1) * TB, :], w1_ref[t], hb, c)
    else:
        # large TB*GP: bound live ranges with a fori_loop carry
        def body(t, carry):
            hb, c = carry
            row = pl.multiple_of(t * TB, TB)
            return cell(gx_ref[pl.ds(row, TB), :], w1_ref[t], hb, c)
        hb, c = lax.fori_loop(0, S, body, (hb, c), unroll=2)

    # ---- 3. fc1 bias + deep dense head (dropout = identity, inference) -----
    z = z_ref[...] + b1_ref[...]
    for l in range(n_hidden_layers):
        z = jnp.maximum(z, 0.0)
        z = jnp.dot(z.astype(jnp.bfloat16), wd_ref[l],
                    preferred_element_type=jnp.float32) + bd_ref[l]
    z = jnp.maximum(z, 0.0)
    z = jnp.dot(z.astype(jnp.bfloat16), wo_ref[...],
                preferred_element_type=jnp.float32) + bo_ref[...]

    # n_outputs (=1) < 128 lanes -> masked store; negligible at this size.
    out_ref[...] = z.astype(out_ref.dtype)


# ---------------------------------------------------------------------------
# Batch-tile selection
# ---------------------------------------------------------------------------
def _choose_tiles(batch, seq_len, gp, vmem_budget):
    """Pick (TB, nb).  TB >= 16; whole batch in one tile when small; nb >= 2
    when it splits cleanly (megacore on v7x); TB capped so the gx scratch
    (S*TB*4*GP f32) stays within ~1/8 of the VMEM budget."""
    gx_bytes_per_row = seq_len * 4 * gp * 4
    cap = (vmem_budget // 8) // max(gx_bytes_per_row, 1)
    cap = max(16, min(256, (cap // 16) * 16))
    bp = _round_up(batch, 16)
    if bp <= cap:
        if bp % 32 == 0:
            return bp // 2, 2      # nb = 2 so "parallel" can shard both TCs (v7x)
        return bp, 1
    nb = -(-bp // cap)
    return cap, nb


# ---------------------------------------------------------------------------
# Wrapper
# ---------------------------------------------------------------------------
def lstm_forecaster_forward(x, params):
    B, S, F = x.shape
    n_out = params["wo_t"].shape[1]
    GP = params["whh_t"].shape[0]
    HP = params["w1_r"].shape[2]
    L = params["n_hidden_layers"]

    vmem_limit = _vmem_limit_bytes()
    TB, nb = _choose_tiles(B, S, GP, vmem_limit)
    B_pad = TB * nb

    # time-major, batch padded to the tile, flattened per batch tile so the
    # kernel needs no in-kernel reshape: row = t*TB + j.
    # TODO(synk): this costs one (tiny) extra XLA pass over x vs feeding
    # (S, B_pad, F) directly; kept to avoid a second-minor-dim reshape in-kernel.
    x_t = jnp.transpose(x, (1, 0, 2))                              # (S, B, F)
    x_t = jnp.pad(x_t, ((0, 0), (0, B_pad - B), (0, 0)))           # (S, Bp, F)
    x_t = (x_t.reshape(S, nb, TB, F)
               .transpose(1, 0, 2, 3)
               .reshape(nb, S * TB, F))                            # (nb, S*TB, F)

    kernel = functools.partial(
        lstm_forecaster_kernel, seq_len=S, n_hidden_layers=L)

    def weight_spec(a):
        # grid-invariant weights: single-buffer (double-buffering is wasted VMEM)
        return pl.BlockSpec(a.shape, lambda b, _nd=a.ndim: (0,) * _nd,
                            pipeline_mode=pl.Buffered(1))

    args = (x_t,
            params["wih_t"], params["whh_t"], params["b_lstm"],
            params["w1_r"], params["b1"],
            params["wd_t"], params["bd"],
            params["wo_t"], params["bo"])

    in_specs = ([pl.BlockSpec((1, S * TB, F), lambda b: (b, 0, 0))]
                + [weight_spec(a) for a in args[1:]])

    out = pl.pallas_call(
        kernel,
        out_shape=jax.ShapeDtypeStruct((B_pad, n_out), jnp.float32),
        grid=(nb,),
        in_specs=in_specs,
        out_specs=pl.BlockSpec((TB, n_out), lambda b: (b, 0)),
        scratch_shapes=[
            pltpu.VMEM((S * TB, 4 * GP), jnp.float32),   # hoisted x-projection
            pltpu.VMEM((TB, HP), jnp.float32),           # fc1 accumulator
        ],
        compiler_params=pltpu.CompilerParams(
            dimension_semantics=("parallel",),           # shards across 2 TCs (v7x)
            vmem_limit_bytes=vmem_limit),
    )(*args)
    return out[:B]


# ---------------------------------------------------------------------------
# Parameter init (PyTorch-style uniform(-1/sqrt(fan), 1/sqrt(fan))), raw layout
# ---------------------------------------------------------------------------
def init_raw_params(key, n_features, n_hidden, n_outputs, seq_len, n_deep_layers):
    H, F, S = n_hidden, n_features, seq_len
    n_hidden_layers = max(n_deep_layers - 1, 0)
    keys = iter(jax.random.split(key, 6 + 2 * n_hidden_layers + 2))

    def u(k, shape, fan_in):
        bound = float(fan_in) ** -0.5
        return jax.random.uniform(k, shape, jnp.float32, -bound, bound)

    raw = {
        "w_ih": u(next(keys), (4 * H, F), H),
        "w_hh": u(next(keys), (4 * H, H), H),
        "b_ih": u(next(keys), (4 * H,), H),
        "b_hh": u(next(keys), (4 * H,), H),
        "w1":   u(next(keys), (H, H * S), H * S),
        "b1":   u(next(keys), (H,), H * S),
    }
    wd, bd = [], []
    for _ in range(n_hidden_layers):
        wd.append(u(next(keys), (H, H), H))
        bd.append(u(next(keys), (H,), H))
    raw["wd"], raw["bd"] = wd, bd
    raw["wo"] = u(next(keys), (n_outputs, H), H)
    raw["bo"] = u(next(keys), (n_outputs,), H)
    return raw


# ---------------------------------------------------------------------------
# Pack raw params into the kernel layout: transpose, gate reorder (i,f,o|g),
# per-gate 128-lane padding, bf16 matmul operands (biases stay f32).
# ---------------------------------------------------------------------------
_GATE_ORDER = (0, 1, 3, 2)   # PyTorch (i, f, g, o) -> kernel (i, f, o | g)


def pack_params(raw, seq_len):
    S = seq_len
    H = raw["w_hh"].shape[1]
    GP = _round_up(H, 128)     # per-gate lane padding
    HP = _round_up(H, 128)     # hidden width in the MLP head
    L = len(raw["wd"])

    def pad_gates(w_t):        # (in, 4H) -> (in, 4*GP), gates reordered, 128-aligned
        blocks = [jnp.pad(w_t[:, g * H:(g + 1) * H], ((0, 0), (0, GP - H)))
                  for g in _GATE_ORDER]
        return jnp.concatenate(blocks, axis=1)

    wih_t = pad_gates(raw["w_ih"].T)                                  # (F, 4GP)
    whh_t = jnp.pad(pad_gates(raw["w_hh"].T), ((0, GP - H), (0, 0)))  # (GP, 4GP)
    b = raw["b_ih"] + raw["b_hh"]
    b_pad = jnp.concatenate(
        [jnp.pad(b[g * H:(g + 1) * H], (0, GP - H)) for g in _GATE_ORDER])[None, :]

    # fc1: W1 (H, S*H);  w1_r[t, j, :] <-> W1^T[t*H + j, :]  (j < H)
    w1_t = raw["w1"].T.reshape(S, H, H)
    w1_pad = jnp.pad(w1_t, ((0, 0), (0, GP - H), (0, HP - H)))        # (S, GP, HP)
    b1_pad = jnp.pad(raw["b1"], (0, HP - H))[None, :]

    if L > 0:
        wd = jnp.stack([jnp.pad(w.T, ((0, HP - H), (0, HP - H)))
                        for w in raw["wd"]])                          # (L, HP, HP)
        bd = jnp.stack([jnp.pad(bv, (0, HP - H))[None, :]
                        for bv in raw["bd"]])                         # (L, 1, HP)
    else:
        # tiny unused dummies (never read when L == 0) -> negligible DMA
        wd = jnp.zeros((1, 8, 128), jnp.float32)
        bd = jnp.zeros((1, 1, 128), jnp.float32)

    wo_t = jnp.pad(raw["wo"].T, ((0, HP - H), (0, 0)))                # (HP, n_out)
    bo = raw["bo"][None, :]

    bf = lambda a: a.astype(jnp.bfloat16)
    return {
        "wih_t": bf(wih_t), "whh_t": bf(whh_t), "b_lstm": b_pad,
        "w1_r": bf(w1_pad), "b1": b1_pad,
        "wd_t": bf(wd), "bd": bd,
        "wo_t": bf(wo_t), "bo": bo,
        "n_hidden_layers": L,
    }


# ---------------------------------------------------------------------------
# Pure-JAX reference. mirror_bf16=True reproduces the kernel's bf16 matmul
# operands (tight check); mirror_bf16=False is the exact f32 PyTorch math.
# ---------------------------------------------------------------------------
def reference_forward(x, raw, mirror_bf16):
    def mm(a):
        return (a.astype(jnp.bfloat16).astype(jnp.float32)
                if mirror_bf16 else a)

    B, S, F = x.shape
    H = raw["w_hh"].shape[1]
    wih_t, whh_t = mm(raw["w_ih"].T), mm(raw["w_hh"].T)
    b = (raw["b_ih"] + raw["b_hh"])[None, :]
    h = jnp.zeros((B, H), jnp.float32)
    c = jnp.zeros((B, H), jnp.float32)
    outs = []
    for t in range(S):
        g = mm(x[:, t, :]) @ wih_t + mm(h) @ whh_t + b
        i = jax.nn.sigmoid(g[:, :H]); f = jax.nn.sigmoid(g[:, H:2 * H])
        gg = jnp.tanh(g[:, 2 * H:3 * H]); o = jax.nn.sigmoid(g[:, 3 * H:])
        c = f * c + i * gg
        h = o * jnp.tanh(c)
        outs.append(h)
    flat = jnp.concatenate(outs, axis=-1)                  # == x.view(B, -1)
    z = mm(flat) @ mm(raw["w1"].T) + raw["b1"][None, :]
    for l in range(len(raw["wd"])):
        z = jnp.maximum(z, 0.0)
        z = mm(z) @ mm(raw["wd"][l].T) + raw["bd"][l][None, :]
    z = jnp.maximum(z, 0.0)
    z = mm(z) @ mm(raw["wo"].T) + raw["bo"][None, :]
    return z


if __name__ == "__main__":
    # Small shapes consistent with the module's forward:
    batch, seq_len, n_features = 2, 8, 4
    n_hidden, n_outputs, n_deep_layers = 32, 1, 3

    key = jax.random.PRNGKey(0)
    k_x, k_p = jax.random.split(key)
    x = jax.random.normal(k_x, (batch, seq_len, n_features), jnp.float32)
    raw = init_raw_params(k_p, n_features, n_hidden, n_outputs, seq_len,
                          n_deep_layers)
    params = pack_params(raw, seq_len)

    out = lstm_forecaster_forward(x, params)
    out = jax.block_until_ready(out)
    assert out.shape == (batch, n_outputs)

    # tight check vs reference with matching bf16 matmul-operand rounding
    ref_bf = reference_forward(x, raw, mirror_bf16=True)
    assert jnp.allclose(out, ref_bf, atol=2e-3, rtol=2e-3), (out, ref_bf)
    # sanity check vs exact f32 PyTorch-equivalent math
    ref_f32 = reference_forward(x, raw, mirror_bf16=False)
    assert jnp.allclose(out, ref_f32, atol=5e-2, rtol=5e-2), (out, ref_f32)

    # TODO(synk): dropout implemented as identity (inference mode); training-
    # mode stochastic dropout is not reproduced.
    print("KERNEL_OK")
</pallas_src>

<mosaic_0001>
module attributes {stable_mosaic.version = 11 : i64} {
  func.func @lstm_forecaster_kernel(%arg0: i32, %arg1: memref<1x128x4xf32, #tpu.memory_space<vmem>>, %arg2: memref<4x512xbf16, #tpu.memory_space<vmem>>, %arg3: memref<128x512xbf16, #tpu.memory_space<vmem>>, %arg4: memref<1x512xf32, #tpu.memory_space<vmem>>, %arg5: memref<8x128x128xbf16, #tpu.memory_space<vmem>>, %arg6: memref<1x128xf32, #tpu.memory_space<vmem>>, %arg7: memref<2x128x128xbf16, #tpu.memory_space<vmem>>, %arg8: memref<2x1x128xf32, #tpu.memory_space<vmem>>, %arg9: memref<128x1xbf16, #tpu.memory_space<vmem>>, %arg10: memref<1x1xf32, #tpu.memory_space<vmem>>, %arg11: memref<16x1xf32, #tpu.memory_space<vmem>>, %arg12: memref<128x512xf32, #tpu.memory_space<vmem>>, %arg13: memref<16x128xf32, #tpu.memory_space<vmem>>) attributes {dimension_semantics = [#tpu.dimension_semantics<parallel>], iteration_bounds = array<i64: 1>, scalar_prefetch = 0 : i64, scratch_operands = 2 : i64, tpu.core_type = #tpu.core_type<tc>, window_params = [{transform_indices = @transform_0, window_bounds = array<i64: 1, 128, 4>}, {pipeline_mode = #tpu.pipeline_mode<synchronous>, transform_indices = @transform_1, window_bounds = array<i64: 4, 512>}, {pipeline_mode = #tpu.pipeline_mode<synchronous>, transform_indices = @transform_2, window_bounds = array<i64: 128, 512>}, {pipeline_mode = #tpu.pipeline_mode<synchronous>, transform_indices = @transform_3, window_bounds = array<i64: 1, 512>}, {pipeline_mode = #tpu.pipeline_mode<synchronous>, transform_indices = @transform_4, window_bounds = array<i64: 8, 128, 128>}, {pipeline_mode = #tpu.pipeline_mode<synchronous>, transform_indices = @transform_5, window_bounds = array<i64: 1, 128>}, {pipeline_mode = #tpu.pipeline_mode<synchronous>, transform_indices = @transform_6, window_bounds = array<i64: 2, 128, 128>}, {pipeline_mode = #tpu.pipeline_mode<synchronous>, transform_indices = @transform_7, window_bounds = array<i64: 2, 1, 128>}, {pipeline_mode = #tpu.pipeline_mode<synchronous>, transform_indices = @transform_8, window_bounds = array<i64: 128, 1>}, {pipeline_mode = #tpu.pipeline_mode<synchronous>, transform_indices = @transform_9, window_bounds = array<i64: 1, 1>}, {transform_indices = @transform_10, window_bounds = array<i64: 16, 1>}]} {
    %c0 = arith.constant 0 : index
    %c0_0 = arith.constant 0 : index
    %c0_1 = arith.constant 0 : index
    %0 = vector.load %arg1[%c0, %c0_0, %c0_1] : memref<1x128x4xf32, #tpu.memory_space<vmem>>, vector<1x128x4xf32>
    %1 = vector.shape_cast %0 : vector<1x128x4xf32> to vector<128x4xf32>
    %2 = arith.truncf %1 : vector<128x4xf32> to vector<128x4xbf16>
    %c0_2 = arith.constant 0 : index
    %c0_3 = arith.constant 0 : index
    %3 = vector.load %arg2[%c0_2, %c0_3] : memref<4x512xbf16, #tpu.memory_space<vmem>>, vector<4x512xbf16>
    %cst = arith.constant dense<0.000000e+00> : vector<128x512xf32>
    %4 = tpu.matmul %2, %3, %cst {dimension_numbers = #tpu.dot_dimension_numbers<[1], [0], [0], [1], [0, 0, 1, 1], [], []>} : vector<128x4xbf16>, vector<4x512xbf16>, vector<128x512xf32> -> vector<128x512xf32>
    %c0_4 = arith.constant 0 : index
    %c0_5 = arith.constant 0 : index
    %5 = vector.load %arg4[%c0_4, %c0_5] : memref<1x512xf32, #tpu.memory_space<vmem>>, vector<1x512xf32>
    %6 = vector.broadcast %5 : vector<1x512xf32> to vector<128x512xf32>
    %7 = arith.addf %4, %6 : vector<128x512xf32>
    %c0_6 = arith.constant 0 : index
    %c0_7 = arith.constant 0 : index
    %8 = vector.load %arg12[%c0_6, %c0_7] : memref<128x512xf32, #tpu.memory_space<vmem>>, vector<128x512xf32>
    tpu.vector_store %arg12[%c0_6, %c0_7], %7 {strides = array<i32>} : memref<128x512xf32, #tpu.memory_space<vmem>>, vector<128x512xf32>,
    %cst_8 = arith.constant 0.000000e+00 : f32
    %9 = vector.broadcast %cst_8 : f32 to vector<16x128xf32>
    %c0_9 = arith.constant 0 : index
    %c0_10 = arith.constant 0 : index
    %10 = vector.load %arg13[%c0_9, %c0_10] : memref<16x128xf32, #tpu.memory_space<vmem>>, vector<16x128xf32>
    tpu.vector_store %arg13[%c0_9, %c0_10], %9 {strides = array<i32>} : memref<16x128xf32, #tpu.memory_space<vmem>>, vector<16x128xf32>,
    %cst_11 = arith.constant 0.000000e+00 : bf16
    %11 = vector.broadcast %cst_11 : bf16 to vector<16x128xbf16>
    %cst_12 = arith.constant 0.000000e+00 : f32
    %12 = vector.broadcast %cst_12 : f32 to vector<16x128xf32>
    %c0_13 = arith.constant 0 : index
    %c0_14 = arith.constant 0 : index
    %13 = vector.load %arg12[%c0_13, %c0_14] : memref<128x512xf32, #tpu.memory_space<vmem>>, vector<16x512xf32>
    %c0_15 = arith.constant 0 : index
    %c0_16 = arith.constant 0 : index
    %c0_17 = arith.constant 0 : index
    %14 = vector.load %arg5[%c0_15, %c0_16, %c0_17] : memref<8x128x128xbf16, #tpu.memory_space<vmem>>, vector<1x128x128xbf16>
    %15 = vector.shape_cast %14 : vector<1x128x128xbf16> to vector<128x128xbf16>
    %c0_18 = arith.constant 0 : index
    %c0_19 = arith.constant 0 : index
    %16 = vector.load %arg3[%c0_18, %c0_19] : memref<128x512xbf16, #tpu.memory_space<vmem>>, vector<128x512xbf16>
    %cst_20 = arith.constant dense<0.000000e+00> : vector<16x512xf32>
    %17 = tpu.matmul %11, %16, %cst_20 {dimension_numbers = #tpu.dot_dimension_numbers<[1], [0], [0], [1], [0, 0, 1, 1], [], []>} : vector<16x128xbf16>, vector<128x512xbf16>, vector<16x512xf32> -> vector<16x512xf32>
    %18 = arith.addf %13, %17 : vector<16x512xf32>
    %19 = vector.extract_strided_slice %18 {offsets = [0, 0], sizes = [16, 384], strides = [1, 1]} : vector<16x512xf32> to vector<16x384xf32>
    %20 = arith.negf %19 : vector<16x384xf32>
    %21 = math.exp %20 : vector<16x384xf32>
    %cst_21 = arith.constant 1.000000e+00 : f32
    %22 = vector.broadcast %cst_21 : f32 to vector<16x384xf32>
    %23 = arith.addf %22, %21 : vector<16x384xf32>
    %24 = arith.divf %22, %23 : vector<16x384xf32>
    %25 = vector.extract_strided_slice %24 {offsets = [0, 0], sizes = [16, 128], strides = [1, 1]} : vector<16x384xf32> to vector<16x128xf32>
    %26 = vector.extract_strided_slice %24 {offsets = [0, 128], sizes = [16, 128], strides = [1, 1]} : vector<16x384xf32> to vector<16x128xf32>
    %27 = vector.extract_strided_slice %24 {offsets = [0, 256], sizes = [16, 128], strides = [1, 1]} : vector<16x384xf32> to vector<16x128xf32>
    %28 = vector.extract_strided_slice %18 {offsets = [0, 384], sizes = [16, 128], strides = [1, 1]} : vector<16x512xf32> to vector<16x128xf32>
    %29 = math.tanh %28 : vector<16x128xf32>
    %30 = arith.mulf %26, %12 : vector<16x128xf32>
    %31 = arith.mulf %25, %29 : vector<16x128xf32>
    %32 = arith.addf %30, %31 : vector<16x128xf32>
    %33 = math.tanh %32 : vector<16x128xf32>
    %34 = arith.mulf %27, %33 : vector<16x128xf32>
    %35 = arith.truncf %34 : vector<16x128xf32> to vector<16x128xbf16>
    %c0_22 = arith.constant 0 : index
    %c0_23 = arith.constant 0 : index
    %36 = vector.load %arg13[%c0_22, %c0_23] : memref<16x128xf32, #tpu.memory_space<vmem>>, vector<16x128xf32>
    %cst_24 = arith.constant dense<0.000000e+00> : vector<16x128xf32>
    %37 = tpu.matmul %35, %15, %cst_24 {dimension_numbers = #tpu.dot_dimension_numbers<[1], [0], [0], [1], [0, 0, 1, 1], [], []>} : vector<16x128xbf16>, vector<128x128xbf16>, vector<16x128xf32> -> vector<16x128xf32>
    %38 = arith.addf %36, %37 : vector<16x128xf32>
    %c0_25 = arith.constant 0 : index
    %c0_26 = arith.constant 0 : index
    %39 = vector.load %arg13[%c0_25, %c0_26] : memref<16x128xf32, #tpu.memory_space<vmem>>, vector<16x128xf32>
    tpu.vector_store %arg13[%c0_25, %c0_26], %38 {strides = array<i32>} : memref<16x128xf32, #tpu.memory_space<vmem>>, vector<16x128xf32>,
    %c16 = arith.constant 16 : index
    %c0_27 = arith.constant 0 : index
    %40 = vector.load %arg12[%c16, %c0_27] : memref<128x512xf32, #tpu.memory_space<vmem>>, vector<16x512xf32>
    %c1 = arith.constant 1 : index
    %c0_28 = arith.constant 0 : index
    %c0_29 = arith.constant 0 : index
    %41 = vector.load %arg5[%c1, %c0_28, %c0_29] : memref<8x128x128xbf16, #tpu.memory_space<vmem>>, vector<1x128x128xbf16>
    %42 = vector.shape_cast %41 : vector<1x128x128xbf16> to vector<128x128xbf16>
    %c0_30 = arith.constant 0 : index
    %c0_31 = arith.constant 0 : index
    %43 = vector.load %arg3[%c0_30, %c0_31] : memref<128x512xbf16, #tpu.memory_space<vmem>>, vector<128x512xbf16>
    %cst_32 = arith.constant dense<0.000000e+00> : vector<16x512xf32>
    %44 = tpu.matmul %35, %43, %cst_32 {dimension_numbers = #tpu.dot_dimension_numbers<[1], [0], [0], [1], [0, 0, 1, 1], [], []>} : vector<16x128xbf16>, vector<128x512xbf16>, vector<16x512xf32> -> vector<16x512xf32>
    %45 = arith.addf %40, %44 : vector<16x512xf32>
    %46 = vector.extract_strided_slice %45 {offsets = [0, 0], sizes = [16, 384], strides = [1, 1]} : vector<16x512xf32> to vector<16x384xf32>
    %47 = arith.negf %46 : vector<16x384xf32>
    %48 = math.exp %47 : vector<16x384xf32>
    %cst_33 = arith.constant 1.000000e+00 : f32
    %49 = vector.broadcast %cst_33 : f32 to vector<16x384xf32>
    %50 = arith.addf %49, %48 : vector<16x384xf32>
    %51 = arith.divf %49, %50 : vector<16x384xf32>
    %52 = vector.extract_strided_slice %51 {offsets = [0, 0], sizes = [16, 128], strides = [1, 1]} : vector<16x384xf32> to vector<16x128xf32>
    %53 = vector.extract_strided_slice %51 {offsets = [0, 128], sizes = [16, 128], strides = [1, 1]} : vector<16x384xf32> to vector<16x128xf32>
    %54 = vector.extract_strided_slice %51 {offsets = [0, 256], sizes = [16, 128], strides = [1, 1]} : vector<16x384xf32> to vector<16x128xf32>
    %55 = vector.extract_strided_slice %45 {offsets = [0, 384], sizes = [16, 128], strides = [1, 1]} : vector<16x512xf32> to vector<16x128xf32>
    %56 = math.tanh %55 : vector<16x128xf32>
    %57 = arith.mulf %53, %32 : vector<16x128xf32>
    %58 = arith.mulf %52, %56 : vector<16x128xf32>
    %59 = arith.addf %57, %58 : vector<16x128xf32>
    %60 = math.tanh %59 : vector<16x128xf32>
    %61 = arith.mulf %54, %60 : vector<16x128xf32>
    %62 = arith.truncf %61 : vector<16x128xf32> to vector<16x128xbf16>
    %c0_34 = arith.constant 0 : index
    %c0_35 = arith.constant 0 : index
    %63 = vector.load %arg13[%c0_34, %c0_35] : memref<16x128xf32, #tpu.memory_space<vmem>>, vector<16x128xf32>
    %cst_36 = arith.constant dense<0.000000e+00> : vector<16x128xf32>
    %64 = tpu.matmul %62, %42, %cst_36 {dimension_numbers = #tpu.dot_dimension_numbers<[1], [0], [0], [1], [0, 0, 1, 1], [], []>} : vector<16x128xbf16>, vector<128x128xbf16>, vector<16x128xf32> -> vector<16x128xf32>
    %65 = arith.addf %63, %64 : vector<16x128xf32>
    %c0_37 = arith.constant 0 : index
    %c0_38 = arith.constant 0 : index
    %66 = vector.load %arg13[%c0_37, %c0_38] : memref<16x128xf32, #tpu.memory_space<vmem>>, vector<16x128xf32>
    tpu.vector_store %arg13[%c0_37, %c0_38], %65 {strides = array<i32>} : memref<16x128xf32, #tpu.memory_space<vmem>>, vector<16x128xf32>,
    %c32 = arith.constant 32 : index
    %c0_39 = arith.constant 0 : index
    %67 = vector.load %arg12[%c32, %c0_39] : memref<128x512xf32, #tpu.memory_space<vmem>>, vector<16x512xf32>
    %c2 = arith.constant 2 : index
    %c0_40 = arith.constant 0 : index
    %c0_41 = arith.constant 0 : index
    %68 = vector.load %arg5[%c2, %c0_40, %c0_41] : memref<8x128x128xbf16, #tpu.memory_space<vmem>>, vector<1x128x128xbf16>
    %69 = vector.shape_cast %68 : vector<1x128x128xbf16> to vector<128x128xbf16>
    %c0_42 = arith.constant 0 : index
    %c0_43 = arith.constant 0 : index
    %70 = vector.load %arg3[%c0_42, %c0_43] : memref<128x512xbf16, #tpu.memory_space<vmem>>, vector<128x512xbf16>
    %cst_44 = arith.constant dense<0.000000e+00> : vector<16x512xf32>
    %71 = tpu.matmul %62, %70, %cst_44 {dimension_numbers = #tpu.dot_dimension_numbers<[1], [0], [0], [1], [0, 0, 1, 1], [], []>} : vector<16x128xbf16>, vector<128x512xbf16>, vector<16x512xf32> -> vector<16x512xf32>
    %72 = arith.addf %67, %71 : vector<16x512xf32>
    %73 = vector.extract_strided_slice %72 {offsets = [0, 0], sizes = [16, 384], strides = [1, 1]} : vector<16x512xf32> to vector<16x384xf32>
    %74 = arith.negf %73 : vector<16x384xf32>
    %75 = math.exp %74 : vector<16x384xf32>
    %cst_45 = arith.constant 1.000000e+00 : f32
    %76 = vector.broadcast %cst_45 : f32 to vector<16x384xf32>
    %77 = arith.addf %76, %75 : vector<16x384xf32>
    %78 = arith.divf %76, %77 : vector<16x384xf32>
    %79 = vector.extract_strided_slice %78 {offsets = [0, 0], sizes = [16, 128], strides = [1, 1]} : vector<16x384xf32> to vector<16x128xf32>
    %80 = vector.extract_strided_slice %78 {offsets = [0, 128], sizes = [16, 128], strides = [1, 1]} : vector<16x384xf32> to vector<16x128xf32>
    %81 = vector.extract_strided_slice %78 {offsets = [0, 256], sizes = [16, 128], strides = [1, 1]} : vector<16x384xf32> to vector<16x128xf32>
    %82 = vector.extract_strided_slice %72 {offsets = [0, 384], sizes = [16, 128], strides = [1, 1]} : vector<16x512xf32> to vector<16x128xf32>
    %83 = math.tanh %82 : vector<16x128xf32>
    %84 = arith.mulf %80, %59 : vector<16x128xf32>
    %85 = arith.mulf %79, %83 : vector<16x128xf32>
    %86 = arith.addf %84, %85 : vector<16x128xf32>
    %87 = math.tanh %86 : vector<16x128xf32>
    %88 = arith.mulf %81, %87 : vector<16x128xf32>
    %89 = arith.truncf %88 : vector<16x128xf32> to vector<16x128xbf16>
    %c0_46 = arith.constant 0 : index
    %c0_47 = arith.constant 0 : index
    %90 = vector.load %arg13[%c0_46, %c0_47] : memref<16x128xf32, #tpu.memory_space<vmem>>, vector<16x128xf32>
    %cst_48 = arith.constant dense<0.000000e+00> : vector<16x128xf32>
    %91 = tpu.matmul %89, %69, %cst_48 {dimension_numbers = #tpu.dot_dimension_numbers<[1], [0], [0], [1], [0, 0, 1, 1], [], []>} : vector<16x128xbf16>, vector<128x128xbf16>, vector<16x128xf32> -> vector<16x128xf32>
    %92 = arith.addf %90, %91 : vector<16x128xf32>
    %c0_49 = arith.constant 0 : index
    %c0_50 = arith.constant 0 : index
    %93 = vector.load %arg13[%c0_49, %c0_50] : memref<16x128xf32, #tpu.memory_space<vmem>>, vector<16x128xf32>
    tpu.vector_store %arg13[%c0_49, %c0_50], %92 {strides = array<i32>} : memref<16x128xf32, #tpu.memory_space<vmem>>, vector<16x128xf32>,
    %c48 = arith.constant 48 : index
    %c0_51 = arith.constant 0 : index
    %94 = vector.load %arg12[%c48, %c0_51] : memref<128x512xf32, #tpu.memory_space<vmem>>, vector<16x512xf32>
    %c3 = arith.constant 3 : index
    %c0_52 = arith.constant 0 : index
    %c0_53 = arith.constant 0 : index
    %95 = vector.load %arg5[%c3, %c0_52, %c0_53] : memref<8x128x128xbf16, #tpu.memory_space<vmem>>, vector<1x128x128xbf16>
    %96 = vector.shape_cast %95 : vector<1x128x128xbf16> to vector<128x128xbf16>
    %c0_54 = arith.constant 0 : index
    %c0_55 = arith.constant 0 : index
    %97 = vector.load %arg3[%c0_54, %c0_55] : memref<128x512xbf16, #tpu.memory_space<vmem>>, vector<128x512xbf16>
    %cst_56 = arith.constant dense<0.000000e+00> : vector<16x512xf32>
    %98 = tpu.matmul %89, %97, %cst_56 {dimension_numbers = #tpu.dot_dimension_numbers<[1], [0], [0], [1], [0, 0, 1, 1], [], []>} : vector<16x128xbf16>, vector<128x512xbf16>, vector<16x512xf32> -> vector<16x512xf32>
    %99 = arith.addf %94, %98 : vector<16x512xf32>
    %100 = vector.extract_strided_slice %99 {offsets = [0, 0], sizes = [16, 384], strides = [1, 1]} : vector<16x512xf32> to vector<16x384xf32>
    %101 = arith.negf %100 : vector<16x384xf32>
    %102 = math.exp %101 : vector<16x384xf32>
    %cst_57 = arith.constant 1.000000e+00 : f32
    %103 = vector.broadcast %cst_57 : f32 to vector<16x384xf32>
    %104 = arith.addf %103, %102 : vector<16x384xf32>
    %105 = arith.divf %103, %104 : vector<16x384xf32>
    %106 = vector.extract_strided_slice %105 {offsets = [0, 0], sizes = [16, 128], strides = [1, 1]} : vector<16x384xf32> to vector<16x128xf32>
    %107 = vector.extract_strided_slice %105 {offsets = [0, 128], sizes = [16, 128], strides = [1, 1]} : vector<16x384xf32> to vector<16x128xf32>
    %108 = vector.extract_strided_slice %105 {offsets = [0, 256], sizes = [16, 128], strides = [1, 1]} : vector<16x384xf32> to vector<16x128xf32>
    %109 = vector.extract_strided_slice %99 {offsets = [0, 384], sizes = [16, 128], strides = [1, 1]} : vector<16x512xf32> to vector<16x128xf32>
    %110 = math.tanh %109 : vector<16x128xf32>
    %111 = arith.mulf %107, %86 : vector<16x128xf32>
    %112 = arith.mulf %106, %110 : vector<16x128xf32>
    %113 = arith.addf %111, %112 : vector<16x128xf32>
    %114 = math.tanh %113 : vector<16x128xf32>
    %115 = arith.mulf %108, %114 : vector<16x128xf32>
    %116 = arith.truncf %115 : vector<16x128xf32> to vector<16x128xbf16>
    %c0_58 = arith.constant 0 : index
    %c0_59 = arith.constant 0 : index
    %117 = vector.load %arg13[%c0_58, %c0_59] : memref<16x128xf32, #tpu.memory_space<vmem>>, vector<16x128xf32>
    %cst_60 = arith.constant dense<0.000000e+00> : vector<16x128xf32>
    %118 = tpu.matmul %116, %96, %cst_60 {dimension_numbers = #tpu.dot_dimension_numbers<[1], [0], [0], [1], [0, 0, 1, 1], [], []>} : vector<16x128xbf16>, vector<128x128xbf16>, vector<16x128xf32> -> vector<16x128xf32>
    %119 = arith.addf %117, %118 : vector<16x128xf32>
    %c0_61 = arith.constant 0 : index
    %c0_62 = arith.constant 0 : index
    %120 = vector.load %arg13[%c0_61, %c0_62] : memref<16x128xf32, #tpu.memory_space<vmem>>, vector<16x128xf32>
    tpu.vector_store %arg13[%c0_61, %c0_62], %119 {strides = array<i32>} : memref<16x128xf32, #tpu.memory_space<vmem>>, vector<16x128xf32>,
    %c64 = arith.constant 64 : index
    %c0_63 = arith.constant 0 : index
    %121 = vector.load %arg12[%c64, %c0_63] : memref<128x512xf32, #tpu.memory_space<vmem>>, vector<16x512xf32>
    %c4 = arith.constant 4 : index
    %c0_64 = arith.constant 0 : index
    %c0_65 = arith.constant 0 : index
    %122 = vector.load %arg5[%c4, %c0_64, %c0_65] : memref<8x128x128xbf16, #tpu.memory_space<vmem>>, vector<1x128x128xbf16>
    %123 = vector.shape_cast %122 : vector<1x128x128xbf16> to vector<128x128xbf16>
    %c0_66 = arith.constant 0 : index
    %c0_67 = arith.constant 0 : index
    %124 = vector.load %arg3[%c0_66, %c0_67] : memref<128x512xbf16, #tpu.memory_space<vmem>>, vector<128x512xbf16>
    %cst_68 = arith.constant dense<0.000000e+00> : vector<16x512xf32>
    %125 = tpu.matmul %116, %124, %cst_68 {dimension_numbers = #tpu.dot_dimension_numbers<[1], [0], [0], [1], [0, 0, 1, 1], [], []>} : vector<16x128xbf16>, vector<128x512xbf16>, vector<16x512xf32> -> vector<16x512xf32>
    %126 = arith.addf %121, %125 : vector<16x512xf32>
    %127 = vector.extract_strided_slice %126 {offsets = [0, 0], sizes = [16, 384], strides = [1, 1]} : vector<16x512xf32> to vector<16x384xf32>
    %128 = arith.negf %127 : vector<16x384xf32>
    %129 = math.exp %128 : vector<16x384xf32>
    %cst_69 = arith.constant 1.000000e+00 : f32
    %130 = vector.broadcast %cst_69 : f32 to vector<16x384xf32>
    %131 = arith.addf %130, %129 : vector<16x384xf32>
    %132 = arith.divf %130, %131 : vector<16x384xf32>
    %133 = vector.extract_strided_slice %132 {offsets = [0, 0], sizes = [16, 128], strides = [1, 1]} : vector<16x384xf32> to vector<16x128xf32>
    %134 = vector.extract_strided_slice %132 {offsets = [0, 128], sizes = [16, 128], strides = [1, 1]} : vector<16x384xf32> to vector<16x128xf32>
    %135 = vector.extract_strided_slice %132 {offsets = [0, 256], sizes = [16, 128], strides = [1, 1]} : vector<16x384xf32> to vector<16x128xf32>
    %136 = vector.extract_strided_slice %126 {offsets = [0, 384], sizes = [16, 128], strides = [1, 1]} : vector<16x512xf32> to vector<16x128xf32>
    %137 = math.tanh %136 : vector<16x128xf32>
    %138 = arith.mulf %134, %113 : vector<16x128xf32>
    %139 = arith.mulf %133, %137 : vector<16x128xf32>
    %140 = arith.addf %138, %139 : vector<16x128xf32>
    %141 = math.tanh %140 : vector<16x128xf32>
    %142 = arith.mulf %135, %141 : vector<16x128xf32>
    %143 = arith.truncf %142 : vector<16x128xf32> to vector<16x128xbf16>
    %c0_70 = arith.constant 0 : index
    %c0_71 = arith.constant 0 : index
    %144 = vector.load %arg13[%c0_70, %c0_71] : memref<16x128xf32, #tpu.memory_space<vmem>>, vector<16x128xf32>
    %cst_72 = arith.constant dense<0.000000e+00> : vector<16x128xf32>
    %145 = tpu.matmul %143, %123, %cst_72 {dimension_numbers = #tpu.dot_dimension_numbers<[1], [0], [0], [1], [0, 0, 1, 1], [], []>} : vector<16x128xbf16>, vector<128x128xbf16>, vector<16x128xf32> -> vector<16x128xf32>
    %146 = arith.addf %144, %145 : vector<16x128xf32>
    %c0_73 = arith.constant 0 : index
    %c0_74 = arith.constant 0 : index
    %147 = vector.load %arg13[%c0_73, %c0_74] : memref<16x128xf32, #tpu.memory_space<vmem>>, vector<16x128xf32>
    tpu.vector_store %arg13[%c0_73, %c0_74], %146 {strides = array<i32>} : memref<16x128xf32, #tpu.memory_space<vmem>>, vector<16x128xf32>,
    %c80 = arith.constant 80 : index
    %c0_75 = arith.constant 0 : index
    %148 = vector.load %arg12[%c80, %c0_75] : memref<128x512xf32, #tpu.memory_space<vmem>>, vector<16x512xf32>
    %c5 = arith.constant 5 : index
    %c0_76 = arith.constant 0 : index
    %c0_77 = arith.constant 0 : index
    %149 = vector.load %arg5[%c5, %c0_76, %c0_77] : memref<8x128x128xbf16, #tpu.memory_space<vmem>>, vector<1x128x128xbf16>
    %150 = vector.shape_cast %149 : vector<1x128x128xbf16> to vector<128x128xbf16>
    %c0_78 = arith.constant 0 : index
    %c0_79 = arith.constant 0 : index
    %151 = vector.load %arg3[%c0_78, %c0_79] : memref<128x512xbf16, #tpu.memory_space<vmem>>, vector<128x512xbf16>
    %cst_80 = arith.constant dense<0.000000e+00> : vector<16x512xf32>
    %152 = tpu.matmul %143, %151, %cst_80 {dimension_numbers = #tpu.dot_dimension_numbers<[1], [0], [0], [1], [0, 0, 1, 1], [], []>} : vector<16x128xbf16>, vector<128x512xbf16>, vector<16x512xf32> -> vector<16x512xf32>
    %153 = arith.addf %148, %152 : vector<16x512xf32>
    %154 = vector.extract_strided_slice %153 {offsets = [0, 0], sizes = [16, 384], strides = [1, 1]} : vector<16x512xf32> to vector<16x384xf32>
    %155 = arith.negf %154 : vector<16x384xf32>
    %156 = math.exp %155 : vector<16x384xf32>
    %cst_81 = arith.constant 1.000000e+00 : f32
    %157 = vector.broadcast %cst_81 : f32 to vector<16x384xf32>
    %158 = arith.addf %157, %156 : vector<16x384xf32>
    %159 = arith.divf %157, %158 : vector<16x384xf32>
    %160 = vector.extract_strided_slice %159 {offsets = [0, 0], sizes = [16, 128], strides = [1, 1]} : vector<16x384xf32> to vector<16x128xf32>
    %161 = vector.extract_strided_slice %159 {offsets = [0, 128], sizes = [16, 128], strides = [1, 1]} : vector<16x384xf32> to vector<16x128xf32>
    %162 = vector.extract_strided_slice %159 {offsets = [0, 256], sizes = [16, 128], strides = [1, 1]} : vector<16x384xf32> to vector<16x128xf32>
    %163 = vector.extract_strided_slice %153 {offsets = [0, 384], sizes = [16, 128], strides = [1, 1]} : vector<16x512xf32> to vector<16x128xf32>
    %164 = math.tanh %163 : vector<16x128xf32>
    %165 = arith.mulf %161, %140 : vector<16x128xf32>
    %166 = arith.mulf %160, %164 : vector<16x128xf32>
    %167 = arith.addf %165, %166 : vector<16x128xf32>
    %168 = math.tanh %167 : vector<16x128xf32>
    %169 = arith.mulf %162, %168 : vector<16x128xf32>
    %170 = arith.truncf %169 : vector<16x128xf32> to vector<16x128xbf16>
    %c0_82 = arith.constant 0 : index
    %c0_83 = arith.constant 0 : index
    %171 = vector.load %arg13[%c0_82, %c0_83] : memref<16x128xf32, #tpu.memory_space<vmem>>, vector<16x128xf32>
    %cst_84 = arith.constant dense<0.000000e+00> : vector<16x128xf32>
    %172 = tpu.matmul %170, %150, %cst_84 {dimension_numbers = #tpu.dot_dimension_numbers<[1], [0], [0], [1], [0, 0, 1, 1], [], []>} : vector<16x128xbf16>, vector<128x128xbf16>, vector<16x128xf32> -> vector<16x128xf32>
    %173 = arith.addf %171, %172 : vector<16x128xf32>
    %c0_85 = arith.constant 0 : index
    %c0_86 = arith.constant 0 : index
    %174 = vector.load %arg13[%c0_85, %c0_86] : memref<16x128xf32, #tpu.memory_space<vmem>>, vector<16x128xf32>
    tpu.vector_store %arg13[%c0_85, %c0_86], %173 {strides = array<i32>} : memref<16x128xf32, #tpu.memory_space<vmem>>, vector<16x128xf32>,
    %c96 = arith.constant 96 : index
    %c0_87 = arith.constant 0 : index
    %175 = vector.load %arg12[%c96, %c0_87] : memref<128x512xf32, #tpu.memory_space<vmem>>, vector<16x512xf32>
    %c6 = arith.constant 6 : index
    %c0_88 = arith.constant 0 : index
    %c0_89 = arith.constant 0 : index
    %176 = vector.load %arg5[%c6, %c0_88, %c0_89] : memref<8x128x128xbf16, #tpu.memory_space<vmem>>, vector<1x128x128xbf16>
    %177 = vector.shape_cast %176 : vector<1x128x128xbf16> to vector<128x128xbf16>
    %c0_90 = arith.constant 0 : index
    %c0_91 = arith.constant 0 : index
    %178 = vector.load %arg3[%c0_90, %c0_91] : memref<128x512xbf16, #tpu.memory_space<vmem>>, vector<128x512xbf16>
    %cst_92 = arith.constant dense<0.000000e+00> : vector<16x512xf32>
    %179 = tpu.matmul %170, %178, %cst_92 {dimension_numbers = #tpu.dot_dimension_numbers<[1], [0], [0], [1], [0, 0, 1, 1], [], []>} : vector<16x128xbf16>, vector<128x512xbf16>, vector<16x512xf32> -> vector<16x512xf32>
    %180 = arith.addf %175, %179 : vector<16x512xf32>
    %181 = vector.extract_strided_slice %180 {offsets = [0, 0], sizes = [16, 384], strides = [1, 1]} : vector<16x512xf32> to vector<16x384xf32>
    %182 = arith.negf %181 : vector<16x384xf32>
    %183 = math.exp %182 : vector<16x384xf32>
    %cst_93 = arith.constant 1.000000e+00 : f32
    %184 = vector.broadcast %cst_93 : f32 to vector<16x384xf32>
    %185 = arith.addf %184, %183 : vector<16x384xf32>
    %186 = arith.divf %184, %185 : vector<16x384xf32>
    %187 = vector.extract_strided_slice %186 {offsets = [0, 0], sizes = [16, 128], strides = [1, 1]} : vector<16x384xf32> to vector<16x128xf32>
    %188 = vector.extract_strided_slice %186 {offsets = [0, 128], sizes = [16, 128], strides = [1, 1]} : vector<16x384xf32> to vector<16x128xf32>
    %189 = vector.extract_strided_slice %186 {offsets = [0, 256], sizes = [16, 128], strides = [1, 1]} : vector<16x384xf32> to vector<16x128xf32>
    %190 = vector.extract_strided_slice %180 {offsets = [0, 384], sizes = [16, 128], strides = [1, 1]} : vector<16x512xf32> to vector<16x128xf32>
    %191 = math.tanh %190 : vector<16x128xf32>
    %192 = arith.mulf %188, %167 : vector<16x128xf32>
    %193 = arith.mulf %187, %191 : vector<16x128xf32>
    %194 = arith.addf %192, %193 : vector<16x128xf32>
    %195 = math.tanh %194 : vector<16x128xf32>
    %196 = arith.mulf %189, %195 : vector<16x128xf32>
    %197 = arith.truncf %196 : vector<16x128xf32> to vector<16x128xbf16>
    %c0_94 = arith.constant 0 : index
    %c0_95 = arith.constant 0 : index
    %198 = vector.load %arg13[%c0_94, %c0_95] : memref<16x128xf32, #tpu.memory_space<vmem>>, vector<16x128xf32>
    %cst_96 = arith.constant dense<0.000000e+00> : vector<16x128xf32>
    %199 = tpu.matmul %197, %177, %cst_96 {dimension_numbers = #tpu.dot_dimension_numbers<[1], [0], [0], [1], [0, 0, 1, 1], [], []>} : vector<16x128xbf16>, vector<128x128xbf16>, vector<16x128xf32> -> vector<16x128xf32>
    %200 = arith.addf %198, %199 : vector<16x128xf32>
    %c0_97 = arith.constant 0 : index
    %c0_98 = arith.constant 0 : index
    %201 = vector.load %arg13[%c0_97, %c0_98] : memref<16x128xf32, #tpu.memory_space<vmem>>, vector<16x128xf32>
    tpu.vector_store %arg13[%c0_97, %c0_98], %200 {strides = array<i32>} : memref<16x128xf32, #tpu.memory_space<vmem>>, vector<16x128xf32>,
    %c112 = arith.constant 112 : index
    %c0_99 = arith.constant 0 : index
    %202 = vector.load %arg12[%c112, %c0_99] : memref<128x512xf32, #tpu.memory_space<vmem>>, vector<16x512xf32>
    %c7 = arith.constant 7 : index
    %c0_100 = arith.constant 0 : index
    %c0_101 = arith.constant 0 : index
    %203 = vector.load %arg5[%c7, %c0_100, %c0_101] : memref<8x128x128xbf16, #tpu.memory_space<vmem>>, vector<1x128x128xbf16>
    %204 = vector.shape_cast %203 : vector<1x128x128xbf16> to vector<128x128xbf16>
    %c0_102 = arith.constant 0 : index
    %c0_103 = arith.constant 0 : index
    %205 = vector.load %arg3[%c0_102, %c0_103] : memref<128x512xbf16, #tpu.memory_space<vmem>>, vector<128x512xbf16>
    %cst_104 = arith.constant dense<0.000000e+00> : vector<16x512xf32>
    %206 = tpu.matmul %197, %205, %cst_104 {dimension_numbers = #tpu.dot_dimension_numbers<[1], [0], [0], [1], [0, 0, 1, 1], [], []>} : vector<16x128xbf16>, vector<128x512xbf16>, vector<16x512xf32> -> vector<16x512xf32>
    %207 = arith.addf %202, %206 : vector<16x512xf32>
    %208 = vector.extract_strided_slice %207 {offsets = [0, 0], sizes = [16, 384], strides = [1, 1]} : vector<16x512xf32> to vector<16x384xf32>
    %209 = arith.negf %208 : vector<16x384xf32>
    %210 = math.exp %209 : vector<16x384xf32>
    %cst_105 = arith.constant 1.000000e+00 : f32
    %211 = vector.broadcast %cst_105 : f32 to vector<16x384xf32>
    %212 = arith.addf %211, %210 : vector<16x384xf32>
    %213 = arith.divf %211, %212 : vector<16x384xf32>
    %214 = vector.extract_strided_slice %213 {offsets = [0, 0], sizes = [16, 128], strides = [1, 1]} : vector<16x384xf32> to vector<16x128xf32>
    %215 = vector.extract_strided_slice %213 {offsets = [0, 128], sizes = [16, 128], strides = [1, 1]} : vector<16x384xf32> to vector<16x128xf32>
    %216 = vector.extract_strided_slice %213 {offsets = [0, 256], sizes = [16, 128], strides = [1, 1]} : vector<16x384xf32> to vector<16x128xf32>
    %217 = vector.extract_strided_slice %207 {offsets = [0, 384], sizes = [16, 128], strides = [1, 1]} : vector<16x512xf32> to vector<16x128xf32>
    %218 = math.tanh %217 : vector<16x128xf32>
    %219 = arith.mulf %215, %194 : vector<16x128xf32>
    %220 = arith.mulf %214, %218 : vector<16x128xf32>
    %221 = arith.addf %219, %220 : vector<16x128xf32>
    %222 = math.tanh %221 : vector<16x128xf32>
    %223 = arith.mulf %216, %222 : vector<16x128xf32>
    %224 = arith.truncf %223 : vector<16x128xf32> to vector<16x128xbf16>
    %c0_106 = arith.constant 0 : index
    %c0_107 = arith.constant 0 : index
    %225 = vector.load %arg13[%c0_106, %c0_107] : memref<16x128xf32, #tpu.memory_space<vmem>>, vector<16x128xf32>
    %cst_108 = arith.constant dense<0.000000e+00> : vector<16x128xf32>
    %226 = tpu.matmul %224, %204, %cst_108 {dimension_numbers = #tpu.dot_dimension_numbers<[1], [0], [0], [1], [0, 0, 1, 1], [], []>} : vector<16x128xbf16>, vector<128x128xbf16>, vector<16x128xf32> -> vector<16x128xf32>
    %227 = arith.addf %225, %226 : vector<16x128xf32>
    %c0_109 = arith.constant 0 : index
    %c0_110 = arith.constant 0 : index
    %228 = vector.load %arg13[%c0_109, %c0_110] : memref<16x128xf32, #tpu.memory_space<vmem>>, vector<16x128xf32>
    tpu.vector_store %arg13[%c0_109, %c0_110], %227 {strides = array<i32>} : memref<16x128xf32, #tpu.memory_space<vmem>>, vector<16x128xf32>,
    %c0_111 = arith.constant 0 : index
    %c0_112 = arith.constant 0 : index
    %229 = vector.load %arg13[%c0_111, %c0_112] : memref<16x128xf32, #tpu.memory_space<vmem>>, vector<16x128xf32>
    %c0_113 = arith.constant 0 : index
    %c0_114 = arith.constant 0 : index
    %230 = vector.load %arg6[%c0_113, %c0_114] : memref<1x128xf32, #tpu.memory_space<vmem>>, vector<1x128xf32>
    %231 = vector.broadcast %230 : vector<1x128xf32> to vector<16x128xf32>
    %232 = arith.addf %229, %231 : vector<16x128xf32>
    %cst_115 = arith.constant 0.000000e+00 : f32
    %233 = vector.broadcast %cst_115 : f32 to vector<16x128xf32>
    %234 = arith.maximumf %232, %233 : vector<16x128xf32>
    %235 = arith.truncf %234 : vector<16x128xf32> to vector<16x128xbf16>
    %c0_116 = arith.constant 0 : index
    %c0_117 = arith.constant 0 : index
    %c0_118 = arith.constant 0 : index
    %236 = vector.load %arg7[%c0_116, %c0_117, %c0_118] : memref<2x128x128xbf16, #tpu.memory_space<vmem>>, vector<1x128x128xbf16>
    %237 = vector.shape_cast %236 : vector<1x128x128xbf16> to vector<128x128xbf16>
    %cst_119 = arith.constant dense<0.000000e+00> : vector<16x128xf32>
    %238 = tpu.matmul %235, %237, %cst_119 {dimension_numbers = #tpu.dot_dimension_numbers<[1], [0], [0], [1], [0, 0, 1, 1], [], []>} : vector<16x128xbf16>, vector<128x128xbf16>, vector<16x128xf32> -> vector<16x128xf32>
    %c0_120 = arith.constant 0 : index
    %c0_121 = arith.constant 0 : index
    %c0_122 = arith.constant 0 : index
    %239 = vector.load %arg8[%c0_120, %c0_121, %c0_122] : memref<2x1x128xf32, #tpu.memory_space<vmem>>, vector<1x1x128xf32>
    %240 = vector.shape_cast %239 : vector<1x1x128xf32> to vector<1x128xf32>
    %241 = vector.broadcast %240 : vector<1x128xf32> to vector<16x128xf32>
    %242 = arith.addf %238, %241 : vector<16x128xf32>
    %cst_123 = arith.constant 0.000000e+00 : f32
    %243 = vector.broadcast %cst_123 : f32 to vector<16x128xf32>
    %244 = arith.maximumf %242, %243 : vector<16x128xf32>
    %245 = arith.truncf %244 : vector<16x128xf32> to vector<16x128xbf16>
    %c1_124 = arith.constant 1 : index
    %c0_125 = arith.constant 0 : index
    %c0_126 = arith.constant 0 : index
    %246 = vector.load %arg7[%c1_124, %c0_125, %c0_126] : memref<2x128x128xbf16, #tpu.memory_space<vmem>>, vector<1x128x128xbf16>
    %247 = vector.shape_cast %246 : vector<1x128x128xbf16> to vector<128x128xbf16>
    %cst_127 = arith.constant dense<0.000000e+00> : vector<16x128xf32>
    %248 = tpu.matmul %245, %247, %cst_127 {dimension_numbers = #tpu.dot_dimension_numbers<[1], [0], [0], [1], [0, 0, 1, 1], [], []>} : vector<16x128xbf16>, vector<128x128xbf16>, vector<16x128xf32> -> vector<16x128xf32>
    %c1_128 = arith.constant 1 : index
    %c0_129 = arith.constant 0 : index
    %c0_130 = arith.constant 0 : index
    %249 = vector.load %arg8[%c1_128, %c0_129, %c0_130] : memref<2x1x128xf32, #tpu.memory_space<vmem>>, vector<1x1x128xf32>
    %250 = vector.shape_cast %249 : vector<1x1x128xf32> to vector<1x128xf32>
    %251 = vector.broadcast %250 : vector<1x128xf32> to vector<16x128xf32>
    %252 = arith.addf %248, %251 : vector<16x128xf32>
    %cst_131 = arith.constant 0.000000e+00 : f32
    %253 = vector.broadcast %cst_131 : f32 to vector<16x128xf32>
    %254 = arith.maximumf %252, %253 : vector<16x128xf32>
    %255 = arith.truncf %254 : vector<16x128xf32> to vector<16x128xbf16>
    %c0_132 = arith.constant 0 : index
    %c0_133 = arith.constant 0 : index
    %256 = vector.load %arg9[%c0_132, %c0_133] : memref<128x1xbf16, #tpu.memory_space<vmem>>, vector<128x1xbf16>
    %cst_134 = arith.constant dense<0.000000e+00> : vector<16x1xf32>
    %257 = tpu.matmul %255, %256, %cst_134 {dimension_numbers = #tpu.dot_dimension_numbers<[1], [0], [0], [1], [0, 0, 1, 1], [], []>} : vector<16x128xbf16>, vector<128x1xbf16>, vector<16x1xf32> -> vector<16x1xf32>
    %c0_135 = arith.constant 0 : index
    %c0_136 = arith.constant 0 : index
    %258 = vector.load %arg10[%c0_135, %c0_136] : memref<1x1xf32, #tpu.memory_space<vmem>>, vector<1x1xf32>
    %259 = vector.broadcast %258 : vector<1x1xf32> to vector<16x1xf32>
    %260 = arith.addf %257, %259 : vector<16x1xf32>
    %c0_137 = arith.constant 0 : index
    %c0_138 = arith.constant 0 : index
    %261 = vector.load %arg11[%c0_137, %c0_138] : memref<16x1xf32, #tpu.memory_space<vmem>>, vector<16x1xf32>
    tpu.vector_store %arg11[%c0_137, %c0_138], %260 {strides = array<i32>} : memref<16x1xf32, #tpu.memory_space<vmem>>, vector<16x1xf32>,
    return
  }
  func.func @transform_0(%arg0: i32) -> (i32, i32, i32) {
    %c0_i32 = arith.constant 0 : i32
    %c0_i32_0 = arith.constant 0 : i32
    %c0_i32_1 = arith.constant 0 : i32
    return %arg0, %c0_i32, %c0_i32_0 : i32, i32, i32
  }
  func.func @transform_1(%arg0: i32) -> (i32, i32) {
    %c0_i32 = arith.constant 0 : i32
    %c0_i32_0 = arith.constant 0 : i32
    %c0_i32_1 = arith.constant 0 : i32
    return %c0_i32, %c0_i32_0 : i32, i32
  }
  func.func @transform_2(%arg0: i32) -> (i32, i32) {
    %c0_i32 = arith.constant 0 : i32
    %c0_i32_0 = arith.constant 0 : i32
    %c0_i32_1 = arith.constant 0 : i32
    return %c0_i32, %c0_i32_0 : i32, i32
  }
  func.func @transform_3(%arg0: i32) -> (i32, i32) {
    %c0_i32 = arith.constant 0 : i32
    %c0_i32_0 = arith.constant 0 : i32
    %c0_i32_1 = arith.constant 0 : i32
    return %c0_i32, %c0_i32_0 : i32, i32
  }
  func.func @transform_4(%arg0: i32) -> (i32, i32, i32) {
    %c0_i32 = arith.constant 0 : i32
    %c0_i32_0 = arith.constant 0 : i32
    %c0_i32_1 = arith.constant 0 : i32
    %c0_i32_2 = arith.constant 0 : i32
    return %c0_i32, %c0_i32_0, %c0_i32_1 : i32, i32, i32
  }
  func.func @transform_5(%arg0: i32) -> (i32, i32) {
    %c0_i32 = arith.constant 0 : i32
    %c0_i32_0 = arith.constant 0 : i32
    %c0_i32_1 = arith.constant 0 : i32
    return %c0_i32, %c0_i32_0 : i32, i32
  }
  func.func @transform_6(%arg0: i32) -> (i32, i32, i32) {
    %c0_i32 = arith.constant 0 : i32
    %c0_i32_0 = arith.constant 0 : i32
    %c0_i32_1 = arith.constant 0 : i32
    %c0_i32_2 = arith.constant 0 : i32
    return %c0_i32, %c0_i32_0, %c0_i32_1 : i32, i32, i32
  }
  func.func @transform_7(%arg0: i32) -> (i32, i32, i32) {
    %c0_i32 = arith.constant 0 : i32
    %c0_i32_0 = arith.constant 0 : i32
    %c0_i32_1 = arith.constant 0 : i32
    %c0_i32_2 = arith.constant 0 : i32
    return %c0_i32, %c0_i32_0, %c0_i32_1 : i32, i32, i32
  }
  func.func @transform_8(%arg0: i32) -> (i32, i32) {
    %c0_i32 = arith.constant 0 : i32
    %c0_i32_0 = arith.constant 0 : i32
    %c0_i32_1 = arith.constant 0 : i32
    return %c0_i32, %c0_i32_0 : i32, i32
  }
  func.func @transform_9(%arg0: i32) -> (i32, i32) {
    %c0_i32 = arith.constant 0 : i32
    %c0_i32_0 = arith.constant 0 : i32
    %c0_i32_1 = arith.constant 0 : i32
    return %c0_i32, %c0_i32_0 : i32, i32
  }
  func.func @transform_10(%arg0: i32) -> (i32, i32) {
    %c0_i32 = arith.constant 0 : i32
    %c0_i32_0 = arith.constant 0 : i32
    return %arg0, %c0_i32 : i32, i32
  }
}

</mosaic_0001>

<bundles_post_ra>
// kernel: tpu_custom_call.1
= control target key start
LH: loop header
LB: loop body
LE: loop exit
PB: predicated region body
PF: predicated region fallthrough
CT: control target
= control target key end

     0   :  { %s6873_s0 = inlined_call_operand.vmem [shape: f32[1,128,4], index: 0, kind: input, shape index: {}]   ;;  %s6874_s1 = inlined_call_operand.vmem [shape: bf16[4,512], index: 1, kind: input, shape index: {}]   ;;  %s6875_s2 = inlined_call_operand.hbm [shape: bf16[128,512], index: 2, kind: input, shape index: {}]   ;;  %s6876_s3 = inlined_call_operand.vmem [shape: f32[1,512], index: 3, kind: input, shape index: {}]   ;;  %s6877_s4 = inlined_call_operand.hbm [shape: bf16[8,128,128], index: 4, kind: input, shape index: {}]   ;;  %s6878_s5 = inlined_call_operand.vmem [shape: f32[1,128], index: 5, kind: input, shape index: {}]   ;;  %s6879_s6 = inlined_call_operand.vmem [shape: bf16[2,128,128], index: 6, kind: input, shape index: {}]   ;;  %s6880_s7 = inlined_call_operand.vmem [shape: f32[2,1,128], index: 7, kind: input, shape index: {}]   ;;  %s6881_s8 = inlined_call_operand.vmem [shape: bf16[128,1], index: 8, kind: input, shape index: {}]   ;;  %s6882_s9 = inlined_call_operand.<no memory space> [shape: f32[1,1], index: 9, kind: input, shape index: {}]   ;;  %s6883_s10 = inlined_call_operand.vmem [shape: f32[16,1], index: 10, kind: output, shape index: {}]  }
   0x1   :  { %v15_v0 = vstv %s6882_s9 }
   0x2   :  { %16 = vst [vmem:[#allocation4] sm:$0x1] %v15_v0 }
   0x3   :  { %17 = vsyncpa [#allocation6], 0 }
   0x4   :  { %18 = vsyncpa [#allocation8], 0  ;;  %s5909_s15 = smov [#allocation5]   ;;  %s5861_s19 = scalar_lea.hbm %s6875_s2, 4096 }
   0x5   :  { %s28_s16 = sshll.u32 %s5909_s15, 4  ;;  %p5862_p0 = scmp.ne.s32.totalorder %s6875_s2, %s5861_s19  ;;  %s29_s16 = int_to_ptr.vmem [resolvable:$true] %s28_s16 }
   0x6   :  { %p5865_p1 = scmp.lt.u32.totalorder %s5861_s19, %s6875_s2 }
   0x8   :  { %p5867_p2 = pnand %p5865_p1, %p5862_p0 }
   0xa   :  { %5870 = shalt.err (!%p5867_p2)
}
   0xb   :  { %s5871_s9 = scalar_lea.vmem %s29_s16, 4096  ;;  %p5876_p4 = scmp.lt.s32.totalorder %s29_s16, %s29_s16 }
   0xc   :  { %p5872_p3 = scmp.ne.s32.totalorder %s29_s16, %s5871_s9  ;;  %p5877_p5 = scmp.lt.s32.totalorder %s5871_s9, %s5871_s9 }
   0xe   :  { %p5878_p6 = por %p5877_p5, %p5876_p4 }
  0x10   :  { %p5879_p7 = pnand %p5878_p6, %p5872_p3 }
  0x12   :  { %5882 = shalt.err (!%p5879_p7)
}
  0x13   :  { %s5910_s24 = smov 256   ;;  %s5911_s25 = smov 16  }
  0x14   :  { %34 = dma.hbm_to_vmem [thread:$0]  %s6875_s2, 4096, %s29_s16, [#allocation6], %s5910_s24, %s5910_s24, %s5911_s25  }
  0x15   :  { %s5912_s28 = smov [#allocation7]   ;;  %s5883_s12 = scalar_lea.hbm %s6877_s4, 8192 }
  0x16   :  { %s42_s29 = sshll.u32 %s5912_s28, 4  ;;  %p5884_p8 = scmp.ne.s32.totalorder %s6877_s4, %s5883_s12  ;;  %s43_s29 = int_to_ptr.vmem [resolvable:$true] %s42_s29 }
  0x17   :  { %p5887_p9 = scmp.lt.u32.totalorder %s5883_s12, %s6877_s4 }
  0x19   :  { %p5889_p10 = pnand %p5887_p9, %p5884_p8 }
  0x1b   :  { %5892 = shalt.err (!%p5889_p10)
}
  0x1c   :  { %s5893_s18 = scalar_lea.vmem %s43_s29, 8192  ;;  %p5898_p12 = scmp.lt.s32.totalorder %s43_s29, %s43_s29 }
  0x1d   :  { %p5894_p11 = scmp.ne.s32.totalorder %s43_s29, %s5893_s18  ;;  %p5899_p13 = scmp.lt.s32.totalorder %s5893_s18, %s5893_s18 }
  0x1f   :  { %p5900_p0 = por %p5899_p13, %p5898_p12 }
  0x21   :  { %p5901_p1 = pnand %p5900_p0, %p5894_p11 }
  0x23   :  { %5904 = shalt.err (!%p5901_p1)
}
  0x24   :  { %s5913_s2 = smov 64   ;;  %s5914_s16 = smov 4  }
  0x25   :  { %48 = dma.hbm_to_vmem [thread:$0]  %s6877_s4, 8192, %s43_s29, [#allocation8], %s5913_s2, %s5913_s2, %s5914_s16  }
  0x26   :  { %5905 = dma.done.wait [#allocation6], 4096  }
  0x27   :  { %5906 = vsyncadd [#allocation6], 4294963200 }
  0x28   :  { %5907 = dma.done.wait [#allocation8], 8192  }
  0x29   :  { %5908 = vsyncadd [#allocation8], 4294959104  ;;  %v93_v1 = vlaneseq  ;;  %v5915_v2 = vmov 1983009808   ;;  %v6886_v4 = vmov 0   ;;  %v90_v8 = vld [vmem:[%s6874_s1] sm:$0xff] }
  0x2a   :  { %v116_v3 = vunpack.c.l.s4 %v5915_v2  ;;  %201 = vmatprep.mubr.bf16.mxu0 %v6886_v4  ;;  %261 = vmatprep.mubr.bf16.mxu1 %v6886_v4  ;;  %vm156_vm0 = vcmask 1041408   ;;  %v114_v9 = vcombine.high %v90_v8, %v90_v8  ;;  %v66_v11 = vld [vmem:[%s6873_s0] sm:$0xff]  ;;  %v67_v12 = vld [vmem:[%s6873_s0 + $0x8] sm:$0xff]  ;;  %vm131_vm1 = vcmask 31744   ;;  %v68_v24 = vld [vmem:[%s6873_s0 + $0x10] sm:$0xff] }
  0x2b   :  { %v6003_v5 = vshrl.u32 %v93_v1, 7  ;;  %v78_v13 = vld [vmem:[%s6873_s0 + $0x60] sm:$0xff]  ;;  %v79_v14 = vld [vmem:[%s6873_s0 + $0x68] sm:$0xff]  ;;  %v82_v19 = vpack.c.bf16 %v67_v12, %v66_v11  ;;  %v69_v25 = vld [vmem:[%s6873_s0 + $0x18] sm:$0xff]  ;;  %v6884_v11 = vmov 0.0   ;;  %vm5918_vm2 = vmmov 0  }
  0x2c   :  { %v117_v6 = vunpack.c.0.s8 %v116_v3  ;;  %v6022_v18 = vld [vmem:[#allocation5 + $0x4] ss:$16 sps:$4 sm:$0xff]   ;;  %v6026_v20 = vpack.c.bf16 %v79_v14, %v78_v13  ;;  %v6031_v23 = vld [vmem:[#allocation5 + $0xc] ss:$16 sps:$4 sm:$0xff]   ;;  %v6042_v27 = vld [vmem:[#allocation5] ss:$16 sps:$4 sm:$0xff]   ;;  %v83_v31 = vpack.c.bf16 %v69_v25, %v68_v24 }
  0x2d   :  { %v80_v26 = vld [vmem:[%s6873_s0 + $0x70] sm:$0xff]  ;;  %v81_v29 = vld [vmem:[%s6873_s0 + $0x78] sm:$0xff]  ;;  %v70_v34 = vld [vmem:[%s6873_s0 + $0x20] sm:$0xff]  ;;  %vm4458_vm3 = vcmask 7168  }
  0x2e   :  { %v120_v7 = vsub.s32 %v117_v6, %v6003_v5  ;;  %v6047_v28 = vld [vmem:[#allocation5 + $0x24] ss:$16 sps:$4 sm:$0xff]   ;;  %v6056_v30 = vld [vmem:[#allocation5 + $0x20] ss:$16 sps:$4 sm:$0xff]   ;;  %v6058_v32 = vpack.c.bf16 %v81_v29, %v80_v26  ;;  %v6084_v40 = vld [vmem:[#allocation5 + $0x8] ss:$16 sps:$4 sm:$0xff]  }
  0x2f   :  { %v6061_v33 = vld [vmem:[#allocation5 + $0x44] ss:$16 sps:$4 sm:$0xff]   ;;  %v6067_v35 = vld [vmem:[#allocation5 + $0x40] ss:$16 sps:$4 sm:$0xff]   ;;  %v6086_v41 = vld [vmem:[#allocation5 + $0x2c] ss:$16 sps:$4 sm:$0xff]  }
  0x30   :  { %v121_v10 = vrot.slane %v90_v8, %v120_v7  ;;  %v128_v15 = vrot.slane %v114_v9, %v120_v7  ;;  %v6072_v36 = vld [vmem:[#allocation5 + $0x64] ss:$16 sps:$4 sm:$0xff]   ;;  %v6081_v38 = vld [vmem:[#allocation5 + $0x60] ss:$16 sps:$4 sm:$0xff]   ;;  %v6094_v44 = vld [vmem:[#allocation5 + $0x28] ss:$16 sps:$4 sm:$0xff]  }
  0x31   :  { %v71_v37 = vld [vmem:[%s6873_s0 + $0x28] sm:$0xff]  ;;  %v72_v42 = vld [vmem:[%s6873_s0 + $0x30] sm:$0xff]  ;;  %v73_v43 = vld [vmem:[%s6873_s0 + $0x38] sm:$0xff] }
  0x32   :  { %v129_v16 = vcombine.high %v121_v10, %v121_v10  ;;  %v158_v17 = vsel %vm156_vm0, %v121_v10, 0  ;;  %v130_v21 = vcombine.high %v128_v15, %v128_v15  ;;  %v164_v22 = vsel %vm156_vm0, %v128_v15, 0  ;;  %v6097_v45 = vld [vmem:[#allocation5 + $0x80] ss:$16 sps:$4 sm:$0xff]   ;;  %v6099_v46 = vld [vmem:[#allocation5 + $0x84] ss:$16 sps:$4 sm:$0xff]  }
  0x33   :  { %v84_v39 = vpack.c.bf16 %v71_v37, %v70_v34  ;;  %v6103_v47 = vld [vmem:[#allocation5 + $0x4c] ss:$16 sps:$4 sm:$0xff]   ;;  %v6107_v48 = vld [vmem:[#allocation5 + $0xa4] ss:$16 sps:$4 sm:$0xff]   ;;  %v85_v49 = vpack.c.bf16 %v73_v43, %v72_v42  ;;  %v6112_v50 = vld [vmem:[#allocation5 + $0x48] ss:$16 sps:$4 sm:$0xff]  }
  0x34   :  { %4467 = vmatprep.subr.msk.bf16.mxu0 %vm156_vm0, %v129_v16  ;;  %5217 = vmatprep.subr.msk.bf16.mxu1 %vm156_vm0, %v129_v16  ;;  %v6115_v51 = vld [vmem:[#allocation5 + $0xa0] ss:$16 sps:$4 sm:$0xff]   ;;  %v6119_v52 = vld [vmem:[#allocation5 + $0xc4] ss:$16 sps:$4 sm:$0xff]   ;;  %v6121_v53 = vld [vmem:[#allocation5 + $0x6c] ss:$16 sps:$4 sm:$0xff]  }
  0x35   :  { %170 = vmatpush1.bf16.msra.mxu0 %v158_v17  ;;  %5218 = vmatpush1.bf16.msra.mxu1 %v158_v17  ;;  %v74_v54 = vld [vmem:[%s6873_s0 + $0x40] sm:$0xff]  ;;  %v75_v55 = vld [vmem:[%s6873_s0 + $0x48] sm:$0xff]  ;;  %v76_v0 = vld [vmem:[%s6873_s0 + $0x50] sm:$0xff]  ;;  %v99_v37 = vsub.s32 1, %v6003_v5 }
  0x36   :  { %4476 = vmatprep.subr.msk.bf16.mxu1 %vm156_vm0, %v130_v21  ;;  %677 = vmatprep.subr.bf16.mxu0 %v6022_v18  ;;  %v6132_v56 = vld [vmem:[#allocation5 + $0xc0] ss:$16 sps:$4 sm:$0xff]   ;;  %v5388_v57 = vld [vmem:[#allocation5 + $0x68] ss:$16 sps:$4 sm:$0xff]   ;;  %v6136_v58 = vld [vmem:[#allocation5 + $0xe4] ss:$16 sps:$4 sm:$0xff]   ;;  %v86_v60 = vpack.c.bf16 %v75_v55, %v74_v54 }
  0x37   :  { %v5396_v59 = vld [vmem:[#allocation5 + $0x8c] ss:$16 sps:$4 sm:$0xff]   ;;  %v6142_v61 = vld [vmem:[#allocation5 + $0xe0] ss:$16 sps:$4 sm:$0xff]   ;;  %v5394_v62 = vld [vmem:[#allocation5 + $0x88] ss:$16 sps:$4 sm:$0xff]  }
  0x38   :  { %4468 = vmatmul.mubr.msk.bf16.vlgmr.msra.gmra.mrb[0].mxu0 %vm131_vm1, %v82_v19  ;;  %4474 = vmatmul.mubr.msk.bf16.vlgmr.msra.gmra.mrb[0].mxu1 %vm131_vm1, %v6026_v20  ;;  %v5399_v63 = vld [vmem:[#allocation5 + $0xac] ss:$16 sps:$4 sm:$0xff]   ;;  %v6154_v2 = vld [vmem:[#allocation5 + $0xa8] ss:$16 sps:$4 sm:$0xff]   ;;  %v5406_v10 = vld [vmem:[#allocation7] sm:$0xff]  }
  0x39   :  { %283 = vmatpush1.bf16.msra.mxu1 %v164_v22  ;;  %211 = vmatprep.mubr.bf16.mxu0 %v6886_v4  ;;  %v77_v1 = vld [vmem:[%s6873_s0 + $0x58] sm:$0xff]  ;;  %v5407_v12 = vld [vmem:[#allocation7 + $0x8] sm:$0xff]   ;;  %v5410_v15 = vld [vmem:[#allocation7 + $0x20] sm:$0xff]  }
  0x3a   :  { %271 = vmatprep.mubr.bf16.mxu1 %v6886_v4  ;;  %720 = vmatprep.subr.bf16.mxu1 %v6031_v23  ;;  %v6158_v3 = vld [vmem:[#allocation5 + $0xcc] ss:$16 sps:$4 sm:$0xff]   ;;  %v87_v6 = vpack.c.bf16 %v77_v1, %v76_v0  ;;  %v6161_v7 = vld [vmem:[#allocation5 + $0xc8] ss:$16 sps:$4 sm:$0xff]   ;;  %v5408_v13 = vld [vmem:[#allocation7 + $0x10] sm:$0xff]  }
  0x3b   :  { %678 = vmatpush1.bf16.msra.mxu0 %v6042_v27  ;;  %v6163_v8 = vld [vmem:[#allocation5 + $0xec] ss:$16 sps:$4 sm:$0xff]   ;;  %v6169_v9 = vld [vmem:[#allocation5 + $0xe8] ss:$16 sps:$4 sm:$0xff]   ;;  %v5412_v17 = vld [vmem:[#allocation7 + $0x30] sm:$0xff]  }
  0x3c   :  { %679 = vmatprep.subr.bf16.mxu0 %v6047_v28  ;;  %v5409_v14 = vld [vmem:[#allocation7 + $0x18] sm:$0xff]   ;;  %v5411_v16 = vld [vmem:[#allocation7 + $0x28] sm:$0xff]  }
  0x3d   :  { %v91_v34 = vld [vmem:[%s6876_s3] sm:$0xf] }
  0x3e   :  { %v6236_v42 = vrot.slane %v91_v34, %v99_v37 }
  0x3f   :  { %680 = vmatpush1.bf16.msra.mxu0 %v6056_v30 }
  0x40   :  { %4469 = vmatmul.mubr.msk.bf16.gmra.mrb[4].mxu0 %vm131_vm1, %v83_v31  ;;  %4475 = vmatmul.mubr.msk.bf16.gmra.mrb[4].mxu1 %vm131_vm1, %v6058_v32 }
  0x41   :  { %221 = vmatprep.mubr.bf16.mxu0 %v6886_v4  ;;  %314 = vmatprep.mubr.bf16.mxu1 %v6886_v4 }
  0x42   :  { %681 = vmatprep.subr.bf16.mxu0 %v6061_v33 }
  0x43   :  { %682 = vmatpush1.bf16.msra.mxu0 %v6067_v35 }
  0x44   :  { %683 = vmatprep.subr.bf16.mxu0 %v6072_v36 }
  0x47   :  { %684 = vmatpush1.bf16.msra.mxu0 %v6081_v38 }
  0x48   :  { %4470 = vmatmul.mubr.msk.bf16.gmra.mrb[8].mxu0 %vm131_vm1, %v84_v39  ;;  %4477 = vmatmul.mubr.msk.bf16.vlgmr.msra.gmra.mrb[8].mxu1 %vm131_vm1, %v82_v19  ;;  %v5413_v19 = vld [vmem:[#allocation7 + $0x38] sm:$0xff]  }
  0x49   :  { %721 = vmatpush1.bf16.msra.mxu1 %v6084_v40  ;;  %231 = vmatprep.mubr.bf16.mxu0 %v6886_v4 }
  0x4a   :  { %324 = vmatprep.mubr.bf16.mxu1 %v6886_v4  ;;  %722 = vmatprep.subr.bf16.mxu1 %v6086_v41 }
  0x4b   :  { %685 = vmatprep.subr.bf16.mxu0 %v6099_v46 }
  0x4c   :  { %686 = vmatpush1.bf16.msra.mxu0 %v6097_v45 }
  0x4d   :  { %723 = vmatpush1.bf16.msra.mxu1 %v6094_v44  ;;  %687 = vmatprep.subr.bf16.mxu0 %v6107_v48 }
  0x4e   :  { %724 = vmatprep.subr.bf16.mxu1 %v6103_v47 }
  0x50   :  { %4471 = vmatmul.mubr.msk.bf16.gmra.mrb[12].mxu0 %vm131_vm1, %v85_v49  ;;  %4478 = vmatmul.mubr.msk.bf16.gmra.mrb[12].mxu1 %vm131_vm1, %v83_v31 }
  0x51   :  { %241 = vmatprep.mubr.bf16.mxu0 %v6886_v4  ;;  %334 = vmatprep.mubr.bf16.mxu1 %v6886_v4 }
  0x52   :  { %725 = vmatpush1.bf16.msra.mxu1 %v6112_v50  ;;  %688 = vmatpush1.bf16.msra.mxu0 %v6115_v51 }
  0x53   :  { %689 = vmatprep.subr.bf16.mxu0 %v6119_v52  ;;  %726 = vmatprep.subr.bf16.mxu1 %v6121_v53 }
  0x56   :  { %690 = vmatpush1.bf16.msra.mxu0 %v6132_v56  ;;  %727 = vmatpush1.bf16.msra.mxu1 %v5388_v57 }
  0x57   :  { %691 = vmatprep.subr.bf16.mxu0 %v6136_v58  ;;  %728 = vmatprep.subr.bf16.mxu1 %v5396_v59 }
  0x58   :  { %4472 = vmatmul.mubr.msk.bf16.gmra.mrb[16].mxu0 %vm131_vm1, %v86_v60  ;;  %4479 = vmatmul.mubr.msk.bf16.gmra.mrb[16].mxu1 %vm131_vm1, %v84_v39 }
  0x59   :  { %251 = vmatprep.mubr.bf16.mxu0 %v6886_v4  ;;  %344 = vmatprep.mubr.bf16.mxu1 %v6886_v4 }
  0x5a   :  { %692 = vmatpush1.bf16.msra.mxu0 %v6142_v61  ;;  %729 = vmatpush1.bf16.msra.mxu1 %v5394_v62 }
  0x5b   :  { %730 = vmatprep.subr.bf16.mxu1 %v5399_v63  ;;  %4997 = vmatprep.subr.bf16.mxu0 %v6884_v11 }
  0x5e   :  { %731 = vmatpush1.bf16.msra.mxu1 %v6154_v2 }
  0x5f   :  { %732 = vmatprep.subr.bf16.mxu1 %v6158_v3 }
  0x60   :  { %4473 = vmatmul.mubr.msk.bf16.gmra.mrb[20].mxu0 %vm131_vm1, %v87_v6  ;;  %4480 = vmatmul.mubr.msk.bf16.gmra.mrb[20].mxu1 %vm131_vm1, %v85_v49 }
  0x61   :  { %354 = vmatprep.mubr.bf16.mxu1 %v6886_v4  ;;  %709 = vmatprep.mubr.bf16.mxu0 %v6886_v4 }
  0x62   :  { %733 = vmatpush1.bf16.msra.mxu1 %v6161_v7 }
  0x63   :  { %734 = vmatprep.subr.bf16.mxu1 %v6163_v8 }
  0x66   :  { %735 = vmatpush1.bf16.msra.mxu1 %v6169_v9 }
  0x67   :  { %1175 = vmatprep.subr.bf16.mxu1 %v6031_v23 }
  0x68   :  { %4481 = vmatmul.mubr.msk.bf16.gmra.mrb[24].mxu1 %vm131_vm1, %v86_v60  ;;  %710 = vmatmul.mubr.bf16.vlgmr.msra.gmra.mrb[0].mxu0 %v6886_v4 }
  0x69   :  { %364 = vmatprep.mubr.bf16.mxu1 %v6886_v4  ;;  %4998 = vmatpush3.bf16.msra.mxu0 %v5406_v10 }
  0x6a   :  { %4999 = vmatprep.subr.bf16.mxu0 %v6884_v11  ;;  %5013 = vmatprep.mubr.msk.bf16.mxu0 %vm5918_vm2, %v6884_v11 }
  0x6d   :  { %5000 = vmatpush3.bf16.msra.mxu0 %v5407_v12 }
  0x6e   :  { %5001 = vmatprep.subr.bf16.mxu0 %v6884_v11 }
  0x70   :  { %4482 = vmatmul.mubr.msk.bf16.gmra.mrb[28].mxu1 %vm131_vm1, %v87_v6 }
  0x71   :  { %374 = vmatprep.mubr.bf16.mxu1 %v6886_v4  ;;  %5002 = vmatpush3.bf16.msra.mxu0 %v5408_v13 }
  0x72   :  { %5003 = vmatprep.subr.bf16.mxu0 %v6884_v11 }
  0x75   :  { %5004 = vmatpush3.bf16.msra.mxu0 %v5409_v14 }
  0x76   :  { %5005 = vmatprep.subr.bf16.mxu0 %v6884_v11 }
  0x78   :  { %4483 = vmatmul.mubr.msk.bf16.gmra.mrb[32].mxu1 %vm131_vm1, %v6026_v20 }
  0x79   :  { %384 = vmatprep.mubr.bf16.mxu1 %v6886_v4  ;;  %5006 = vmatpush3.bf16.msra.mxu0 %v5410_v15 }
  0x7a   :  { %5007 = vmatprep.subr.bf16.mxu0 %v6884_v11 }
  0x7d   :  { %5008 = vmatpush3.bf16.msra.mxu0 %v5411_v16 }
  0x7e   :  { %5009 = vmatprep.subr.bf16.mxu0 %v6884_v11 }
  0x80   :  { %4484 = vmatmul.mubr.msk.bf16.gmra.mrb[36].mxu1 %vm131_vm1, %v6058_v32  ;;  %v95_v32 = vsub.s32 0, %v6003_v5 }
  0x81   :  { %752 = vmatprep.mubr.bf16.mxu1 %v6886_v4  ;;  %5010 = vmatpush3.bf16.msra.mxu0 %v5412_v17 }
  0x82   :  { %5011 = vmatprep.subr.bf16.mxu0 %v6884_v11 }
  0x85   :  { %5012 = vmatpush3.bf16.msra.mxu0 %v5413_v19 }
  0x86   :  { %1132 = vmatprep.subr.bf16.mxu0 %v6022_v18 }
  0x88   :  { %753 = vmatmul.mubr.bf16.vlgmr.msra.gmra.mrb[8].mxu1 %v6886_v4 }
  0x89   :  { %1176 = vmatpush1.bf16.msra.mxu1 %v6084_v40  ;;  %1207 = vmatprep.mubr.bf16.mxu1 %v6886_v4 }
  0x8a   :  { %1177 = vmatprep.subr.bf16.mxu1 %v6086_v41  ;;  %v6234_v41 = vrot.slane %v91_v34, %v95_v32 }
  0x8d   :  { %1178 = vmatpush1.bf16.msra.mxu1 %v6094_v44 }
  0x8e   :  { %1179 = vmatprep.subr.bf16.mxu1 %v6103_v47 }
  0x91   :  { %1180 = vmatpush1.bf16.msra.mxu1 %v6112_v50 }
  0x92   :  { %1181 = vmatprep.subr.bf16.mxu1 %v6121_v53 }
  0x95   :  { %1182 = vmatpush1.bf16.msra.mxu1 %v5388_v57 }
  0x96   :  { %1183 = vmatprep.subr.bf16.mxu1 %v5396_v59  ;;  %v103_v59 = vsub.s32 2, %v6003_v5 }
  0x98   :  { %v6244_v6 = vrot.slane %v91_v34, %v103_v59 }
  0x99   :  { %1184 = vmatpush1.bf16.msra.mxu1 %v5394_v62  ;;  %v107_v62 = vsub.s32 3, %v6003_v5 }
  0x9a   :  { %1185 = vmatprep.subr.bf16.mxu1 %v5399_v63 }
  0x9b   :  { %v6246_v12 = vrot.slane %v91_v34, %v107_v62 }
  0x9d   :  { %1186 = vmatpush1.bf16.msra.mxu1 %v6154_v2 }
  0x9e   :  { %1187 = vmatprep.subr.bf16.mxu1 %v6158_v3 }
  0xa1   :  { %1188 = vmatpush1.bf16.msra.mxu1 %v6161_v7 }
  0xa2   :  { %1189 = vmatprep.subr.bf16.mxu1 %v6163_v8 }
  0xa5   :  { %1190 = vmatpush1.bf16.msra.mxu1 %v6169_v9 }
  0xa6   :  { %5017 = vmatprep.subr.bf16.mxu1 %v6884_v11 }
 0x10b   :  { %v6213_v20 = vpop.f32.mrb[0].mxu1 }
 0x10c   :  { %v6215_v21 = vpop.f32.mrb[1].mxu1 }
 0x10d   :  { %v6217_v22 = vpop.f32.mrb[2].mxu1 }
 0x10e   :  { %v6219_v23 = vpop.f32.mrb[3].mxu1 }
 0x113   :  { %v6221_v24 = vpop.f32.mrb[4].mxu1 }
 0x114   :  { %v6223_v25 = vpop.f32.mrb[5].mxu1 }
 0x115   :  { %6888 = vst [vmem:[#allocation11_spill] sm:$0xff] %v6223_v25  ;;  %v6225_v26 = vpop.f32.mrb[6].mxu1 }
 0x116   :  { %6889 = vst [vmem:[#allocation12_spill] sm:$0xff] %v6225_v26  ;;  %v6227_v29 = vpop.f32.mrb[7].mxu1 }
 0x117   :  { %6890 = vst [vmem:[#allocation13_spill] sm:$0xff] %v6227_v29 }
 0x13b   :  { %v711_v31 = vpop.f32.mrb[0].mxu0 }
 0x13c   :  { %v713_v18 = vpop.f32.mrb[1].mxu0  ;;  %v5219_v43 = vadd.f32 %v711_v31, %v6234_v41 }
 0x13d   :  { %v715_v39 = vpop.f32.mrb[2].mxu0  ;;  %v5220_v44 = vadd.f32 %v713_v18, %v6236_v42 }
 0x13e   :  { %v717_v40 = vpop.f32.mrb[3].mxu0  ;;  %v5221_v47 = vadd.f32 %v715_v39, %v6234_v41  ;;  %v4517_v50 = vmul.f32 -1.442695, %v5219_v43 }
 0x13f   :  { %v5222_v49 = vadd.f32 %v717_v40, %v6236_v42  ;;  %v4518_v53 = vmul.f32 -1.442695, %v5220_v44 }
 0x140   :  { %v4520_v54 = vmul.f32 -1.442695, %v5221_v47  ;;  %5590 = vpow2.f32 %v4517_v50 }
 0x141   :  { %v4521_v55 = vmul.f32 -1.442695, %v5222_v49  ;;  %5592 = vpow2.f32 %v4518_v53 }
 0x142   :  { %5594 = vpow2.f32 %v4520_v54 }
 0x143   :  { %5596 = vpow2.f32 %v4521_v55 }
 0x14a   :  { %v5591_v57 = vpop.eup %5590 }
 0x14b   :  { %v5593_v60 = vpop.eup %5592  ;;  %v789_v1 = vadd.f32 1.0, %v5591_v57 }
 0x14c   :  { %v5595_v63 = vpop.eup %5594  ;;  %v790_v10 = vadd.f32 1.0, %v5593_v60 }
 0x14d   :  { %v5597_v0 = vpop.eup %5596  ;;  %v792_v13 = vadd.f32 1.0, %v5595_v63  ;;  %5598 = vrcp.f32 %v789_v1 }
 0x14e   :  { %v793_v14 = vadd.f32 1.0, %v5597_v0  ;;  %5600 = vrcp.f32 %v790_v10 }
 0x14f   :  { %5602 = vrcp.f32 %v792_v13 }
 0x150   :  { %5604 = vrcp.f32 %v793_v14 }
 0x157   :  { %v5599_v39 = vpop.eup %5598 }
 0x158   :  { %v5601_v40 = vpop.eup %5600 }
 0x159   :  { %v5603_v43 = vpop.eup %5602  ;;  %v809_v50 = vmul.f32 0.0, %v5601_v40 }
 0x15a   :  { %v5605_v44 = vpop.eup %5604 }
 0x15b   :  { %v754_v15 = vpop.f32.mrb[8].mxu1  ;;  %v810_v59 = vmul.f32 0.0, %v5605_v44 }
 0x15c   :  { %v5259_v16 = vadd.f32 %v754_v15, %v6244_v6  ;;  %v756_v17 = vpop.f32.mrb[9].mxu1 }
 0x15d   :  { %v5260_v19 = vadd.f32 %v756_v17, %v6246_v12  ;;  %v758_v5 = vpop.f32.mrb[10].mxu1 }
 0x15e   :  { %v4519_v31 = vmul.f32 -1.442695, %v5259_v16  ;;  %v5261_v32 = vadd.f32 %v758_v5, %v6244_v6  ;;  %v760_v18 = vpop.f32.mrb[11].mxu1 }
 0x15f   :  { %5606 = vtanh.f32 %v5260_v19  ;;  %v5262_v34 = vadd.f32 %v760_v18, %v6246_v12  ;;  %v5849_v19 = vld [vmem:[#allocation5 + $0x20] ss:$16 sps:$4 sm:$0xff]  }
 0x160   :  { %5608 = vpow2.f32 %v4519_v31  ;;  %v4522_v37 = vmul.f32 -1.442695, %v5261_v32 }
 0x161   :  { %5610 = vtanh.f32 %v5262_v34 }
 0x162   :  { %5612 = vpow2.f32 %v4522_v37 }
 0x169   :  { %v5607_v47 = vpop.eup %5606 }
 0x16a   :  { %v5609_v49 = vpop.eup %5608  ;;  %v811_v53 = vmul.f32 %v5607_v47, %v5599_v39 }
 0x16b   :  { %v5611_v54 = vpop.eup %5610  ;;  %v791_v55 = vadd.f32 1.0, %v5609_v49 }
 0x16c   :  { %v5613_v57 = vpop.eup %5612  ;;  %v6252_v60 = vadd.f32 %v811_v53, %v809_v50  ;;  %v812_v62 = vmul.f32 %v5611_v54, %v5603_v43 }
 0x16d   :  { %5614 = vrcp.f32 %v791_v55  ;;  %v794_v63 = vadd.f32 1.0, %v5613_v57 }
 0x16e   :  { %5616 = vtanh.f32 %v6252_v60  ;;  %v6255_v0 = vadd.f32 %v812_v62, %v810_v59 }
 0x16f   :  { %5618 = vrcp.f32 %v794_v63 }
 0x170   :  { %5620 = vtanh.f32 %v6255_v0 }
 0x177   :  { %v5615_v1 = vpop.eup %5614 }
 0x178   :  { %v5617_v10 = vpop.eup %5616 }
 0x179   :  { %v5619_v13 = vpop.eup %5618  ;;  %v817_v15 = vmul.f32 %v5617_v10, %v5615_v1 }
 0x17a   :  { %v5621_v14 = vpop.eup %5620 }
 0x17b   :  { %v818_v16 = vmul.f32 %v5621_v14, %v5619_v13 }
 0x17d   :  { %v819_v17 = vpack.c.bf16 %v818_v16, %v817_v15 }
 0x17f   :  { %5014 = vmatmul.mubr.bf16.vlgmr.msra.gmra.mrb[24].mxu0 %v819_v17  ;;  %1208 = vmatmul.mubr.bf16.vlgmr.msra.gmra.mrb[12].mxu1 %v819_v17 }
 0x180   :  { %1133 = vmatpush1.bf16.msra.mxu0 %v6042_v27  ;;  %1164 = vmatprep.mubr.bf16.mxu0 %v6886_v4  ;;  %v5846_v27 = vld [vmem:[#allocation5 + $0x4] ss:$16 sps:$4 sm:$0xff]  }
 0x181   :  { %1134 = vmatprep.subr.bf16.mxu0 %v6047_v28  ;;  %5033 = vmatprep.mubr.msk.bf16.mxu1 %vm5918_vm2, %v6884_v11  ;;  %v5847_v28 = vld [vmem:[#allocation5] ss:$16 sps:$4 sm:$0xff]  }
 0x184   :  { %1135 = vmatpush1.bf16.msra.mxu0 %v6056_v30  ;;  %v5848_v30 = vld [vmem:[#allocation5 + $0x24] ss:$16 sps:$4 sm:$0xff]  }
 0x185   :  { %1136 = vmatprep.subr.bf16.mxu0 %v6061_v33 }
 0x188   :  { %1137 = vmatpush1.bf16.msra.mxu0 %v6067_v35 }
 0x189   :  { %1138 = vmatprep.subr.bf16.mxu0 %v6072_v36 }
 0x18c   :  { %1139 = vmatpush1.bf16.msra.mxu0 %v6081_v38 }
 0x18d   :  { %1140 = vmatprep.subr.bf16.mxu0 %v6099_v46 }
 0x190   :  { %1141 = vmatpush1.bf16.msra.mxu0 %v6097_v45 }
 0x191   :  { %1142 = vmatprep.subr.bf16.mxu0 %v6107_v48 }
 0x194   :  { %1143 = vmatpush1.bf16.msra.mxu0 %v6115_v51 }
 0x195   :  { %1144 = vmatprep.subr.bf16.mxu0 %v6119_v52 }
 0x198   :  { %1145 = vmatpush1.bf16.msra.mxu0 %v6132_v56 }
 0x199   :  { %1146 = vmatprep.subr.bf16.mxu0 %v6136_v58 }
 0x19c   :  { %1147 = vmatpush1.bf16.msra.mxu0 %v6142_v61 }
 0x19d   :  { %1587 = vmatprep.subr.bf16.mxu0 %v5846_v27 }
 0x19f   :  { %1165 = vmatmul.mubr.bf16.vlgmr.msra.gmra.mrb[4].mxu0 %v819_v17 }
 0x1a0   :  { %1588 = vmatpush1.bf16.msra.mxu0 %v5847_v28  ;;  %1619 = vmatprep.mubr.bf16.mxu0 %v6886_v4 }
 0x1a1   :  { %1589 = vmatprep.subr.bf16.mxu0 %v5848_v30 }
 0x1a4   :  { %1590 = vmatpush1.bf16.msra.mxu0 %v5849_v19 }
 0x1a5   :  { %1591 = vmatprep.subr.bf16.mxu0 %v6061_v33  ;;  %v5414_v33 = vld [vmem:[#allocation7 + $0x40] sm:$0xff]  }
 0x1a6   :  { %5018 = vmatpush3.bf16.msra.mxu1 %v5414_v33 }
 0x1a7   :  { %5019 = vmatprep.subr.bf16.mxu1 %v6884_v11 }
 0x1a8   :  { %1592 = vmatpush1.bf16.msra.mxu0 %v6067_v35  ;;  %v5415_v35 = vld [vmem:[#allocation7 + $0x48] sm:$0xff]  }
 0x1a9   :  { %1593 = vmatprep.subr.bf16.mxu0 %v6072_v36  ;;  %v5416_v36 = vld [vmem:[#allocation7 + $0x50] sm:$0xff]  }
 0x1aa   :  { %5020 = vmatpush3.bf16.msra.mxu1 %v5415_v35 }
 0x1ab   :  { %5021 = vmatprep.subr.bf16.mxu1 %v6884_v11 }
 0x1ac   :  { %1594 = vmatpush1.bf16.msra.mxu0 %v6081_v38  ;;  %v5417_v38 = vld [vmem:[#allocation7 + $0x58] sm:$0xff]  }
 0x1ad   :  { %1595 = vmatprep.subr.bf16.mxu0 %v6099_v46  ;;  %v5419_v46 = vld [vmem:[#allocation7 + $0x68] sm:$0xff]  }
 0x1ae   :  { %5022 = vmatpush3.bf16.msra.mxu1 %v5416_v36 }
 0x1af   :  { %5023 = vmatprep.subr.bf16.mxu1 %v6884_v11 }
 0x1b0   :  { %1596 = vmatpush1.bf16.msra.mxu0 %v6097_v45  ;;  %v5418_v45 = vld [vmem:[#allocation7 + $0x60] sm:$0xff]  }
 0x1b1   :  { %1597 = vmatprep.subr.bf16.mxu0 %v6107_v48  ;;  %v5420_v48 = vld [vmem:[#allocation7 + $0x70] sm:$0xff]  }
 0x1b2   :  { %5024 = vmatpush3.bf16.msra.mxu1 %v5417_v38 }
 0x1b3   :  { %5025 = vmatprep.subr.bf16.mxu1 %v6884_v11 }
 0x1b4   :  { %1598 = vmatpush1.bf16.msra.mxu0 %v6115_v51  ;;  %v5421_v51 = vld [vmem:[#allocation7 + $0x78] sm:$0xff]  }
 0x1b5   :  { %1599 = vmatprep.subr.bf16.mxu0 %v6119_v52  ;;  %v5850_v52 = vld [vmem:[#allocation5 + $0xc] ss:$16 sps:$4 sm:$0xff]  }
 0x1b6   :  { %5026 = vmatpush3.bf16.msra.mxu1 %v5418_v45 }
 0x1b7   :  { %5027 = vmatprep.subr.bf16.mxu1 %v6884_v11 }
 0x1b8   :  { %1600 = vmatpush1.bf16.msra.mxu0 %v6132_v56 }
 0x1b9   :  { %1601 = vmatprep.subr.bf16.mxu0 %v6136_v58 }
 0x1ba   :  { %5028 = vmatpush3.bf16.msra.mxu1 %v5419_v46 }
 0x1bb   :  { %5029 = vmatprep.subr.bf16.mxu1 %v6884_v11 }
 0x1bc   :  { %1602 = vmatpush1.bf16.msra.mxu0 %v6142_v61 }
 0x1bd   :  { %5037 = vmatprep.subr.bf16.mxu0 %v6884_v11 }
 0x1be   :  { %5030 = vmatpush3.bf16.msra.mxu1 %v5420_v48 }
 0x1bf   :  { %5031 = vmatprep.subr.bf16.mxu1 %v6884_v11 }
 0x1c2   :  { %5032 = vmatpush3.bf16.msra.mxu1 %v5421_v51 }
 0x1c3   :  { %1630 = vmatprep.subr.bf16.mxu1 %v5850_v52 }
 0x252   :  { %v6297_v56 = vpop.f32.mrb[24].mxu0  ;;  %v1209_v58 = vpop.f32.mrb[12].mxu1 }
 0x253   :  { %v5015_v61 = vpop.f32.mrb[25].mxu0  ;;  %v1211_v5 = vpop.f32.mrb[13].mxu1  ;;  %v5263_v59 = vadd.f32 %v1209_v58, %v6244_v6 }
 0x254   :  { %v6299_v31 = vpop.f32.mrb[26].mxu0  ;;  %v1213_v32 = vpop.f32.mrb[14].mxu1  ;;  %v5264_v63 = vadd.f32 %v1211_v5, %v6246_v12 }
 0x255   :  { %v5016_v18 = vpop.f32.mrb[27].mxu0  ;;  %v1215_v34 = vpop.f32.mrb[15].mxu1  ;;  %v5265_v62 = vadd.f32 %v1213_v32, %v6244_v6  ;;  %v4565_v1 = vmul.f32 -1.442695, %v5263_v59  ;;  %v5857_v59 = vld [vmem:[#allocation5 + $0x68] ss:$16 sps:$4 sm:$0xff]  }
 0x256   :  { %v5266_v10 = vadd.f32 %v1215_v34, %v6246_v12 }
 0x257   :  { %v4568_v13 = vmul.f32 -1.442695, %v5265_v62  ;;  %v5858_v62 = vld [vmem:[#allocation5 + $0x8c] ss:$16 sps:$4 sm:$0xff]  }
 0x272   :  { %v1166_v37 = vpop.f32.mrb[4].mxu0 }
 0x273   :  { %v5223_v39 = vadd.f32 %v1166_v37, %v6234_v41  ;;  %v1168_v40 = vpop.f32.mrb[5].mxu0 }
 0x274   :  { %v5224_v43 = vadd.f32 %v1168_v40, %v6236_v42  ;;  %v1170_v44 = vpop.f32.mrb[6].mxu0 }
 0x275   :  { %v4563_v47 = vmul.f32 -1.442695, %v5223_v39  ;;  %v5225_v49 = vadd.f32 %v1170_v44, %v6234_v41  ;;  %v1172_v50 = vpop.f32.mrb[7].mxu0 }
 0x276   :  { %v4564_v53 = vmul.f32 -1.442695, %v5224_v43  ;;  %v5226_v54 = vadd.f32 %v1172_v50, %v6236_v42  ;;  %v5851_v50 = vld [vmem:[#allocation5 + $0x8] ss:$16 sps:$4 sm:$0xff]  }
 0x277   :  { %5622 = vpow2.f32 %v4563_v47  ;;  %v4566_v55 = vmul.f32 -1.442695, %v5225_v49 }
 0x278   :  { %5624 = vpow2.f32 %v4564_v53  ;;  %v4567_v57 = vmul.f32 -1.442695, %v5226_v54  ;;  %v5853_v53 = vld [vmem:[#allocation5 + $0x28] ss:$16 sps:$4 sm:$0xff]   ;;  %v5854_v54 = vld [vmem:[#allocation5 + $0x4c] ss:$16 sps:$4 sm:$0xff]  }
 0x279   :  { %5626 = vpow2.f32 %v4566_v55  ;;  %v5855_v55 = vld [vmem:[#allocation5 + $0x48] ss:$16 sps:$4 sm:$0xff]  }
 0x27a   :  { %5628 = vpow2.f32 %v4567_v57  ;;  %v5856_v57 = vld [vmem:[#allocation5 + $0x6c] ss:$16 sps:$4 sm:$0xff]  }
 0x27b   :  { %5630 = vtanh.f32 %v5264_v63  ;;  %v5859_v63 = vld [vmem:[#allocation5 + $0x88] ss:$16 sps:$4 sm:$0xff]  }
 0x27c   :  { %5632 = vpow2.f32 %v4565_v1  ;;  %v5860_v1 = vld [vmem:[#allocation5 + $0xac] ss:$16 sps:$4 sm:$0xff]  }
 0x27d   :  { %5634 = vtanh.f32 %v5266_v10  ;;  %v5422_v10 = vld [vmem:[#allocation7 + $0x80] sm:$0xff]  }
 0x27e   :  { %5636 = vpow2.f32 %v4568_v13  ;;  %v6326_v13 = vld [vmem:[#allocation5 + $0xc] ss:$16 sps:$4 sm:$0xff]  }
 0x281   :  { %v5623_v14 = vpop.eup %5622 }
 0x282   :  { %v5625_v15 = vpop.eup %5624  ;;  %v1244_v16 = vadd.f32 1.0, %v5623_v14  ;;  %v6328_v14 = vld [vmem:[#allocation5 + $0x8] ss:$16 sps:$4 sm:$0xff]  }
 0x283   :  { %v5627_v17 = vpop.eup %5626  ;;  %v1245_v27 = vadd.f32 1.0, %v5625_v15  ;;  %v6342_v15 = vld [vmem:[#allocation5 + $0x48] ss:$16 sps:$4 sm:$0xff]  }
 0x284   :  { %v5629_v28 = vpop.eup %5628  ;;  %5638 = vrcp.f32 %v1244_v16  ;;  %v1247_v30 = vadd.f32 1.0, %v5627_v17  ;;  %v5434_v16 = vld [vmem:[#allocation7 + $0x98] sm:$0xff]  }
 0x285   :  { %5640 = vrcp.f32 %v1245_v27  ;;  %v1248_v19 = vadd.f32 1.0, %v5629_v28  ;;  %v5631_v33 = vpop.eup %5630  ;;  %v6347_v17 = vld [vmem:[#allocation5 + $0x6c] ss:$16 sps:$4 sm:$0xff]   ;;  %v6349_v27 = vld [vmem:[#allocation5 + $0x68] ss:$16 sps:$4 sm:$0xff]   ;;  %v5438_v28 = vld [vmem:[#allocation7 + $0xa0] sm:$0xff]  }
 0x286   :  { %5642 = vrcp.f32 %v1247_v30  ;;  %v5633_v35 = vpop.eup %5632  ;;  %v6354_v30 = vld [vmem:[#allocation5 + $0x8c] ss:$16 sps:$4 sm:$0xff]  }
 0x287   :  { %5644 = vrcp.f32 %v1248_v19  ;;  %v5635_v36 = vpop.eup %5634  ;;  %v1246_v48 = vadd.f32 1.0, %v5633_v35  ;;  %v6356_v19 = vld [vmem:[#allocation5 + $0x88] ss:$16 sps:$4 sm:$0xff]  }
 0x288   :  { %v5637_v38 = vpop.eup %5636  ;;  %v6361_v35 = vld [vmem:[#allocation5 + $0xa8] ss:$16 sps:$4 sm:$0xff]  }
 0x289   :  { %v1249_v5 = vadd.f32 1.0, %v5637_v38  ;;  %5646 = vrcp.f32 %v1246_v48  ;;  %v6365_v38 = vld [vmem:[#allocation5 + $0xcc] ss:$16 sps:$4 sm:$0xff]  }
 0x28a   :  { %v6373_v48 = vld [vmem:[#allocation5 + $0xec] ss:$16 sps:$4 sm:$0xff]  }
 0x28e   :  { %v5639_v45 = vpop.eup %5638 }
 0x28f   :  { %v5641_v46 = vpop.eup %5640  ;;  %v1266_v51 = vmul.f32 %v5639_v45, %v5631_v33  ;;  %v5442_v33 = vld [vmem:[#allocation7 + $0xa8] sm:$0xff]   ;;  %v5446_v45 = vld [vmem:[#allocation7 + $0xb0] sm:$0xff]  }
 0x290   :  { %v5643_v52 = vpop.eup %5642  ;;  %v1264_v58 = vmul.f32 %v5641_v46, %v6252_v60  ;;  %v6370_v46 = vld [vmem:[#allocation5 + $0xc8] ss:$16 sps:$4 sm:$0xff]  }
 0x291   :  { %v5645_v61 = vpop.eup %5644  ;;  %v1267_v32 = vmul.f32 %v5643_v52, %v5635_v36  ;;  %v6363_v36 = vld [vmem:[#allocation5 + $0xac] ss:$16 sps:$4 sm:$0xff]   ;;  %v6377_v52 = vld [vmem:[#allocation5 + $0xe8] ss:$16 sps:$4 sm:$0xff]  }
 0x292   :  { %v6310_v18 = vadd.f32 %v1266_v51, %v1264_v58  ;;  %v1265_v34 = vmul.f32 %v5645_v61, %v6255_v0  ;;  %v5852_v0 = vld [vmem:[#allocation5 + $0x2c] ss:$16 sps:$4 sm:$0xff]   ;;  %v6379_v58 = vld [vmem:[#allocation5 + $0x4] ss:$16 sps:$4 sm:$0xff]  }
 0x293   :  { %v5647_v39 = vpop.eup %5646  ;;  %v5450_v51 = vld [vmem:[#allocation7 + $0xb8] sm:$0xff]  }
 0x294   :  { %5648 = vtanh.f32 %v6310_v18  ;;  %v6314_v37 = vadd.f32 %v1267_v32, %v1265_v34 }
 0x295   :  { %5650 = vrcp.f32 %v1249_v5 }
 0x296   :  { %5652 = vtanh.f32 %v6314_v37 }
 0x29e   :  { %v5649_v40 = vpop.eup %5648 }
 0x29f   :  { %v5651_v43 = vpop.eup %5650  ;;  %v1272_v60 = vmul.f32 %v5649_v40, %v5647_v39 }
 0x2a0   :  { %v5653_v44 = vpop.eup %5652 }
 0x2a1   :  { %v1273_v47 = vmul.f32 %v5653_v44, %v5651_v43 }
 0x2a3   :  { %v1274_v49 = vpack.c.bf16 %v1273_v47, %v1272_v60 }
 0x2a5   :  { %5034 = vmatmul.mubr.bf16.vlgmr.msra.gmra.mrb[40].mxu1 %v1274_v49  ;;  %1620 = vmatmul.mubr.bf16.vlgmr.msra.gmra.mrb[8].mxu0 %v1274_v49 }
 0x2a6   :  { %1631 = vmatpush1.bf16.msra.mxu1 %v5851_v50  ;;  %1662 = vmatprep.mubr.bf16.mxu1 %v6886_v4 }
 0x2a7   :  { %1632 = vmatprep.subr.bf16.mxu1 %v5852_v0  ;;  %5053 = vmatprep.mubr.msk.bf16.mxu0 %vm5918_vm2, %v6884_v11 }
 0x2a8   :  { %5038 = vmatpush3.bf16.msra.mxu0 %v5422_v10 }
 0x2a9   :  { %5039 = vmatprep.subr.bf16.mxu0 %v6884_v11 }
 0x2aa   :  { %1633 = vmatpush1.bf16.msra.mxu1 %v5853_v53 }
 0x2ab   :  { %1634 = vmatprep.subr.bf16.mxu1 %v5854_v54 }
 0x2ae   :  { %1635 = vmatpush1.bf16.msra.mxu1 %v5855_v55 }
 0x2af   :  { %1636 = vmatprep.subr.bf16.mxu1 %v5856_v57 }
 0x2b2   :  { %1637 = vmatpush1.bf16.msra.mxu1 %v5857_v59 }
 0x2b3   :  { %1638 = vmatprep.subr.bf16.mxu1 %v5858_v62 }
 0x2b6   :  { %1639 = vmatpush1.bf16.msra.mxu1 %v5859_v63 }
 0x2b7   :  { %1640 = vmatprep.subr.bf16.mxu1 %v5860_v1 }
 0x2ba   :  { %1641 = vmatpush1.bf16.msra.mxu1 %v6154_v2  ;;  %v5426_v2 = vld [vmem:[#allocation7 + $0x88] sm:$0xff]  }
 0x2bb   :  { %1642 = vmatprep.subr.bf16.mxu1 %v6158_v3  ;;  %v6333_v3 = vld [vmem:[#allocation5 + $0x2c] ss:$16 sps:$4 sm:$0xff]   ;;  %5040 = vmatpush3.bf16.msra.mxu0 %v5426_v2 }
 0x2bc   :  { %5041 = vmatprep.subr.bf16.mxu0 %v6884_v11 }
 0x2be   :  { %1643 = vmatpush1.bf16.msra.mxu1 %v6161_v7  ;;  %v6335_v7 = vld [vmem:[#allocation5 + $0x28] ss:$16 sps:$4 sm:$0xff]  }
 0x2bf   :  { %1644 = vmatprep.subr.bf16.mxu1 %v6163_v8  ;;  %v5430_v8 = vld [vmem:[#allocation7 + $0x90] sm:$0xff]  }
 0x2c0   :  { %5042 = vmatpush3.bf16.msra.mxu0 %v5430_v8 }
 0x2c1   :  { %5043 = vmatprep.subr.bf16.mxu0 %v6884_v11 }
 0x2c2   :  { %1645 = vmatpush1.bf16.msra.mxu1 %v6169_v9  ;;  %v6340_v9 = vld [vmem:[#allocation5 + $0x4c] ss:$16 sps:$4 sm:$0xff]  }
 0x2c3   :  { %2085 = vmatprep.subr.bf16.mxu1 %v6326_v13 }
 0x2c4   :  { %5044 = vmatpush3.bf16.msra.mxu0 %v5434_v16 }
 0x2c5   :  { %1663 = vmatmul.mubr.bf16.vlgmr.msra.gmra.mrb[16].mxu1 %v1274_v49  ;;  %5045 = vmatprep.subr.bf16.mxu0 %v6884_v11 }
 0x2c6   :  { %2117 = vmatprep.mubr.bf16.mxu1 %v6886_v4  ;;  %2086 = vmatpush1.bf16.msra.mxu1 %v6328_v14 }
 0x2c7   :  { %2087 = vmatprep.subr.bf16.mxu1 %v6333_v3 }
 0x2c8   :  { %5046 = vmatpush3.bf16.msra.mxu0 %v5438_v28 }
 0x2c9   :  { %5047 = vmatprep.subr.bf16.mxu0 %v6884_v11 }
 0x2ca   :  { %2088 = vmatpush1.bf16.msra.mxu1 %v6335_v7 }
 0x2cb   :  { %2089 = vmatprep.subr.bf16.mxu1 %v6340_v9 }
 0x2cc   :  { %5048 = vmatpush3.bf16.msra.mxu0 %v5442_v33 }
 0x2cd   :  { %5049 = vmatprep.subr.bf16.mxu0 %v6884_v11 }
 0x2ce   :  { %2090 = vmatpush1.bf16.msra.mxu1 %v6342_v15 }
 0x2cf   :  { %2091 = vmatprep.subr.bf16.mxu1 %v6347_v17 }
 0x2d0   :  { %5050 = vmatpush3.bf16.msra.mxu0 %v5446_v45 }
 0x2d1   :  { %5051 = vmatprep.subr.bf16.mxu0 %v6884_v11 }
 0x2d2   :  { %2092 = vmatpush1.bf16.msra.mxu1 %v6349_v27 }
 0x2d3   :  { %2093 = vmatprep.subr.bf16.mxu1 %v6354_v30 }
 0x2d4   :  { %5052 = vmatpush3.bf16.msra.mxu0 %v5450_v51 }
 0x2d5   :  { %2042 = vmatprep.subr.bf16.mxu0 %v6379_v58 }
 0x2d6   :  { %2094 = vmatpush1.bf16.msra.mxu1 %v6356_v19 }
 0x2d7   :  { %2095 = vmatprep.subr.bf16.mxu1 %v6363_v36 }
 0x2da   :  { %2096 = vmatpush1.bf16.msra.mxu1 %v6361_v35 }
 0x2db   :  { %2097 = vmatprep.subr.bf16.mxu1 %v6365_v38 }
 0x2de   :  { %2098 = vmatpush1.bf16.msra.mxu1 %v6370_v46 }
 0x2df   :  { %2099 = vmatprep.subr.bf16.mxu1 %v6373_v48 }
 0x2e2   :  { %2100 = vmatpush1.bf16.msra.mxu1 %v6377_v52 }
 0x2e3   :  { %5057 = vmatprep.subr.bf16.mxu1 %v6884_v11 }
 0x378   :  { %v1359_v61 = vpop.f32.mrb[40].mxu1  ;;  %v1621_v5 = vpop.f32.mrb[8].mxu0 }
 0x379   :  { %v6386_v32 = vadd.f32 %v1359_v61, %v6297_v56  ;;  %v5035_v34 = vpop.f32.mrb[41].mxu1  ;;  %v1623_v39 = vpop.f32.mrb[9].mxu0  ;;  %v5227_v49 = vadd.f32 %v1621_v5, %v6234_v41 }
 0x37a   :  { %v1362_v40 = vpop.f32.mrb[42].mxu1  ;;  %v1625_v43 = vpop.f32.mrb[10].mxu0  ;;  %v5228_v50 = vadd.f32 %v1623_v39, %v6236_v42 }
 0x37b   :  { %v6389_v44 = vadd.f32 %v1362_v40, %v6299_v31  ;;  %v5036_v60 = vpop.f32.mrb[43].mxu1  ;;  %v1627_v47 = vpop.f32.mrb[11].mxu0  ;;  %v5229_v0 = vadd.f32 %v1625_v43, %v6234_v41  ;;  %v4609_v54 = vmul.f32 -1.442695, %v5227_v49 }
 0x37c   :  { %v5230_v53 = vadd.f32 %v1627_v47, %v6236_v42  ;;  %v4610_v56 = vmul.f32 -1.442695, %v5228_v50 }
 0x37d   :  { %v4612_v55 = vmul.f32 -1.442695, %v5229_v0  ;;  %5654 = vpow2.f32 %v4609_v54 }
 0x37e   :  { %v4613_v57 = vmul.f32 -1.442695, %v5230_v53  ;;  %5656 = vpow2.f32 %v4610_v56 }
 0x37f   :  { %5658 = vpow2.f32 %v4612_v55 }
 0x380   :  { %5660 = vpow2.f32 %v4613_v57 }
 0x387   :  { %v5655_v31 = vpop.eup %5654 }
 0x388   :  { %v5657_v59 = vpop.eup %5656  ;;  %v1699_v1 = vadd.f32 1.0, %v5655_v31 }
 0x389   :  { %v5659_v62 = vpop.eup %5658  ;;  %v1700_v10 = vadd.f32 1.0, %v5657_v59 }
 0x38a   :  { %v5661_v63 = vpop.eup %5660  ;;  %v1702_v2 = vadd.f32 1.0, %v5659_v62  ;;  %5662 = vrcp.f32 %v1699_v1 }
 0x38b   :  { %v1703_v8 = vadd.f32 1.0, %v5661_v63  ;;  %5664 = vrcp.f32 %v1700_v10 }
 0x38c   :  { %5666 = vrcp.f32 %v1702_v2 }
 0x38d   :  { %5668 = vrcp.f32 %v1703_v8 }
 0x394   :  { %v5663_v43 = vpop.eup %5662 }
 0x395   :  { %v5665_v60 = vpop.eup %5664 }
 0x396   :  { %v5667_v47 = vpop.eup %5666  ;;  %v1719_v53 = vmul.f32 %v5665_v60, %v6310_v18  ;;  %v6436_v60 = vld [vmem:[#allocation5 + $0xa4] ss:$16 sps:$4 sm:$0xff]  }
 0x397   :  { %v5669_v49 = vpop.eup %5668 }
 0x398   :  { %v1664_v16 = vpop.f32.mrb[16].mxu1  ;;  %v1720_v31 = vmul.f32 %v5669_v49, %v6314_v37  ;;  %v6442_v49 = vld [vmem:[#allocation5 + $0xc4] ss:$16 sps:$4 sm:$0xff]  }
 0x399   :  { %v5267_v28 = vadd.f32 %v1664_v16, %v6244_v6  ;;  %v1666_v33 = vpop.f32.mrb[17].mxu1 }
 0x39a   :  { %v5268_v45 = vadd.f32 %v1666_v33, %v6246_v12  ;;  %v1668_v51 = vpop.f32.mrb[18].mxu1  ;;  %v6407_v33 = vld [vmem:[#allocation5] ss:$16 sps:$4 sm:$0xff]  }
 0x39b   :  { %v4611_v61 = vmul.f32 -1.442695, %v5267_v28  ;;  %v5269_v5 = vadd.f32 %v1668_v51, %v6244_v6  ;;  %v1670_v34 = vpop.f32.mrb[19].mxu1  ;;  %v6412_v51 = vld [vmem:[#allocation5 + $0x20] ss:$16 sps:$4 sm:$0xff]  }
 0x39c   :  { %5670 = vtanh.f32 %v5268_v45  ;;  %v5270_v39 = vadd.f32 %v1670_v34, %v6246_v12  ;;  %v6409_v45 = vld [vmem:[#allocation5 + $0x24] ss:$16 sps:$4 sm:$0xff]  }
 0x39d   :  { %5672 = vpow2.f32 %v4611_v61  ;;  %v4614_v40 = vmul.f32 -1.442695, %v5269_v5  ;;  %v6416_v61 = vld [vmem:[#allocation5 + $0x44] ss:$16 sps:$4 sm:$0xff]   ;;  %v6421_v5 = vld [vmem:[#allocation5 + $0x40] ss:$16 sps:$4 sm:$0xff]  }
 0x39e   :  { %5674 = vtanh.f32 %v5270_v39  ;;  %v6424_v34 = vld [vmem:[#allocation5 + $0x64] ss:$16 sps:$4 sm:$0xff]   ;;  %v6427_v39 = vld [vmem:[#allocation5 + $0x60] ss:$16 sps:$4 sm:$0xff]  }
 0x39f   :  { %5676 = vpow2.f32 %v4614_v40  ;;  %v6430_v40 = vld [vmem:[#allocation5 + $0x84] ss:$16 sps:$4 sm:$0xff]  }
 0x3a6   :  { %v5671_v50 = vpop.eup %5670 }
 0x3a7   :  { %v5673_v0 = vpop.eup %5672  ;;  %v1721_v54 = vmul.f32 %v5671_v50, %v5663_v43  ;;  %v6433_v43 = vld [vmem:[#allocation5 + $0x80] ss:$16 sps:$4 sm:$0xff]  }
 0x3a8   :  { %v5675_v56 = vpop.eup %5674  ;;  %v1701_v55 = vadd.f32 1.0, %v5673_v0  ;;  %v6445_v50 = vld [vmem:[#allocation5 + $0xc0] ss:$16 sps:$4 sm:$0xff]   ;;  %v6448_v0 = vld [vmem:[#allocation5 + $0xe4] ss:$16 sps:$4 sm:$0xff]  }
 0x3a9   :  { %v5677_v57 = vpop.eup %5676  ;;  %v6401_v59 = vadd.f32 %v1721_v54, %v1719_v53  ;;  %v1722_v62 = vmul.f32 %v5675_v56, %v5667_v47  ;;  %v6439_v47 = vld [vmem:[#allocation5 + $0xa0] ss:$16 sps:$4 sm:$0xff]   ;;  %v5479_v56 = vld [vmem:[#allocation7 + $0xc8] sm:$0xff]  }
 0x3aa   :  { %5678 = vrcp.f32 %v1701_v55  ;;  %v1704_v63 = vadd.f32 1.0, %v5677_v57  ;;  %v6451_v53 = vld [vmem:[#allocation5 + $0xe0] ss:$16 sps:$4 sm:$0xff]   ;;  %v5481_v57 = vld [vmem:[#allocation7 + $0xd8] sm:$0xff]  }
 0x3ab   :  { %5680 = vtanh.f32 %v6401_v59  ;;  %v6404_v1 = vadd.f32 %v1722_v62, %v1720_v31  ;;  %v5478_v54 = vld [vmem:[#allocation7 + $0xc0] sm:$0xff]   ;;  %v5480_v55 = vld [vmem:[#allocation7 + $0xd0] sm:$0xff]   ;;  %v5483_v62 = vld [vmem:[#allocation7 + $0xe8] sm:$0xff]  }
 0x3ac   :  { %5682 = vrcp.f32 %v1704_v63  ;;  %v5482_v31 = vld [vmem:[#allocation7 + $0xe0] sm:$0xff]   ;;  %v5484_v63 = vld [vmem:[#allocation7 + $0xf0] sm:$0xff]  }
 0x3ad   :  { %5684 = vtanh.f32 %v6404_v1 }
 0x3b4   :  { %v5679_v10 = vpop.eup %5678 }
 0x3b5   :  { %v5681_v18 = vpop.eup %5680 }
 0x3b6   :  { %v5683_v2 = vpop.eup %5682  ;;  %v1727_v16 = vmul.f32 %v5681_v18, %v5679_v10  ;;  %v5485_v10 = vld [vmem:[#allocation7 + $0xf8] sm:$0xff]  }
 0x3b7   :  { %v5685_v8 = vpop.eup %5684 }
 0x3b8   :  { %v1728_v28 = vmul.f32 %v5685_v8, %v5683_v2 }
 0x3ba   :  { %v1729_v37 = vpack.c.bf16 %v1728_v28, %v1727_v16 }
 0x3bc   :  { %5054 = vmatmul.mubr.bf16.vlgmr.msra.gmra.mrb[28].mxu0 %v1729_v37  ;;  %2118 = vmatmul.mubr.bf16.vlgmr.msra.gmra.mrb[20].mxu1 %v1729_v37 }
 0x3bd   :  { %2043 = vmatpush1.bf16.msra.mxu0 %v6407_v33  ;;  %2074 = vmatprep.mubr.bf16.mxu0 %v6886_v4 }
 0x3be   :  { %2044 = vmatprep.subr.bf16.mxu0 %v6409_v45  ;;  %5073 = vmatprep.mubr.msk.bf16.mxu1 %vm5918_vm2, %v6884_v11 }
 0x3bf   :  { %5058 = vmatpush3.bf16.msra.mxu1 %v5478_v54 }
 0x3c0   :  { %5059 = vmatprep.subr.bf16.mxu1 %v6884_v11 }
 0x3c1   :  { %2045 = vmatpush1.bf16.msra.mxu0 %v6412_v51 }
 0x3c2   :  { %2046 = vmatprep.subr.bf16.mxu0 %v6416_v61 }
 0x3c3   :  { %5060 = vmatpush3.bf16.msra.mxu1 %v5479_v56 }
 0x3c4   :  { %5061 = vmatprep.subr.bf16.mxu1 %v6884_v11 }
 0x3c5   :  { %2047 = vmatpush1.bf16.msra.mxu0 %v6421_v5 }
 0x3c6   :  { %2048 = vmatprep.subr.bf16.mxu0 %v6424_v34 }
 0x3c7   :  { %5062 = vmatpush3.bf16.msra.mxu1 %v5480_v55 }
 0x3c8   :  { %5063 = vmatprep.subr.bf16.mxu1 %v6884_v11 }
 0x3c9   :  { %2049 = vmatpush1.bf16.msra.mxu0 %v6427_v39 }
 0x3ca   :  { %2050 = vmatprep.subr.bf16.mxu0 %v6430_v40 }
 0x3cb   :  { %5064 = vmatpush3.bf16.msra.mxu1 %v5481_v57 }
 0x3cc   :  { %5065 = vmatprep.subr.bf16.mxu1 %v6884_v11 }
 0x3cd   :  { %2051 = vmatpush1.bf16.msra.mxu0 %v6433_v43 }
 0x3ce   :  { %2052 = vmatprep.subr.bf16.mxu0 %v6436_v60 }
 0x3cf   :  { %5066 = vmatpush3.bf16.msra.mxu1 %v5482_v31 }
 0x3d0   :  { %5067 = vmatprep.subr.bf16.mxu1 %v6884_v11 }
 0x3d1   :  { %2053 = vmatpush1.bf16.msra.mxu0 %v6439_v47 }
 0x3d2   :  { %2054 = vmatprep.subr.bf16.mxu0 %v6442_v49 }
 0x3d3   :  { %5068 = vmatpush3.bf16.msra.mxu1 %v5483_v62 }
 0x3d4   :  { %5069 = vmatprep.subr.bf16.mxu1 %v6884_v11 }
 0x3d5   :  { %2055 = vmatpush1.bf16.msra.mxu0 %v6445_v50 }
 0x3d6   :  { %2056 = vmatprep.subr.bf16.mxu0 %v6448_v0 }
 0x3d7   :  { %5070 = vmatpush3.bf16.msra.mxu1 %v5484_v63 }
 0x3d8   :  { %5071 = vmatprep.subr.bf16.mxu1 %v6884_v11 }
 0x3d9   :  { %2057 = vmatpush1.bf16.msra.mxu0 %v6451_v53 }
 0x3da   :  { %2497 = vmatprep.subr.bf16.mxu0 %v6379_v58 }
 0x3db   :  { %5072 = vmatpush3.bf16.msra.mxu1 %v5485_v10 }
 0x3dc   :  { %2075 = vmatmul.mubr.bf16.vlgmr.msra.gmra.mrb[12].mxu0 %v1729_v37  ;;  %2540 = vmatprep.subr.bf16.mxu1 %v6326_v13 }
 0x3dd   :  { %2498 = vmatpush1.bf16.msra.mxu0 %v6407_v33  ;;  %2529 = vmatprep.mubr.bf16.mxu0 %v6886_v4 }
 0x3de   :  { %2499 = vmatprep.subr.bf16.mxu0 %v6409_v45 }
 0x3e1   :  { %2500 = vmatpush1.bf16.msra.mxu0 %v6412_v51 }
 0x3e2   :  { %2501 = vmatprep.subr.bf16.mxu0 %v6416_v61 }
 0x3e5   :  { %2502 = vmatpush1.bf16.msra.mxu0 %v6421_v5 }
 0x3e6   :  { %2503 = vmatprep.subr.bf16.mxu0 %v6424_v34 }
 0x3e9   :  { %2504 = vmatpush1.bf16.msra.mxu0 %v6427_v39 }
 0x3ea   :  { %2505 = vmatprep.subr.bf16.mxu0 %v6430_v40 }
 0x3ed   :  { %2506 = vmatpush1.bf16.msra.mxu0 %v6433_v43 }
 0x3ee   :  { %2507 = vmatprep.subr.bf16.mxu0 %v6436_v60 }
 0x3f1   :  { %2508 = vmatpush1.bf16.msra.mxu0 %v6439_v47 }
 0x3f2   :  { %2509 = vmatprep.subr.bf16.mxu0 %v6442_v49 }
 0x3f5   :  { %2510 = vmatpush1.bf16.msra.mxu0 %v6445_v50 }
 0x3f6   :  { %2511 = vmatprep.subr.bf16.mxu0 %v6448_v0 }
 0x3f9   :  { %2512 = vmatpush1.bf16.msra.mxu0 %v6451_v53 }
 0x3fa   :  { %5077 = vmatprep.subr.bf16.mxu0 %v6884_v11 }
 0x48f   :  { %v1814_v18 = vpop.f32.mrb[28].mxu0  ;;  %v2119_v2 = vpop.f32.mrb[20].mxu1 }
 0x490   :  { %v6482_v8 = vadd.f32 %v1814_v18, %v6386_v32  ;;  %v5055_v16 = vpop.f32.mrb[29].mxu0  ;;  %v2121_v28 = vpop.f32.mrb[21].mxu1 }
 0x491   :  { %v1817_v37 = vpop.f32.mrb[30].mxu0  ;;  %v2123_v54 = vpop.f32.mrb[22].mxu1 }
 0x492   :  { %v6485_v56 = vadd.f32 %v1817_v37, %v6389_v44  ;;  %v5056_v55 = vpop.f32.mrb[31].mxu0  ;;  %v2125_v57 = vpop.f32.mrb[23].mxu1  ;;  %v5271_v37 = vadd.f32 %v2119_v2, %v6244_v6 }
 0x493   :  { %v5273_v55 = vadd.f32 %v2123_v54, %v6244_v6 }
 0x4af   :  { %v2076_v31 = vpop.f32.mrb[12].mxu0 }
 0x4b0   :  { %v5231_v62 = vadd.f32 %v2076_v31, %v6234_v41  ;;  %v2078_v63 = vpop.f32.mrb[13].mxu0  ;;  %v5272_v31 = vadd.f32 %v2121_v28, %v6246_v12 }
 0x4b1   :  { %v5232_v10 = vadd.f32 %v2078_v63, %v6236_v42  ;;  %v2080_v11 = vpop.f32.mrb[14].mxu0  ;;  %v4657_v63 = vmul.f32 -1.442695, %v5271_v37 }
 0x4b2   :  { %v4655_v4 = vmul.f32 -1.442695, %v5231_v62  ;;  %v5233_v32 = vadd.f32 %v2080_v11, %v6234_v41  ;;  %v2082_v18 = vpop.f32.mrb[15].mxu0  ;;  %v5274_v62 = vadd.f32 %v2125_v57, %v6246_v12  ;;  %v4660_v11 = vmul.f32 -1.442695, %v5273_v55 }
 0x4b3   :  { %v4656_v16 = vmul.f32 -1.442695, %v5232_v10  ;;  %v5234_v29 = vadd.f32 %v2082_v18, %v6236_v42 }
 0x4b4   :  { %5686 = vpow2.f32 %v4655_v4  ;;  %v4658_v26 = vmul.f32 -1.442695, %v5233_v32 }
 0x4b5   :  { %5688 = vpow2.f32 %v4656_v16  ;;  %v4659_v44 = vmul.f32 -1.442695, %v5234_v29 }
 0x4b6   :  { %5690 = vpow2.f32 %v4658_v26 }
 0x4b7   :  { %5692 = vpow2.f32 %v4659_v44 }
 0x4b8   :  { %5694 = vtanh.f32 %v5272_v31 }
 0x4b9   :  { %5696 = vpow2.f32 %v4657_v63 }
 0x4ba   :  { %5698 = vtanh.f32 %v5274_v62 }
 0x4bb   :  { %5700 = vpow2.f32 %v4660_v11 }
 0x4be   :  { %v5687_v10 = vpop.eup %5686 }
 0x4bf   :  { %v5689_v18 = vpop.eup %5688  ;;  %v2154_v4 = vadd.f32 1.0, %v5687_v10 }
 0x4c0   :  { %v5691_v32 = vpop.eup %5690  ;;  %v2155_v29 = vadd.f32 1.0, %v5689_v18 }
 0x4c1   :  { %v5693_v2 = vpop.eup %5692  ;;  %5702 = vrcp.f32 %v2154_v4  ;;  %v2157_v26 = vadd.f32 1.0, %v5691_v32 }
 0x4c2   :  { %5704 = vrcp.f32 %v2155_v29  ;;  %v2158_v54 = vadd.f32 1.0, %v5693_v2  ;;  %v5695_v28 = vpop.eup %5694 }
 0x4c3   :  { %5706 = vrcp.f32 %v2157_v26  ;;  %v5697_v16 = vpop.eup %5696 }
 0x4c4   :  { %5708 = vrcp.f32 %v2158_v54  ;;  %v5699_v57 = vpop.eup %5698  ;;  %v2156_v31 = vadd.f32 1.0, %v5697_v16 }
 0x4c5   :  { %v5701_v44 = vpop.eup %5700 }
 0x4c6   :  { %v2159_v18 = vadd.f32 1.0, %v5701_v44  ;;  %5710 = vrcp.f32 %v2156_v31 }
 0x4cb   :  { %v5703_v37 = vpop.eup %5702 }
 0x4cc   :  { %v5705_v55 = vpop.eup %5704  ;;  %v2176_v63 = vmul.f32 %v5703_v37, %v5695_v28 }
 0x4cd   :  { %v5707_v62 = vpop.eup %5706  ;;  %v2174_v10 = vmul.f32 %v5705_v55, %v6401_v59 }
 0x4ce   :  { %v5709_v11 = vpop.eup %5708  ;;  %v2177_v25 = vmul.f32 %v5707_v62, %v5699_v57 }
 0x4cf   :  { %v6496_v4 = vadd.f32 %v2176_v63, %v2174_v10  ;;  %v2175_v32 = vmul.f32 %v5709_v11, %v6404_v1  ;;  %v6891_v1 = vmov 0  }
 0x4d0   :  { %v5711_v2 = vpop.eup %5710 }
 0x4d1   :  { %5712 = vtanh.f32 %v6496_v4  ;;  %v6500_v29 = vadd.f32 %v2177_v25, %v2175_v32  ;;  %v6892_v25 = vmov 0.0  }
 0x4d2   :  { %5714 = vrcp.f32 %v2159_v18 }
 0x4d3   :  { %5716 = vtanh.f32 %v6500_v29 }
 0x4db   :  { %v5713_v26 = vpop.eup %5712 }
 0x4dc   :  { %v5715_v54 = vpop.eup %5714  ;;  %v2182_v59 = vmul.f32 %v5713_v26, %v5711_v2 }
 0x4dd   :  { %v5717_v28 = vpop.eup %5716 }
 0x4de   :  { %v2183_v16 = vmul.f32 %v5717_v28, %v5715_v54 }
 0x4e0   :  { %v2184_v44 = vpack.c.bf16 %v2183_v16, %v2182_v59 }
 0x4e2   :  { %5074 = vmatmul.mubr.bf16.vlgmr.msra.gmra.mrb[44].mxu1 %v2184_v44  ;;  %2530 = vmatmul.mubr.bf16.vlgmr.msra.gmra.mrb[16].mxu0 %v2184_v44 }
 0x4e3   :  { %2541 = vmatpush1.bf16.msra.mxu1 %v6328_v14  ;;  %2572 = vmatprep.mubr.bf16.mxu1 %v6891_v1 }
 0x4e4   :  { %2542 = vmatprep.subr.bf16.mxu1 %v6333_v3  ;;  %5093 = vmatprep.mubr.msk.bf16.mxu0 %vm5918_vm2, %v6892_v25 }
 0x4e7   :  { %2543 = vmatpush1.bf16.msra.mxu1 %v6335_v7 }
 0x4e8   :  { %2544 = vmatprep.subr.bf16.mxu1 %v6340_v9 }
 0x4eb   :  { %2545 = vmatpush1.bf16.msra.mxu1 %v6342_v15 }
 0x4ec   :  { %2546 = vmatprep.subr.bf16.mxu1 %v6347_v17 }
 0x4ef   :  { %2547 = vmatpush1.bf16.msra.mxu1 %v6349_v27 }
 0x4f0   :  { %2548 = vmatprep.subr.bf16.mxu1 %v6354_v30 }
 0x4f3   :  { %2549 = vmatpush1.bf16.msra.mxu1 %v6356_v19 }
 0x4f4   :  { %2550 = vmatprep.subr.bf16.mxu1 %v6363_v36 }
 0x4f7   :  { %2551 = vmatpush1.bf16.msra.mxu1 %v6361_v35 }
 0x4f8   :  { %2552 = vmatprep.subr.bf16.mxu1 %v6365_v38 }
 0x4fb   :  { %2553 = vmatpush1.bf16.msra.mxu1 %v6370_v46 }
 0x4fc   :  { %2554 = vmatprep.subr.bf16.mxu1 %v6373_v48 }
 0x4ff   :  { %2555 = vmatpush1.bf16.msra.mxu1 %v6377_v52 }
 0x500   :  { %2995 = vmatprep.subr.bf16.mxu1 %v6326_v13  ;;  %v5486_v13 = vld [vmem:[#allocation7 + $0x100] sm:$0xff]  }
 0x501   :  { %5078 = vmatpush3.bf16.msra.mxu0 %v5486_v13 }
 0x502   :  { %2573 = vmatmul.mubr.bf16.vlgmr.msra.gmra.mrb[24].mxu1 %v2184_v44  ;;  %5079 = vmatprep.subr.bf16.mxu0 %v6892_v25 }
 0x503   :  { %2996 = vmatpush1.bf16.msra.mxu1 %v6328_v14  ;;  %3027 = vmatprep.mubr.bf16.mxu1 %v6891_v1  ;;  %v5487_v14 = vld [vmem:[#allocation7 + $0x108] sm:$0xff]  }
 0x504   :  { %2997 = vmatprep.subr.bf16.mxu1 %v6333_v3  ;;  %v5488_v3 = vld [vmem:[#allocation7 + $0x110] sm:$0xff]  }
 0x505   :  { %5080 = vmatpush3.bf16.msra.mxu0 %v5487_v14 }
 0x506   :  { %5081 = vmatprep.subr.bf16.mxu0 %v6892_v25 }
 0x507   :  { %2998 = vmatpush1.bf16.msra.mxu1 %v6335_v7  ;;  %v5489_v7 = vld [vmem:[#allocation7 + $0x118] sm:$0xff]  }
 0x508   :  { %2999 = vmatprep.subr.bf16.mxu1 %v6340_v9  ;;  %v5490_v9 = vld [vmem:[#allocation7 + $0x120] sm:$0xff]  }
 0x509   :  { %5082 = vmatpush3.bf16.msra.mxu0 %v5488_v3 }
 0x50a   :  { %5083 = vmatprep.subr.bf16.mxu0 %v6892_v25 }
 0x50b   :  { %3000 = vmatpush1.bf16.msra.mxu1 %v6342_v15  ;;  %v5491_v15 = vld [vmem:[#allocation7 + $0x128] sm:$0xff]  }
 0x50c   :  { %3001 = vmatprep.subr.bf16.mxu1 %v6347_v17  ;;  %v5492_v17 = vld [vmem:[#allocation7 + $0x130] sm:$0xff]  }
 0x50d   :  { %5084 = vmatpush3.bf16.msra.mxu0 %v5489_v7 }
 0x50e   :  { %5085 = vmatprep.subr.bf16.mxu0 %v6892_v25 }
 0x50f   :  { %3002 = vmatpush1.bf16.msra.mxu1 %v6349_v27  ;;  %v5493_v27 = vld [vmem:[#allocation7 + $0x138] sm:$0xff]  }
 0x510   :  { %3003 = vmatprep.subr.bf16.mxu1 %v6354_v30 }
 0x511   :  { %5086 = vmatpush3.bf16.msra.mxu0 %v5490_v9 }
 0x512   :  { %5087 = vmatprep.subr.bf16.mxu0 %v6892_v25 }
 0x513   :  { %3004 = vmatpush1.bf16.msra.mxu1 %v6356_v19 }
 0x514   :  { %3005 = vmatprep.subr.bf16.mxu1 %v6363_v36 }
 0x515   :  { %5088 = vmatpush3.bf16.msra.mxu0 %v5491_v15 }
 0x516   :  { %5089 = vmatprep.subr.bf16.mxu0 %v6892_v25 }
 0x517   :  { %3006 = vmatpush1.bf16.msra.mxu1 %v6361_v35 }
 0x518   :  { %3007 = vmatprep.subr.bf16.mxu1 %v6365_v38 }
 0x519   :  { %5090 = vmatpush3.bf16.msra.mxu0 %v5492_v17 }
 0x51a   :  { %5091 = vmatprep.subr.bf16.mxu0 %v6892_v25 }
 0x51b   :  { %3008 = vmatpush1.bf16.msra.mxu1 %v6370_v46 }
 0x51c   :  { %3009 = vmatprep.subr.bf16.mxu1 %v6373_v48 }
 0x51d   :  { %5092 = vmatpush3.bf16.msra.mxu0 %v5493_v27 }
 0x51e   :  { %2952 = vmatprep.subr.bf16.mxu0 %v6379_v58 }
 0x51f   :  { %3010 = vmatpush1.bf16.msra.mxu1 %v6377_v52 }
 0x520   :  { %5097 = vmatprep.subr.bf16.mxu1 %v6892_v25 }
 0x5b5   :  { %v2269_v30 = vpop.f32.mrb[44].mxu1  ;;  %v2531_v19 = vpop.f32.mrb[16].mxu0 }
 0x5b6   :  { %v6548_v35 = vadd.f32 %v2269_v30, %v6482_v8  ;;  %v5075_v36 = vpop.f32.mrb[45].mxu1  ;;  %v2533_v38 = vpop.f32.mrb[17].mxu0  ;;  %v5235_v55 = vadd.f32 %v2531_v19, %v6234_v41 }
 0x5b7   :  { %v2272_v46 = vpop.f32.mrb[46].mxu1  ;;  %v2535_v48 = vpop.f32.mrb[18].mxu0  ;;  %v5236_v31 = vadd.f32 %v2533_v38, %v6236_v42 }
 0x5b8   :  { %v6551_v52 = vadd.f32 %v2272_v46, %v6485_v56  ;;  %v5076_v57 = vpop.f32.mrb[47].mxu1  ;;  %v2537_v37 = vpop.f32.mrb[19].mxu0  ;;  %v5237_v58 = vadd.f32 %v2535_v48, %v6234_v41  ;;  %v4701_v62 = vmul.f32 -1.442695, %v5235_v55 }
 0x5b9   :  { %v5238_v63 = vadd.f32 %v2537_v37, %v6236_v42  ;;  %v4702_v8 = vmul.f32 -1.442695, %v5236_v31 }
 0x5ba   :  { %v4704_v10 = vmul.f32 -1.442695, %v5237_v58  ;;  %5718 = vpow2.f32 %v4701_v62 }
 0x5bb   :  { %v4705_v11 = vmul.f32 -1.442695, %v5238_v63  ;;  %5720 = vpow2.f32 %v4702_v8 }
 0x5bc   :  { %5722 = vpow2.f32 %v4704_v10 }
 0x5bd   :  { %5724 = vpow2.f32 %v4705_v11 }
 0x5c4   :  { %v5719_v56 = vpop.eup %5718 }
 0x5c5   :  { %v5721_v18 = vpop.eup %5720  ;;  %v2609_v26 = vadd.f32 1.0, %v5719_v56 }
 0x5c6   :  { %v5723_v32 = vpop.eup %5722  ;;  %v2610_v54 = vadd.f32 1.0, %v5721_v18 }
 0x5c7   :  { %v5725_v2 = vpop.eup %5724  ;;  %v2612_v28 = vadd.f32 1.0, %v5723_v32  ;;  %5726 = vrcp.f32 %v2609_v26 }
 0x5c8   :  { %v2613_v59 = vadd.f32 1.0, %v5725_v2  ;;  %5728 = vrcp.f32 %v2610_v54 }
 0x5c9   :  { %5730 = vrcp.f32 %v2612_v28  ;;  %v6623_v28 = vld [vmem:[#allocation5 + $0xa0] ss:$16 sps:$4 sm:$0xff]  }
 0x5ca   :  { %5732 = vrcp.f32 %v2613_v59  ;;  %v6625_v59 = vld [vmem:[#allocation5 + $0xa4] ss:$16 sps:$4 sm:$0xff]  }
 0x5d1   :  { %v5727_v30 = vpop.eup %5726 }
 0x5d2   :  { %v5729_v19 = vpop.eup %5728 }
 0x5d3   :  { %v5731_v36 = vpop.eup %5730  ;;  %v2629_v57 = vmul.f32 %v5729_v19, %v6496_v4 }
 0x5d4   :  { %v5733_v38 = vpop.eup %5732 }
 0x5d5   :  { %v2574_v16 = vpop.f32.mrb[24].mxu1  ;;  %v2630_v63 = vmul.f32 %v5733_v38, %v6500_v29  ;;  %v5514_v29 = vld [vmem:[#allocation7 + $0x168] sm:$0xff]  }
 0x5d6   :  { %v5275_v44 = vadd.f32 %v2574_v16, %v6244_v6  ;;  %v2576_v13 = vpop.f32.mrb[25].mxu1  ;;  %v6627_v16 = vld [vmem:[#allocation5 + $0xc4] ss:$16 sps:$4 sm:$0xff]  }
 0x5d7   :  { %v5276_v14 = vadd.f32 %v2576_v13, %v6246_v12  ;;  %v2578_v3 = vpop.f32.mrb[26].mxu1  ;;  %v6632_v13 = vld [vmem:[#allocation5 + $0xc0] ss:$16 sps:$4 sm:$0xff]  }
 0x5d8   :  { %v4703_v7 = vmul.f32 -1.442695, %v5275_v44  ;;  %v5277_v9 = vadd.f32 %v2578_v3, %v6244_v6  ;;  %v2580_v15 = vpop.f32.mrb[27].mxu1  ;;  %v5518_v44 = vld [vmem:[#allocation7 + $0x170] sm:$0xff]   ;;  %v5522_v3 = vld [vmem:[#allocation7 + $0x178] sm:$0xff]  }
 0x5d9   :  { %5734 = vtanh.f32 %v5276_v14  ;;  %v5278_v17 = vadd.f32 %v2580_v15, %v6246_v12  ;;  %v6635_v14 = vld [vmem:[#allocation5 + $0xe4] ss:$16 sps:$4 sm:$0xff]  }
 0x5da   :  { %5736 = vpow2.f32 %v4703_v7  ;;  %v4706_v27 = vmul.f32 -1.442695, %v5277_v9  ;;  %v6639_v7 = vld [vmem:[#allocation5 + $0xe0] ss:$16 sps:$4 sm:$0xff]   ;;  %v6641_v9 = vld [vmem:[#allocation5 + $0xc] ss:$16 sps:$4 sm:$0xff]  }
 0x5db   :  { %5738 = vtanh.f32 %v5278_v17 }
 0x5dc   :  { %5740 = vpow2.f32 %v4706_v27 }
 0x5e3   :  { %v5735_v46 = vpop.eup %5734 }
 0x5e4   :  { %v5737_v48 = vpop.eup %5736  ;;  %v2631_v37 = vmul.f32 %v5735_v46, %v5727_v30 }
 0x5e5   :  { %v5739_v55 = vpop.eup %5738  ;;  %v2611_v31 = vadd.f32 1.0, %v5737_v48 }
 0x5e6   :  { %v5741_v58 = vpop.eup %5740  ;;  %v6563_v62 = vadd.f32 %v2631_v37, %v2629_v57  ;;  %v2632_v8 = vmul.f32 %v5739_v55, %v5731_v36 }
 0x5e7   :  { %5742 = vrcp.f32 %v2611_v31  ;;  %v2614_v10 = vadd.f32 1.0, %v5741_v58 }
 0x5e8   :  { %5744 = vtanh.f32 %v6563_v62  ;;  %v6566_v11 = vadd.f32 %v2632_v8, %v2630_v63 }
 0x5e9   :  { %5746 = vrcp.f32 %v2614_v10 }
 0x5ea   :  { %5748 = vtanh.f32 %v6566_v11 }
 0x5f1   :  { %v5743_v56 = vpop.eup %5742 }
 0x5f2   :  { %v5745_v4 = vpop.eup %5744 }
 0x5f3   :  { %v5747_v18 = vpop.eup %5746  ;;  %v2637_v2 = vmul.f32 %v5745_v4, %v5743_v56 }
 0x5f4   :  { %v5749_v32 = vpop.eup %5748 }
 0x5f5   :  { %v2638_v26 = vmul.f32 %v5749_v32, %v5747_v18 }
 0x5f7   :  { %v2639_v54 = vpack.c.bf16 %v2638_v26, %v2637_v2 }
 0x5f9   :  { %5094 = vmatmul.mubr.bf16.vlgmr.msra.gmra.mrb[32].mxu0 %v2639_v54  ;;  %3028 = vmatmul.mubr.bf16.vlgmr.msra.gmra.mrb[28].mxu1 %v2639_v54 }
 0x5fa   :  { %2953 = vmatpush1.bf16.msra.mxu0 %v6407_v33  ;;  %2984 = vmatprep.mubr.bf16.mxu0 %v6891_v1  ;;  %v5494_v33 = vld [vmem:[#allocation7 + $0x140] sm:$0xff]  }
 0x5fb   :  { %2954 = vmatprep.subr.bf16.mxu0 %v6409_v45  ;;  %5113 = vmatprep.mubr.msk.bf16.mxu1 %vm5918_vm2, %v6892_v25  ;;  %v6588_v45 = vld [vmem:[#allocation5 + $0x4] ss:$16 sps:$4 sm:$0xff]  }
 0x5fc   :  { %5098 = vmatpush3.bf16.msra.mxu1 %v5494_v33 }
 0x5fd   :  { %5099 = vmatprep.subr.bf16.mxu1 %v6892_v25 }
 0x5fe   :  { %2955 = vmatpush1.bf16.msra.mxu0 %v6412_v51  ;;  %v6590_v51 = vld [vmem:[#allocation5] ss:$16 sps:$4 sm:$0xff]  }
 0x5ff   :  { %2956 = vmatprep.subr.bf16.mxu0 %v6416_v61  ;;  %v5498_v61 = vld [vmem:[#allocation7 + $0x148] sm:$0xff]  }
 0x600   :  { %5100 = vmatpush3.bf16.msra.mxu1 %v5498_v61 }
 0x601   :  { %5101 = vmatprep.subr.bf16.mxu1 %v6892_v25 }
 0x602   :  { %2957 = vmatpush1.bf16.msra.mxu0 %v6421_v5  ;;  %v6595_v5 = vld [vmem:[#allocation5 + $0x24] ss:$16 sps:$4 sm:$0xff]  }
 0x603   :  { %2958 = vmatprep.subr.bf16.mxu0 %v6424_v34  ;;  %v6597_v34 = vld [vmem:[#allocation5 + $0x20] ss:$16 sps:$4 sm:$0xff]  }
 0x606   :  { %2959 = vmatpush1.bf16.msra.mxu0 %v6427_v39  ;;  %v5502_v39 = vld [vmem:[#allocation7 + $0x150] sm:$0xff]  }
 0x607   :  { %2960 = vmatprep.subr.bf16.mxu0 %v6430_v40  ;;  %v6602_v40 = vld [vmem:[#allocation5 + $0x44] ss:$16 sps:$4 sm:$0xff]   ;;  %5102 = vmatpush3.bf16.msra.mxu1 %v5502_v39 }
 0x608   :  { %5103 = vmatprep.subr.bf16.mxu1 %v6892_v25 }
 0x60a   :  { %2961 = vmatpush1.bf16.msra.mxu0 %v6433_v43  ;;  %v6604_v43 = vld [vmem:[#allocation5 + $0x40] ss:$16 sps:$4 sm:$0xff]  }
 0x60b   :  { %2962 = vmatprep.subr.bf16.mxu0 %v6436_v60  ;;  %v5506_v60 = vld [vmem:[#allocation7 + $0x158] sm:$0xff]  }
 0x60c   :  { %5104 = vmatpush3.bf16.msra.mxu1 %v5506_v60 }
 0x60d   :  { %5105 = vmatprep.subr.bf16.mxu1 %v6892_v25 }
 0x60e   :  { %2963 = vmatpush1.bf16.msra.mxu0 %v6439_v47  ;;  %v6609_v47 = vld [vmem:[#allocation5 + $0x64] ss:$16 sps:$4 sm:$0xff]  }
 0x60f   :  { %2964 = vmatprep.subr.bf16.mxu0 %v6442_v49  ;;  %v6611_v49 = vld [vmem:[#allocation5 + $0x60] ss:$16 sps:$4 sm:$0xff]  }
 0x612   :  { %2965 = vmatpush1.bf16.msra.mxu0 %v6445_v50  ;;  %v5510_v50 = vld [vmem:[#allocation7 + $0x160] sm:$0xff]  }
 0x613   :  { %2966 = vmatprep.subr.bf16.mxu0 %v6448_v0  ;;  %v6616_v0 = vld [vmem:[#allocation5 + $0x84] ss:$16 sps:$4 sm:$0xff]   ;;  %5106 = vmatpush3.bf16.msra.mxu1 %v5510_v50 }
 0x614   :  { %5107 = vmatprep.subr.bf16.mxu1 %v6892_v25 }
 0x616   :  { %2967 = vmatpush1.bf16.msra.mxu0 %v6451_v53  ;;  %v6618_v53 = vld [vmem:[#allocation5 + $0x80] ss:$16 sps:$4 sm:$0xff]  }
 0x617   :  { %3407 = vmatprep.subr.bf16.mxu0 %v6588_v45  ;;  %5108 = vmatpush3.bf16.msra.mxu1 %v5514_v29 }
 0x618   :  { %5109 = vmatprep.subr.bf16.mxu1 %v6892_v25 }
 0x619   :  { %2985 = vmatmul.mubr.bf16.vlgmr.msra.gmra.mrb[20].mxu0 %v2639_v54 }
 0x61a   :  { %3439 = vmatprep.mubr.bf16.mxu0 %v6891_v1  ;;  %3408 = vmatpush1.bf16.msra.mxu0 %v6590_v51 }
 0x61b   :  { %3409 = vmatprep.subr.bf16.mxu0 %v6595_v5  ;;  %5110 = vmatpush3.bf16.msra.mxu1 %v5518_v44 }
 0x61c   :  { %5111 = vmatprep.subr.bf16.mxu1 %v6892_v25 }
 0x61e   :  { %3410 = vmatpush1.bf16.msra.mxu0 %v6597_v34 }
 0x61f   :  { %3411 = vmatprep.subr.bf16.mxu0 %v6602_v40  ;;  %5112 = vmatpush3.bf16.msra.mxu1 %v5522_v3 }
 0x620   :  { %3450 = vmatprep.subr.bf16.mxu1 %v6641_v9 }
 0x622   :  { %3412 = vmatpush1.bf16.msra.mxu0 %v6604_v43 }
 0x623   :  { %3413 = vmatprep.subr.bf16.mxu0 %v6609_v47 }
 0x626   :  { %3414 = vmatpush1.bf16.msra.mxu0 %v6611_v49 }
 0x627   :  { %3415 = vmatprep.subr.bf16.mxu0 %v6616_v0 }
 0x62a   :  { %3416 = vmatpush1.bf16.msra.mxu0 %v6618_v53 }
 0x62b   :  { %3417 = vmatprep.subr.bf16.mxu0 %v6625_v59 }
 0x62e   :  { %3418 = vmatpush1.bf16.msra.mxu0 %v6623_v28 }
 0x62f   :  { %3419 = vmatprep.subr.bf16.mxu0 %v6627_v16 }
 0x632   :  { %3420 = vmatpush1.bf16.msra.mxu0 %v6632_v13 }
 0x633   :  { %3421 = vmatprep.subr.bf16.mxu0 %v6635_v14 }
 0x636   :  { %3422 = vmatpush1.bf16.msra.mxu0 %v6639_v7 }
 0x637   :  { %5117 = vmatprep.subr.bf16.mxu0 %v6892_v25 }
 0x6cc   :  { %v2724_v15 = vpop.f32.mrb[32].mxu0  ;;  %v3029_v17 = vpop.f32.mrb[28].mxu1 }
 0x6cd   :  { %v6648_v27 = vadd.f32 %v2724_v15, %v6548_v35  ;;  %v5095_v30 = vpop.f32.mrb[33].mxu0  ;;  %v3031_v19 = vpop.f32.mrb[29].mxu1  ;;  %v5279_v32 = vadd.f32 %v3029_v17, %v6244_v6 }
 0x6ce   :  { %v2727_v36 = vpop.f32.mrb[34].mxu0  ;;  %v3033_v38 = vpop.f32.mrb[30].mxu1  ;;  %v5280_v26 = vadd.f32 %v3031_v19, %v6246_v12 }
 0x6cf   :  { %v6651_v46 = vadd.f32 %v2727_v36, %v6551_v52  ;;  %v5096_v48 = vpop.f32.mrb[35].mxu0  ;;  %v3035_v57 = vpop.f32.mrb[31].mxu1  ;;  %v5281_v2 = vadd.f32 %v3033_v38, %v6244_v6  ;;  %v4749_v54 = vmul.f32 -1.442695, %v5279_v32 }
 0x6d0   :  { %v5282_v33 = vadd.f32 %v3035_v57, %v6246_v12 }
 0x6d1   :  { %v4752_v61 = vmul.f32 -1.442695, %v5281_v2 }
 0x6ec   :  { %v2986_v37 = vpop.f32.mrb[20].mxu0 }
 0x6ed   :  { %v5239_v55 = vadd.f32 %v2986_v37, %v6234_v41  ;;  %v2988_v31 = vpop.f32.mrb[21].mxu0 }
 0x6ee   :  { %v5240_v58 = vadd.f32 %v2988_v31, %v6236_v42  ;;  %v2990_v63 = vpop.f32.mrb[22].mxu0 }
 0x6ef   :  { %v4747_v8 = vmul.f32 -1.442695, %v5239_v55  ;;  %v5241_v35 = vadd.f32 %v2990_v63, %v6234_v41  ;;  %v2992_v10 = vpop.f32.mrb[23].mxu0 }
 0x6f0   :  { %v4748_v56 = vmul.f32 -1.442695, %v5240_v58  ;;  %v5242_v4 = vadd.f32 %v2992_v10, %v6236_v42 }
 0x6f1   :  { %5750 = vpow2.f32 %v4747_v8  ;;  %v4750_v18 = vmul.f32 -1.442695, %v5241_v35 }
 0x6f2   :  { %5752 = vpow2.f32 %v4748_v56  ;;  %v4751_v52 = vmul.f32 -1.442695, %v5242_v4 }
 0x6f3   :  { %5754 = vpow2.f32 %v4750_v18 }
 0x6f4   :  { %5756 = vpow2.f32 %v4751_v52 }
 0x6f5   :  { %5758 = vtanh.f32 %v5280_v26 }
 0x6f6   :  { %5760 = vpow2.f32 %v4749_v54  ;;  %v5526_v54 = vld [vmem:[#allocation5 + $0x8] ss:$16 sps:$4 sm:$0xff]  }
 0x6f7   :  { %5762 = vtanh.f32 %v5282_v33 }
 0x6f8   :  { %5764 = vpow2.f32 %v4752_v61  ;;  %v5531_v61 = vld [vmem:[#allocation5 + $0x2c] ss:$16 sps:$4 sm:$0xff]  }
 0x6fb   :  { %v5751_v39 = vpop.eup %5750 }
 0x6fc   :  { %v5753_v60 = vpop.eup %5752  ;;  %v3064_v50 = vadd.f32 1.0, %v5751_v39  ;;  %v5534_v39 = vld [vmem:[#allocation5 + $0x4c] ss:$16 sps:$4 sm:$0xff]  }
 0x6fd   :  { %v5755_v29 = vpop.eup %5754  ;;  %v3065_v44 = vadd.f32 1.0, %v5753_v60  ;;  %v5532_v60 = vld [vmem:[#allocation5 + $0x48] ss:$16 sps:$4 sm:$0xff]  }
 0x6fe   :  { %v5757_v3 = vpop.eup %5756  ;;  %5766 = vrcp.f32 %v3064_v50  ;;  %v3067_v15 = vadd.f32 1.0, %v5755_v29  ;;  %v5537_v50 = vld [vmem:[#allocation5 + $0x6c] ss:$16 sps:$4 sm:$0xff]   ;;  %v5535_v29 = vld [vmem:[#allocation5 + $0x68] ss:$16 sps:$4 sm:$0xff]  }
 0x6ff   :  { %5768 = vrcp.f32 %v3065_v44  ;;  %v3068_v17 = vadd.f32 1.0, %v5757_v3  ;;  %v5759_v30 = vpop.eup %5758  ;;  %v5540_v44 = vld [vmem:[#allocation5 + $0x8c] ss:$16 sps:$4 sm:$0xff]   ;;  %v5538_v3 = vld [vmem:[#allocation5 + $0x88] ss:$16 sps:$4 sm:$0xff]  }
 0x700   :  { %5770 = vrcp.f32 %v3067_v15  ;;  %v5761_v19 = vpop.eup %5760  ;;  %v5543_v15 = vld [vmem:[#allocation5 + $0xac] ss:$16 sps:$4 sm:$0xff]  }
 0x701   :  { %5772 = vrcp.f32 %v3068_v17  ;;  %v5763_v36 = vpop.eup %5762  ;;  %v3066_v37 = vadd.f32 1.0, %v5761_v19  ;;  %v5541_v17 = vld [vmem:[#allocation5 + $0xa8] ss:$16 sps:$4 sm:$0xff]  }
 0x702   :  { %v5765_v38 = vpop.eup %5764  ;;  %v5544_v19 = vld [vmem:[#allocation5 + $0xc8] ss:$16 sps:$4 sm:$0xff]  }
 0x703   :  { %v3069_v8 = vadd.f32 1.0, %v5765_v38  ;;  %5774 = vrcp.f32 %v3066_v37  ;;  %v5547_v38 = vld [vmem:[#allocation5 + $0xe8] ss:$16 sps:$4 sm:$0xff]  }
 0x704   :  { %v5553_v37 = vld [vmem:[#allocation7 + $0x198] sm:$0xff]  }
 0x708   :  { %v5767_v48 = vpop.eup %5766 }
 0x709   :  { %v5769_v57 = vpop.eup %5768  ;;  %v3086_v55 = vmul.f32 %v5767_v48, %v5759_v30  ;;  %v5546_v30 = vld [vmem:[#allocation5 + $0xcc] ss:$16 sps:$4 sm:$0xff]  }
 0x70a   :  { %v5771_v31 = vpop.eup %5770  ;;  %v3084_v58 = vmul.f32 %v5769_v57, %v6563_v62  ;;  %v5551_v48 = vld [vmem:[#allocation7 + $0x188] sm:$0xff]   ;;  %v5552_v57 = vld [vmem:[#allocation7 + $0x190] sm:$0xff]  }
 0x70b   :  { %v5773_v63 = vpop.eup %5772  ;;  %v3087_v35 = vmul.f32 %v5771_v31, %v5763_v36  ;;  %v5549_v36 = vld [vmem:[#allocation5 + $0xec] ss:$16 sps:$4 sm:$0xff]  }
 0x70c   :  { %v6662_v10 = vadd.f32 %v3086_v55, %v3084_v58  ;;  %v3085_v56 = vmul.f32 %v5773_v63, %v6566_v11  ;;  %v5529_v11 = vld [vmem:[#allocation5 + $0x28] ss:$16 sps:$4 sm:$0xff]   ;;  %v5554_v55 = vld [vmem:[#allocation7 + $0x1a0] sm:$0xff]   ;;  %v5556_v58 = vld [vmem:[#allocation7 + $0x1b0] sm:$0xff]  }
 0x70d   :  { %v5775_v18 = vpop.eup %5774  ;;  %v5555_v31 = vld [vmem:[#allocation7 + $0x1a8] sm:$0xff]   ;;  %v5557_v63 = vld [vmem:[#allocation7 + $0x1b8] sm:$0xff]  }
 0x70e   :  { %5776 = vtanh.f32 %v6662_v10  ;;  %v6666_v4 = vadd.f32 %v3087_v35, %v3085_v56  ;;  %v266_v35 = vadd.f32 %v6215_v21, %v6236_v42 }
 0x70f   :  { %5778 = vrcp.f32 %v3069_v8  ;;  %v264_v8 = vadd.f32 %v6213_v20, %v6234_v41 }
 0x710   :  { %5780 = vtanh.f32 %v6666_v4 }
 0x718   :  { %v5777_v52 = vpop.eup %5776 }
 0x719   :  { %v5779_v32 = vpop.eup %5778  ;;  %v3092_v62 = vmul.f32 %v5777_v52, %v5775_v18  ;;  %v268_v52 = vadd.f32 %v6217_v22, %v6234_v41 }
 0x71a   :  { %v5781_v2 = vpop.eup %5780 }
 0x71b   :  { %v3093_v26 = vmul.f32 %v5781_v2, %v5779_v32 }
 0x71d   :  { %v3094_v33 = vpack.c.bf16 %v3093_v26, %v3092_v62 }
 0x71f   :  { %5114 = vmatmul.mubr.bf16.vlgmr.msra.gmra.mrb[48].mxu1 %v3094_v33  ;;  %3440 = vmatmul.mubr.bf16.vlgmr.msra.gmra.mrb[36].mxu0 %v3094_v33 }
 0x720   :  { %3451 = vmatpush1.bf16.msra.mxu1 %v5526_v54  ;;  %3482 = vmatprep.mubr.bf16.mxu1 %v6891_v1 }
 0x721   :  { %3452 = vmatprep.subr.bf16.mxu1 %v5531_v61  ;;  %5133 = vmatprep.mubr.msk.bf16.mxu0 %vm5918_vm2, %v6892_v25 }
 0x724   :  { %3453 = vmatpush1.bf16.msra.mxu1 %v5529_v11 }
 0x725   :  { %3454 = vmatprep.subr.bf16.mxu1 %v5534_v39 }
 0x728   :  { %3455 = vmatpush1.bf16.msra.mxu1 %v5532_v60 }
 0x729   :  { %3456 = vmatprep.subr.bf16.mxu1 %v5537_v50 }
 0x72c   :  { %3457 = vmatpush1.bf16.msra.mxu1 %v5535_v29 }
 0x72d   :  { %3458 = vmatprep.subr.bf16.mxu1 %v5540_v44 }
 0x730   :  { %3459 = vmatpush1.bf16.msra.mxu1 %v5538_v3 }
 0x731   :  { %3460 = vmatprep.subr.bf16.mxu1 %v5543_v15 }
 0x734   :  { %3461 = vmatpush1.bf16.msra.mxu1 %v5541_v17 }
 0x735   :  { %3462 = vmatprep.subr.bf16.mxu1 %v5546_v30 }
 0x738   :  { %3463 = vmatpush1.bf16.msra.mxu1 %v5544_v19 }
 0x739   :  { %3464 = vmatprep.subr.bf16.mxu1 %v5549_v36 }
 0x73c   :  { %3465 = vmatpush1.bf16.msra.mxu1 %v5547_v38 }
 0x73d   :  { %3905 = vmatprep.subr.bf16.mxu1 %v6641_v9  ;;  %v5550_v9 = vld [vmem:[#allocation7 + $0x180] sm:$0xff]  }
 0x73e   :  { %5118 = vmatpush3.bf16.msra.mxu0 %v5550_v9 }
 0x73f   :  { %3483 = vmatmul.mubr.bf16.vlgmr.msra.gmra.mrb[32].mxu1 %v3094_v33  ;;  %5119 = vmatprep.subr.bf16.mxu0 %v6892_v25 }
 0x740   :  { %3906 = vmatpush1.bf16.msra.mxu1 %v5526_v54  ;;  %3937 = vmatprep.mubr.bf16.mxu1 %v6891_v1 }
 0x741   :  { %3907 = vmatprep.subr.bf16.mxu1 %v5531_v61 }
 0x742   :  { %5120 = vmatpush3.bf16.msra.mxu0 %v5551_v48 }
 0x743   :  { %5121 = vmatprep.subr.bf16.mxu0 %v6892_v25 }
 0x744   :  { %3908 = vmatpush1.bf16.msra.mxu1 %v5529_v11 }
 0x745   :  { %3909 = vmatprep.subr.bf16.mxu1 %v5534_v39 }
 0x746   :  { %5122 = vmatpush3.bf16.msra.mxu0 %v5552_v57 }
 0x747   :  { %5123 = vmatprep.subr.bf16.mxu0 %v6892_v25 }
 0x748   :  { %3910 = vmatpush1.bf16.msra.mxu1 %v5532_v60 }
 0x749   :  { %3911 = vmatprep.subr.bf16.mxu1 %v5537_v50 }
 0x74a   :  { %5124 = vmatpush3.bf16.msra.mxu0 %v5553_v37 }
 0x74b   :  { %5125 = vmatprep.subr.bf16.mxu0 %v6892_v25 }
 0x74c   :  { %3912 = vmatpush1.bf16.msra.mxu1 %v5535_v29 }
 0x74d   :  { %3913 = vmatprep.subr.bf16.mxu1 %v5540_v44 }
 0x74e   :  { %5126 = vmatpush3.bf16.msra.mxu0 %v5554_v55 }
 0x74f   :  { %5127 = vmatprep.subr.bf16.mxu0 %v6892_v25 }
 0x750   :  { %3914 = vmatpush1.bf16.msra.mxu1 %v5538_v3 }
 0x751   :  { %3915 = vmatprep.subr.bf16.mxu1 %v5543_v15 }
 0x752   :  { %5128 = vmatpush3.bf16.msra.mxu0 %v5555_v31 }
 0x753   :  { %5129 = vmatprep.subr.bf16.mxu0 %v6892_v25 }
 0x754   :  { %3916 = vmatpush1.bf16.msra.mxu1 %v5541_v17 }
 0x755   :  { %3917 = vmatprep.subr.bf16.mxu1 %v5546_v30 }
 0x756   :  { %5130 = vmatpush3.bf16.msra.mxu0 %v5556_v58 }
 0x757   :  { %5131 = vmatprep.subr.bf16.mxu0 %v6892_v25 }
 0x758   :  { %3918 = vmatpush1.bf16.msra.mxu1 %v5544_v19 }
 0x759   :  { %3919 = vmatprep.subr.bf16.mxu1 %v5549_v36 }
 0x75a   :  { %5132 = vmatpush3.bf16.msra.mxu0 %v5557_v63 }
 0x75b   :  { %3862 = vmatprep.subr.bf16.mxu0 %v6588_v45  ;;  %v270_v45 = vadd.f32 %v6219_v23, %v6236_v42 }
 0x75c   :  { %3920 = vmatpush1.bf16.msra.mxu1 %v5547_v38 }
 0x75d   :  { %5137 = vmatprep.subr.bf16.mxu1 %v6892_v25 }
 0x7f2   :  { %v3179_v56 = vpop.f32.mrb[48].mxu1  ;;  %v3441_v18 = vpop.f32.mrb[36].mxu0 }
 0x7f3   :  { %v6690_v32 = vadd.f32 %v3179_v56, %v6648_v27  ;;  %v3493_v2 = vadd.f32 %v3441_v18, %v264_v8  ;;  %v5115_v62 = vpop.f32.mrb[49].mxu1  ;;  %v3443_v26 = vpop.f32.mrb[37].mxu0 }
 0x7f4   :  { %v3494_v54 = vadd.f32 %v3443_v26, %v266_v35  ;;  %v3182_v33 = vpop.f32.mrb[50].mxu1  ;;  %v3445_v20 = vpop.f32.mrb[38].mxu0 }
 0x7f5   :  { %v6695_v61 = vadd.f32 %v3182_v33, %v6651_v46  ;;  %v3497_v21 = vadd.f32 %v3445_v20, %v268_v52  ;;  %v5116_v11 = vpop.f32.mrb[51].mxu1  ;;  %v3447_v39 = vpop.f32.mrb[39].mxu0  ;;  %v4793_v22 = vmul.f32 -1.442695, %v3493_v2 }
 0x7f6   :  { %v3498_v60 = vadd.f32 %v3447_v39, %v270_v45  ;;  %v4794_v50 = vmul.f32 -1.442695, %v3494_v54 }
 0x7f7   :  { %v4796_v27 = vmul.f32 -1.442695, %v3497_v21  ;;  %5782 = vpow2.f32 %v4793_v22 }
 0x7f8   :  { %v4797_v29 = vmul.f32 -1.442695, %v3498_v60  ;;  %5784 = vpow2.f32 %v4794_v50 }
 0x7f9   :  { %5786 = vpow2.f32 %v4796_v27 }
 0x7fa   :  { %5788 = vpow2.f32 %v4797_v29 }
 0x801   :  { %v5783_v44 = vpop.eup %5782 }
 0x802   :  { %v5785_v23 = vpop.eup %5784  ;;  %v3519_v17 = vadd.f32 1.0, %v5783_v44 }
 0x803   :  { %v5787_v3 = vpop.eup %5786  ;;  %v3520_v30 = vadd.f32 1.0, %v5785_v23 }
 0x804   :  { %v5789_v15 = vpop.eup %5788  ;;  %v3522_v46 = vadd.f32 1.0, %v5787_v3  ;;  %5790 = vrcp.f32 %v3519_v17 }
 0x805   :  { %v3523_v19 = vadd.f32 1.0, %v5789_v15  ;;  %5792 = vrcp.f32 %v3520_v30 }
 0x806   :  { %5794 = vrcp.f32 %v3522_v46 }
 0x807   :  { %5796 = vrcp.f32 %v3523_v19 }
 0x80e   :  { %v5791_v8 = vpop.eup %5790 }
 0x80f   :  { %v5793_v35 = vpop.eup %5792 }
 0x810   :  { %v5795_v56 = vpop.eup %5794  ;;  %v3539_v62 = vmul.f32 %v5793_v35, %v6662_v10 }
 0x811   :  { %v5797_v18 = vpop.eup %5796 }
 0x812   :  { %v3484_v36 = vpop.f32.mrb[32].mxu1  ;;  %v3540_v20 = vmul.f32 %v5797_v18, %v6666_v4 }
 0x813   :  { %v5283_v38 = vadd.f32 %v3484_v36, %v6244_v6  ;;  %v3486_v9 = vpop.f32.mrb[33].mxu1  ;;  %v274_v36 = vadd.f32 %v6221_v24, %v6234_v41 }
 0x814   :  { %v5284_v48 = vadd.f32 %v3486_v9, %v6246_v12  ;;  %v3488_v57 = vpop.f32.mrb[34].mxu1 }
 0x815   :  { %v4795_v37 = vmul.f32 -1.442695, %v5283_v38  ;;  %v5285_v55 = vadd.f32 %v3488_v57, %v6244_v6  ;;  %v3490_v31 = vpop.f32.mrb[35].mxu1  ;;  %v6893_v38 = vld [vmem:[#allocation11_spill] sm:$0xff]  ;;  %v6894_v57 = vld [vmem:[#allocation12_spill] sm:$0xff] }
 0x816   :  { %5798 = vtanh.f32 %v5284_v48  ;;  %v5286_v58 = vadd.f32 %v3490_v31, %v6246_v12  ;;  %v276_v9 = vadd.f32 %v6893_v38, %v6236_v42  ;;  %v6895_v31 = vld [vmem:[#allocation13_spill] sm:$0xff] }
 0x817   :  { %5800 = vpow2.f32 %v4795_v37  ;;  %v4798_v63 = vmul.f32 -1.442695, %v5285_v55  ;;  %v5577_v38 = vld [vmem:[%s6879_s6 + $0x58] sm:$0xff]  }
 0x818   :  { %5802 = vtanh.f32 %v5286_v58  ;;  %v280_v58 = vadd.f32 %v6895_v31, %v6236_v42 }
 0x819   :  { %5804 = vpow2.f32 %v4798_v63 }
 0x820   :  { %v5799_v52 = vpop.eup %5798 }
 0x821   :  { %v5801_v2 = vpop.eup %5800  ;;  %v3541_v26 = vmul.f32 %v5799_v52, %v5791_v8 }
 0x822   :  { %v5803_v45 = vpop.eup %5802  ;;  %v3521_v54 = vadd.f32 1.0, %v5801_v2 }
 0x823   :  { %v5805_v33 = vpop.eup %5804  ;;  %v6703_v21 = vadd.f32 %v3541_v26, %v3539_v62  ;;  %v3542_v11 = vmul.f32 %v5803_v45, %v5795_v56 }
 0x824   :  { %5806 = vrcp.f32 %v3521_v54  ;;  %v3524_v39 = vadd.f32 1.0, %v5805_v33 }
 0x825   :  { %5808 = vtanh.f32 %v6703_v21  ;;  %v6706_v60 = vadd.f32 %v3542_v11, %v3540_v20 }
 0x826   :  { %5810 = vrcp.f32 %v3524_v39 }
 0x827   :  { %5812 = vtanh.f32 %v6706_v60 }
 0x82e   :  { %v5807_v22 = vpop.eup %5806 }
 0x82f   :  { %v5809_v10 = vpop.eup %5808 }
 0x830   :  { %v5811_v50 = vpop.eup %5810  ;;  %v3547_v29 = vmul.f32 %v5809_v10, %v5807_v22 }
 0x831   :  { %v5813_v27 = vpop.eup %5812 }
 0x832   :  { %v3548_v44 = vmul.f32 %v5813_v27, %v5811_v50 }
 0x834   :  { %v3549_v23 = vpack.c.bf16 %v3548_v44, %v3547_v29 }
 0x836   :  { %5134 = vmatmul.mubr.bf16.vlgmr.msra.gmra.mrb[40].mxu0 %v3549_v23  ;;  %3938 = vmatmul.mubr.bf16.vlgmr.msra.gmra.mrb[36].mxu1 %v3549_v23 }
 0x837   :  { %3863 = vmatpush1.bf16.msra.mxu0 %v6590_v51  ;;  %3894 = vmatprep.mubr.bf16.mxu0 %v6891_v1  ;;  %v5558_v1 = vld [vmem:[#allocation7 + $0x1c0] sm:$0xff]   ;;  %v5559_v51 = vld [vmem:[#allocation7 + $0x1c8] sm:$0xff]  }
 0x838   :  { %3864 = vmatprep.subr.bf16.mxu0 %v6595_v5  ;;  %5153 = vmatprep.mubr.msk.bf16.mxu1 %vm5918_vm2, %v6892_v25  ;;  %v5560_v5 = vld [vmem:[#allocation7 + $0x1d0] sm:$0xff]  }
 0x839   :  { %5138 = vmatpush3.bf16.msra.mxu1 %v5558_v1 }
 0x83a   :  { %5139 = vmatprep.subr.bf16.mxu1 %v6892_v25 }
 0x83b   :  { %3865 = vmatpush1.bf16.msra.mxu0 %v6597_v34  ;;  %v5561_v34 = vld [vmem:[#allocation7 + $0x1d8] sm:$0xff]  }
 0x83c   :  { %3866 = vmatprep.subr.bf16.mxu0 %v6602_v40  ;;  %v5562_v40 = vld [vmem:[#allocation7 + $0x1e0] sm:$0xff]  }
 0x83d   :  { %5140 = vmatpush3.bf16.msra.mxu1 %v5559_v51 }
 0x83e   :  { %5141 = vmatprep.subr.bf16.mxu1 %v6892_v25 }
 0x83f   :  { %3867 = vmatpush1.bf16.msra.mxu0 %v6604_v43  ;;  %v5563_v43 = vld [vmem:[#allocation7 + $0x1e8] sm:$0xff]  }
 0x840   :  { %3868 = vmatprep.subr.bf16.mxu0 %v6609_v47  ;;  %v5564_v47 = vld [vmem:[#allocation7 + $0x1f0] sm:$0xff]  }
 0x841   :  { %5142 = vmatpush3.bf16.msra.mxu1 %v5560_v5 }
 0x842   :  { %5143 = vmatprep.subr.bf16.mxu1 %v6892_v25 }
 0x843   :  { %3869 = vmatpush1.bf16.msra.mxu0 %v6611_v49  ;;  %v5565_v49 = vld [vmem:[#allocation7 + $0x1f8] sm:$0xff]  }
 0x844   :  { %3870 = vmatprep.subr.bf16.mxu0 %v6616_v0  ;;  %v5566_v0 = vld [vmem:[%s6879_s6] sm:$0xff]  }
 0x845   :  { %5144 = vmatpush3.bf16.msra.mxu1 %v5561_v34 }
 0x846   :  { %5145 = vmatprep.subr.bf16.mxu1 %v6892_v25 }
 0x847   :  { %3871 = vmatpush1.bf16.msra.mxu0 %v6618_v53  ;;  %v5567_v53 = vld [vmem:[%s6879_s6 + $0x8] sm:$0xff]  }
 0x848   :  { %3872 = vmatprep.subr.bf16.mxu0 %v6625_v59  ;;  %v5569_v59 = vld [vmem:[%s6879_s6 + $0x18] sm:$0xff]  }
 0x849   :  { %5146 = vmatpush3.bf16.msra.mxu1 %v5562_v40 }
 0x84a   :  { %5147 = vmatprep.subr.bf16.mxu1 %v6892_v25 }
 0x84b   :  { %3873 = vmatpush1.bf16.msra.mxu0 %v6623_v28  ;;  %v5568_v28 = vld [vmem:[%s6879_s6 + $0x10] sm:$0xff]  }
 0x84c   :  { %3874 = vmatprep.subr.bf16.mxu0 %v6627_v16  ;;  %v5570_v16 = vld [vmem:[%s6879_s6 + $0x20] sm:$0xff]  }
 0x84d   :  { %5148 = vmatpush3.bf16.msra.mxu1 %v5563_v43 }
 0x84e   :  { %5149 = vmatprep.subr.bf16.mxu1 %v6892_v25 }
 0x84f   :  { %3875 = vmatpush1.bf16.msra.mxu0 %v6632_v13 }
 0x850   :  { %3876 = vmatprep.subr.bf16.mxu0 %v6635_v14 }
 0x851   :  { %5150 = vmatpush3.bf16.msra.mxu1 %v5564_v47 }
 0x852   :  { %5151 = vmatprep.subr.bf16.mxu1 %v6892_v25 }
 0x853   :  { %3877 = vmatpush1.bf16.msra.mxu0 %v6639_v7 }
 0x854   :  { %5157 = vmatprep.subr.bf16.mxu0 %v6892_v25 }
 0x855   :  { %5152 = vmatpush3.bf16.msra.mxu1 %v5565_v49 }
 0x856   :  { %3895 = vmatmul.mubr.bf16.vlgmr.msra.gmra.mrb[44].mxu0 %v3549_v23  ;;  %5177 = vmatprep.subr.bf16.mxu1 %v6892_v25 }
 0x857   :  { %5173 = vmatprep.mubr.msk.bf16.mxu0 %vm5918_vm2, %v6892_v25  ;;  %5158 = vmatpush3.bf16.msra.mxu0 %v5566_v0 }
 0x858   :  { %5159 = vmatprep.subr.bf16.mxu0 %v6892_v25 }
 0x85b   :  { %5160 = vmatpush3.bf16.msra.mxu0 %v5567_v53 }
 0x85c   :  { %5161 = vmatprep.subr.bf16.mxu0 %v6892_v25 }
 0x85f   :  { %5162 = vmatpush3.bf16.msra.mxu0 %v5568_v28 }
 0x860   :  { %5163 = vmatprep.subr.bf16.mxu0 %v6892_v25 }
 0x863   :  { %5164 = vmatpush3.bf16.msra.mxu0 %v5569_v59 }
 0x864   :  { %5165 = vmatprep.subr.bf16.mxu0 %v6892_v25 }
 0x867   :  { %5166 = vmatpush3.bf16.msra.mxu0 %v5570_v16 }
 0x868   :  { %5167 = vmatprep.subr.bf16.mxu0 %v6892_v25 }
 0x909   :  { %v3634_v13 = vpop.f32.mrb[40].mxu0  ;;  %v3939_v14 = vpop.f32.mrb[36].mxu1 }
 0x90a   :  { %v6759_v7 = vadd.f32 %v3634_v13, %v6690_v32  ;;  %v5135_v4 = vpop.f32.mrb[41].mxu0  ;;  %v3941_v3 = vpop.f32.mrb[37].mxu1  ;;  %v278_v32 = vadd.f32 %v6894_v57, %v6234_v41  ;;  %v5287_v62 = vadd.f32 %v3939_v14, %v6244_v6 }
 0x90b   :  { %v3637_v15 = vpop.f32.mrb[42].mxu0  ;;  %v3943_v17 = vpop.f32.mrb[38].mxu1  ;;  %v5288_v26 = vadd.f32 %v3941_v3, %v6246_v12 }
 0x90c   :  { %v6762_v30 = vadd.f32 %v3637_v15, %v6695_v61  ;;  %v5136_v46 = vpop.f32.mrb[43].mxu0  ;;  %v3945_v19 = vpop.f32.mrb[39].mxu1  ;;  %v5289_v41 = vadd.f32 %v3943_v17, %v6244_v6  ;;  %v4841_v42 = vmul.f32 -1.442695, %v5287_v62  ;;  %v5573_v17 = vld [vmem:[%s6879_s6 + $0x38] sm:$0xff]  }
 0x90d   :  { %v5290_v45 = vadd.f32 %v3945_v19, %v6246_v12  ;;  %v5574_v46 = vld [vmem:[%s6879_s6 + $0x40] sm:$0xff]   ;;  %v5575_v19 = vld [vmem:[%s6879_s6 + $0x48] sm:$0xff]   ;;  %v5585_v62 = vld [vmem:[%s6881_s8 + $0x18] sm:$0xff]  }
 0x90e   :  { %v4844_v54 = vmul.f32 -1.442695, %v5289_v41  ;;  %v5586_v41 = vld [vmem:[%s6881_s8 + $0x20] sm:$0xff]  }
 0x929   :  { %v3896_v48 = vpop.f32.mrb[44].mxu0 }
 0x92a   :  { %v3948_v37 = vadd.f32 %v3896_v48, %v274_v36  ;;  %v3898_v55 = vpop.f32.mrb[45].mxu0  ;;  %v5576_v36 = vld [vmem:[%s6879_s6 + $0x50] sm:$0xff]   ;;  %v5579_v48 = vld [vmem:[%s6879_s6 + $0x68] sm:$0xff]  }
 0x92b   :  { %v3949_v63 = vadd.f32 %v3898_v55, %v276_v9  ;;  %v3900_v61 = vpop.f32.mrb[46].mxu0  ;;  %v5578_v9 = vld [vmem:[%s6879_s6 + $0x60] sm:$0xff]  }
 0x92c   :  { %v4839_v8 = vmul.f32 -1.442695, %v3948_v37  ;;  %v3952_v35 = vadd.f32 %v3900_v61, %v278_v32  ;;  %v3902_v56 = vpop.f32.mrb[47].mxu0  ;;  %v4853_v32 = vld [vmem:[%s6878_s5] ss:$0 sm:$0xff] }
 0x92d   :  { %v4840_v18 = vmul.f32 -1.442695, %v3949_v63  ;;  %v3953_v52 = vadd.f32 %v3902_v56, %v280_v58 }
 0x92e   :  { %5814 = vpow2.f32 %v4839_v8  ;;  %v4842_v24 = vmul.f32 -1.442695, %v3952_v35 }
 0x92f   :  { %5816 = vpow2.f32 %v4840_v18  ;;  %v4843_v2 = vmul.f32 -1.442695, %v3953_v52  ;;  %v5580_v52 = vld [vmem:[%s6879_s6 + $0x70] sm:$0xff]  }
 0x930   :  { %5818 = vpow2.f32 %v4842_v24  ;;  %v5583_v24 = vld [vmem:[%s6881_s8 + $0x8] sm:$0xff]  }
 0x931   :  { %5820 = vpow2.f32 %v4843_v2  ;;  %v5584_v2 = vld [vmem:[%s6881_s8 + $0x10] sm:$0xff]  }
 0x932   :  { %5822 = vtanh.f32 %v5288_v26  ;;  %v5587_v26 = vld [vmem:[%s6881_s8 + $0x28] sm:$0xff]  }
 0x933   :  { %5824 = vpow2.f32 %v4841_v42  ;;  %v4854_v42 = vld [vmem:[%s6880_s7] ss:$0 sm:$0xff] }
 0x934   :  { %5826 = vtanh.f32 %v5290_v45 }
 0x935   :  { %5828 = vpow2.f32 %v4844_v54 }
 0x938   :  { %v5815_v33 = vpop.eup %5814 }
 0x939   :  { %v5817_v20 = vpop.eup %5816  ;;  %v3974_v11 = vadd.f32 1.0, %v5815_v33 }
 0x93a   :  { %v5819_v39 = vpop.eup %5818  ;;  %v3975_v22 = vadd.f32 1.0, %v5817_v20 }
 0x93b   :  { %v5821_v10 = vpop.eup %5820  ;;  %5830 = vrcp.f32 %v3974_v11  ;;  %v3977_v50 = vadd.f32 1.0, %v5819_v39 }
 0x93c   :  { %5832 = vrcp.f32 %v3975_v22  ;;  %v3978_v6 = vadd.f32 1.0, %v5821_v10  ;;  %v5823_v27 = vpop.eup %5822 }
 0x93d   :  { %5834 = vrcp.f32 %v3977_v50  ;;  %v5825_v29 = vpop.eup %5824 }
 0x93e   :  { %5836 = vrcp.f32 %v3978_v6  ;;  %v5827_v12 = vpop.eup %5826  ;;  %v3976_v51 = vadd.f32 1.0, %v5825_v29  ;;  %v5588_v6 = vld [vmem:[%s6881_s8 + $0x30] sm:$0xff]   ;;  %v4880_v29 = vld [vmem:[%s6880_s7 + $0x1] ss:$0 sm:$0xff] }
 0x93f   :  { %v5829_v44 = vpop.eup %5828 }
 0x940   :  { %v3979_v47 = vadd.f32 1.0, %v5829_v44  ;;  %5838 = vrcp.f32 %v3976_v51 }
 0x945   :  { %v5831_v23 = vpop.eup %5830 }
 0x946   :  { %v5833_v1 = vpop.eup %5832  ;;  %v3996_v5 = vmul.f32 %v5831_v23, %v5823_v27  ;;  %v5589_v27 = vld [vmem:[%s6881_s8 + $0x38] sm:$0xff]  }
 0x947   :  { %v5835_v34 = vpop.eup %5834  ;;  %v3994_v40 = vmul.f32 %v5833_v1, %v6703_v21  ;;  %v5571_v21 = vld [vmem:[%s6879_s6 + $0x28] sm:$0xff]  }
 0x948   :  { %v5837_v43 = vpop.eup %5836  ;;  %v3997_v49 = vmul.f32 %v5835_v34, %v5827_v12  ;;  %5168 = vmatpush3.bf16.msra.mxu0 %v5571_v21 }
 0x949   :  { %v3998_v0 = vadd.f32 %v3996_v5, %v3994_v40  ;;  %v3995_v53 = vmul.f32 %v5837_v43, %v6706_v60  ;;  %5169 = vmatprep.subr.bf16.mxu0 %v6892_v25  ;;  %v5572_v60 = vld [vmem:[%s6879_s6 + $0x30] sm:$0xff]  }
 0x94a   :  { %v5839_v59 = vpop.eup %5838 }
 0x94b   :  { %5840 = vtanh.f32 %v3998_v0  ;;  %v3999_v28 = vadd.f32 %v3997_v49, %v3995_v53 }
 0x94c   :  { %5842 = vrcp.f32 %v3979_v47  ;;  %5170 = vmatpush3.bf16.msra.mxu0 %v5572_v60 }
 0x94d   :  { %5844 = vtanh.f32 %v3999_v28  ;;  %5171 = vmatprep.subr.bf16.mxu0 %v6892_v25 }
 0x950   :  { %5172 = vmatpush3.bf16.msra.mxu0 %v5573_v17 }
 0x951   :  { %5197 = vmatprep.subr.bf16.mxu0 %v6892_v25 }
 0x955   :  { %v5841_v16 = vpop.eup %5840 }
 0x956   :  { %v5843_v13 = vpop.eup %5842  ;;  %v4002_v14 = vmul.f32 %v5841_v16, %v5839_v59 }
 0x957   :  { %v5845_v4 = vpop.eup %5844 }
 0x958   :  { %v4003_v3 = vmul.f32 %v5845_v4, %v5843_v13 }
 0x95a   :  { %v4004_v15 = vpack.c.bf16 %v4003_v3, %v4002_v14 }
 0x95c   :  { %5154 = vmatmul.mubr.bf16.vlgmr.msra.gmra.mrb[52].mxu1 %v4004_v15 }
 0x95d   :  { %5193 = vmatprep.mubr.msk.bf16.mxu1 %vm5918_vm2, %v6892_v25  ;;  %5178 = vmatpush3.bf16.msra.mxu1 %v5574_v46 }
 0x95e   :  { %5179 = vmatprep.subr.bf16.mxu1 %v6892_v25 }
 0x961   :  { %5180 = vmatpush3.bf16.msra.mxu1 %v5575_v19 }
 0x962   :  { %5181 = vmatprep.subr.bf16.mxu1 %v6892_v25 }
 0x965   :  { %5182 = vmatpush3.bf16.msra.mxu1 %v5576_v36 }
 0x966   :  { %5183 = vmatprep.subr.bf16.mxu1 %v6892_v25 }
 0x969   :  { %5184 = vmatpush3.bf16.msra.mxu1 %v5577_v38 }
 0x96a   :  { %5185 = vmatprep.subr.bf16.mxu1 %v6892_v25 }
 0x96d   :  { %5186 = vmatpush3.bf16.msra.mxu1 %v5578_v9 }
 0x96e   :  { %5187 = vmatprep.subr.bf16.mxu1 %v6892_v25 }
 0x971   :  { %5188 = vmatpush3.bf16.msra.mxu1 %v5579_v48 }
 0x972   :  { %5189 = vmatprep.subr.bf16.mxu1 %v6892_v25 }
 0x975   :  { %5190 = vmatpush3.bf16.msra.mxu1 %v5580_v52 }
 0x976   :  { %5191 = vmatprep.subr.bf16.mxu1 %v6892_v25 }
 0xa2f   :  { %v4089_v57 = vpop.f32.mrb[52].mxu1 }
 0xa30   :  { %v4096_v37 = vadd.f32 %v4089_v57, %v6759_v7  ;;  %v5155_v55 = vpop.f32.mrb[53].mxu1  ;;  %v5581_v7 = vld [vmem:[%s6879_s6 + $0x78] sm:$0xff]  }
 0xa31   :  { %v4092_v31 = vpop.f32.mrb[54].mxu1  ;;  %5192 = vmatpush3.bf16.msra.mxu1 %v5581_v7 }
 0xa32   :  { %v4109_v58 = vadd.f32 %v4853_v32, %v4096_v37  ;;  %v4097_v63 = vadd.f32 %v4092_v31, %v6762_v30  ;;  %v5156_v61 = vpop.f32.mrb[55].mxu1  ;;  %v5582_v30 = vld [vmem:[%s6881_s8] sm:$0xff]  }
 0xa34   :  { %v4110_v8 = vadd.f32 %v4853_v32, %v4097_v63  ;;  %v4111_v35 = vmax.f32 %v4109_v58, 0.0 }
 0xa36   :  { %v4112_v56 = vmax.f32 %v4110_v8, 0.0 }
 0xa38   :  { %v4113_v18 = vpack.c.bf16 %v4112_v56, %v4111_v35 }
 0xa3a   :  { %5174 = vmatmul.mubr.bf16.vlgmr.msra.gmra.mrb[48].mxu0 %v4113_v18 }
 0xa3b   :  { %5213 = vmatprep.mubr.msk.bf16.mxu0 %vm5918_vm2, %v6892_v25  ;;  %5198 = vmatpush3.bf16.msra.mxu0 %v5582_v30 }
 0xa3c   :  { %5199 = vmatprep.subr.bf16.mxu0 %v6892_v25 }
 0xa3f   :  { %5200 = vmatpush3.bf16.msra.mxu0 %v5583_v24 }
 0xa40   :  { %5201 = vmatprep.subr.bf16.mxu0 %v6892_v25 }
 0xa43   :  { %5202 = vmatpush3.bf16.msra.mxu0 %v5584_v2 }
 0xa44   :  { %5203 = vmatprep.subr.bf16.mxu0 %v6892_v25 }
 0xa47   :  { %5204 = vmatpush3.bf16.msra.mxu0 %v5585_v62 }
 0xa48   :  { %5205 = vmatprep.subr.bf16.mxu0 %v6892_v25 }
 0xa4b   :  { %5206 = vmatpush3.bf16.msra.mxu0 %v5586_v41 }
 0xa4c   :  { %5207 = vmatprep.subr.bf16.mxu0 %v6892_v25 }
 0xa4f   :  { %5208 = vmatpush3.bf16.msra.mxu0 %v5587_v26 }
 0xa50   :  { %5209 = vmatprep.subr.bf16.mxu0 %v6892_v25 }
 0xa53   :  { %5210 = vmatpush3.bf16.msra.mxu0 %v5588_v6 }
 0xa54   :  { %5211 = vmatprep.subr.bf16.mxu0 %v6892_v25  ;;  %v4889_v25 = vld [vmem:[#allocation4] ss:$0 sm:$0xff] }
 0xa57   :  { %5212 = vmatpush3.bf16.msra.mxu0 %v5589_v27 }
 0xb0d   :  { %v4219_v45 = vpop.f32.mrb[48].mxu0 }
 0xb0e   :  { %v4220_v54 = vadd.f32 %v4854_v42, %v4219_v45  ;;  %v5175_v33 = vpop.f32.mrb[49].mxu0 }
 0xb0f   :  { %v4222_v20 = vpop.f32.mrb[50].mxu0 }
 0xb10   :  { %v4223_v11 = vadd.f32 %v4854_v42, %v4222_v20  ;;  %v5176_v39 = vpop.f32.mrb[51].mxu0  ;;  %v4226_v22 = vmax.f32 %v4220_v54, 0.0 }
 0xb12   :  { %v4227_v10 = vmax.f32 %v4223_v11, 0.0 }
 0xb14   :  { %v4228_v50 = vpack.c.bf16 %v4227_v10, %v4226_v22 }
 0xb16   :  { %5194 = vmatmul.mubr.bf16.vlgmr.msra.gmra.mrb[56].mxu1 %v4228_v50 }
 0xbe9   :  { %v4336_v12 = vpop.f32.mrb[56].mxu1 }
 0xbea   :  { %v4337_v44 = vadd.f32 %v4880_v29, %v4336_v12  ;;  %v5195_v23 = vpop.f32.mrb[57].mxu1 }
 0xbeb   :  { %v4339_v1 = vpop.f32.mrb[58].mxu1 }
 0xbec   :  { %v4340_v51 = vadd.f32 %v4880_v29, %v4339_v1  ;;  %v5196_v5 = vpop.f32.mrb[59].mxu1  ;;  %v4343_v34 = vmax.f32 %v4337_v44, 0.0 }
 0xbee   :  { %v4344_v40 = vmax.f32 %v4340_v51, 0.0 }
 0xbf0   :  { %v4345_v43 = vpack.c.bf16 %v4344_v40, %v4343_v34 }
 0xbf2   :  { %5214 = vmatmul.mubr.bf16.vlgmr.msra.gmra.mrb[52].mxu0 %v4345_v43 }
 0xcc5   :  { %v4451_v47 = vpop.f32.mrb[52].mxu0 }
 0xcc6   :  { %v4452_v49 = vadd.f32 %v4889_v25, %v4451_v47  ;;  %v5215_v0 = vpop.f32.mrb[53].mxu0 }
 0xcc7   :  { %v4454_v53 = vpop.f32.mrb[54].mxu0 }
 0xcc8   :  { %4459 = vst.msk [vmem:[%s6883_s10] sm:$0xff] %vm4458_vm3, %v4452_v49  ;;  %v4455_v28 = vadd.f32 %v4889_v25, %v4454_v53  ;;  %v5216_v59 = vpop.f32.mrb[55].mxu0 }
 0xcca   :  { %4460 = vst.msk [vmem:[%s6883_s10 + $0x8] sm:$0xff] %vm4458_vm3, %v4455_v28 }
 0xccb   :  { %4465 = vsyncpa [#allocation6], 1 }
 0xccc   :  { %4466 = vsyncpa [#allocation8], 1 }

</bundles_post_ra>
